<compile_context>
chip_gen: v5e
topology: v5e:2x2
jax: 0.10.0
libtpu: 0.0.40
codegen_flags: <defaults>
</compile_context>

<pallas_src>
import math

import jax
import jax.numpy as jnp
from jax.experimental import pallas as pl
from jax.experimental.pallas import tpu as pltpu

_BN_EPS = 1e-5  # PyTorch BatchNorm1d default


def _bn_relu(z, gamma, beta):
    """BatchNorm1d (training mode, biased variance) + ReLU.

    Layout: features on sublanes, batch on lanes -> statistics are a lane
    reduction.  Single pass: sum(z) and sum(z*z) together.
    gamma/beta are per-feature column vectors (F, 1).
    """
    inv_n = 1.0 / z.shape[1]
    mu = jnp.sum(z, axis=1, keepdims=True) * inv_n
    ez2 = jnp.sum(z * z, axis=1, keepdims=True) * inv_n
    var = ez2 - mu * mu
    zn = (z - mu) * jax.lax.rsqrt(var + _BN_EPS)
    return jnp.maximum(zn * gamma + beta, 0.0)


def _make_kernel(timegrid, kappa, sigma, n_steps):
    tg = tuple(float(t) for t in timegrid)
    half_k2 = 0.5 * float(kappa) ** 2
    sigma = float(sigma)
    T = n_steps

    def kernel(x_ref, xi_ref, w_ref, vec_ref, v0w_ref, v0v_ref, v_ref, path_ref):
        # x_ref: (DP, Bs) f32  -- padded feature rows (D..DP-1) are exactly zero
        x = x_ref[...]
        path_ref[0, :, :] = x
        v = None                                     # defined at i == 0 by the v0 head

        for i in range(T):                           # static unroll over timegrid[:-1]
            Wl = w_ref[i]                            # (3, H, H) bf16: [W1^T | W2^T | W3^T] padded
            vec = vec_ref[i]                         # (H, 8)    f32 per-step vector slab
            g1, be1 = vec[:, 0:1], vec[:, 1:2]
            g2, be2 = vec[:, 2:3], vec[:, 3:4]
            b3, law = vec[:, 4:5], vec[:, 5:6]       # padded rows are zero

            # --- per-step gradient net: Linear -> BN -> ReLU (x2) -> Linear
            # (bias-free before BN: the Linear bias is cancelled by BN's mean
            #  subtraction in training mode)
            xb = x.astype(jnp.bfloat16)
            h1 = _bn_relu(
                jnp.dot(Wl[0], xb, preferred_element_type=jnp.float32), g1, be1)
            h2 = _bn_relu(
                jnp.dot(Wl[1], h1.astype(jnp.bfloat16),
                        preferred_element_type=jnp.float32), g2, be2)
            grad = jnp.dot(Wl[2], h2.astype(jnp.bfloat16),
                           preferred_element_type=jnp.float32) + b3     # (DP, Bs), pad rows 0

            h = tg[i + 1] - tg[i]
            sqh = sigma * math.sqrt(h)
            xi = xi_ref[i]                            # (DP, Bs), pad rows 0
            dx = x - law                              # pad rows 0

            if i == 0:
                # --- v0 head: (Linear -> BN -> ReLU) x3 on the initial state
                V = v0w_ref[...]                      # (2, H, H) bf16
                vv = v0v_ref[...]                     # (H, 8)    f32
                u = _bn_relu(
                    jnp.dot(V[0], xb, preferred_element_type=jnp.float32),
                    vv[:, 0:1], vv[:, 1:2])
                u = _bn_relu(
                    jnp.dot(V[1], u.astype(jnp.bfloat16),
                            preferred_element_type=jnp.float32),
                    vv[:, 2:3], vv[:, 3:4])
                # final Linear(H -> 1) as a sublane reduce (cheaper than a 1-row matmul)
                z3 = jnp.sum(u * vv[:, 4:5], axis=0, keepdims=True) + vv[0:1, 5:6]
                v = _bn_relu(z3, vv[1:2, 5:6], vv[2:3, 5:6])            # (1, Bs)

            # --- fused sublane reduction over features:
            #   -f*h + ito = sum( sqh*grad*xi - h*(kappa^2/2 * dx^2 + 1/2 * grad^2) )
            v = v + jnp.sum(sqh * grad * xi
                            - h * (half_k2 * dx * dx + 0.5 * grad * grad),
                            axis=0, keepdims=True)

            # --- Euler–Maruyama state update (alpha = -grad); pad rows stay zero
            x = x + sqh * xi - h * grad
            path_ref[i + 1, :, :] = x

        v_ref[...] = v                                # (1, Bs), lane-dense

    return kernel


def net_stacked_forward(params, x0, xi, law, timegrid, kappa, sigma,
                        num_batch_shards=1):
    """Returns (v, x_final, path) with the same semantics as the PyTorch forward
    (xi are the pre-sampled Brownian increments).

    num_batch_shards > 1 shards the Monte-Carlo batch across a "parallel" grid
    axis (uses both TensorCores on v7x).  NOTE: BatchNorm batch statistics are
    then computed per shard, which is a (small) semantic change vs. the
    full-batch PyTorch forward, so the default is 1.
    """
    B, D = x0.shape
    T = len(timegrid) - 1
    H = params["w1"].shape[-1]
    DP = H                                            # feature pad -> uniform (H, H) weight blocks
    assert D <= DP
    assert B % num_batch_shards == 0
    Bs = B // num_batch_shards
    assert Bs % 128 == 0, "per-shard batch must be a multiple of 128 lanes"

    f32 = jnp.float32

    def colvec(a, rows):                              # (T, 1, n) -> (T, rows, 1), zero-padded
        a = jnp.pad(a.astype(f32), ((0, 0), (0, 0), (0, rows - a.shape[-1])))
        return jnp.swapaxes(a, 1, 2)

    # --- packed, tile-aligned parameter slabs (few entry DMAs, free leading-axis slicing).
    #     Weights are stored transposed for the batch-on-lanes layout; padded
    #     rows/cols are exactly zero so padded features never contaminate the
    #     cost reduction or the state update.
    w1t = jnp.pad(jnp.swapaxes(params["w1"], 1, 2), ((0, 0), (0, 0), (0, DP - D)))  # (T,H,DP)
    w2t = jnp.swapaxes(params["w2"], 1, 2)                                          # (T,H,H)
    w3t = jnp.pad(jnp.swapaxes(params["w3"], 1, 2), ((0, 0), (0, DP - D), (0, 0)))  # (T,DP,H)
    w_slab = jnp.stack([w1t, w2t, w3t], axis=1).astype(jnp.bfloat16)                # (T,3,H,H)

    vec_slab = jnp.concatenate(
        [colvec(params["g1"], H), colvec(params["be1"], H),
         colvec(params["g2"], H), colvec(params["be2"], H),
         colvec(params["b3"], DP), colvec(law, DP),
         jnp.zeros((T, H, 2), f32)], axis=2)                                        # (T,H,8)

    vw1t = jnp.pad(params["vw1"].T, ((0, 0), (0, DP - D)))                          # (H,DP)
    vw2t = params["vw2"].T                                                          # (H,H)
    v0w_slab = jnp.stack([vw1t, vw2t], axis=0).astype(jnp.bfloat16)                 # (2,H,H)

    c5 = jnp.zeros((H, 1), f32)
    c5 = c5.at[0, 0].set(params["vb3"][0, 0])     # vb3 (BN-cancelled; kept, one-time)
    c5 = c5.at[1, 0].set(params["vg3"][0, 0])
    c5 = c5.at[2, 0].set(params["vbe3"][0, 0])
    v0v_slab = jnp.concatenate(
        [params["vg1"].T, params["vbe1"].T, params["vg2"].T, params["vbe2"].T,
         params["vw3"].astype(f32), c5, jnp.zeros((H, 2), f32)], axis=1)            # (H,8)

    # --- transposed, zero-padded state / noise: (features on sublanes, batch on lanes)
    x0_t = jnp.pad(x0.T, ((0, DP - D), (0, 0)))                                     # (DP,B)
    xi_t = jnp.pad(jnp.swapaxes(xi, 1, 2), ((0, 0), (0, DP - D), (0, 0)))           # (T,DP,B)

    inputs = (x0_t, xi_t, w_slab, vec_slab, v0w_slab, v0v_slab)

    out_shapes = (
        jax.ShapeDtypeStruct((1, B), f32),             # v     (lane-dense)
        jax.ShapeDtypeStruct((T + 1, DP, B), f32),     # path  (lane-dense, transposed)
    )

    in_specs = [
        pl.BlockSpec((DP, Bs), lambda c: (0, c)),
        pl.BlockSpec((T, DP, Bs), lambda c: (0, 0, c)),
        pl.BlockSpec(w_slab.shape, lambda c: (0, 0, 0, 0)),
        pl.BlockSpec(vec_slab.shape, lambda c: (0, 0, 0)),
        pl.BlockSpec(v0w_slab.shape, lambda c: (0, 0, 0)),
        pl.BlockSpec(v0v_slab.shape, lambda c: (0, 0)),
    ]
    out_specs = (
        pl.BlockSpec((1, Bs), lambda c: (0, c)),
        pl.BlockSpec((T + 1, DP, Bs), lambda c: (0, 0, c)),
    )

    kernel = _make_kernel(timegrid, kappa, sigma, T)

    v_t, path_t = pl.pallas_call(
        kernel,
        grid=(num_batch_shards,),
        in_specs=in_specs,
        out_specs=out_specs,
        out_shape=out_shapes,
        compiler_params=pltpu.CompilerParams(dimension_semantics=("parallel",)),
    )(*inputs)

    # Host-side (cheap XLA) un-transpose back to the PyTorch-layout outputs.
    v = v_t.T                                          # (B, 1)
    path = jnp.swapaxes(path_t[:, :D, :], 1, 2)        # (T+1, B, D)
    x_final = path[-1]                                 # == path[T]; x_out output dropped
    return v, x_final, path


def _uinit(key, shape, scale=0.3):
    return jax.random.uniform(key, shape, jnp.float32, -scale, scale)


def make_params(key, dim, T):
    H = dim + 10
    ks = jax.random.split(key, 14)
    ones = lambda s: jnp.ones(s, jnp.float32)
    zeros = lambda s: jnp.zeros(s, jnp.float32)
    return {
        # per-timestep gradient networks (stacked on leading T axis)
        "w1": _uinit(ks[0], (T, dim, H)), "b1": _uinit(ks[1], (T, 1, H)),
        "g1": ones((T, 1, H)),            "be1": zeros((T, 1, H)),
        "w2": _uinit(ks[2], (T, H, H)),   "b2": _uinit(ks[3], (T, 1, H)),
        "g2": ones((T, 1, H)),            "be2": zeros((T, 1, H)),
        "w3": _uinit(ks[4], (T, H, dim)), "b3": _uinit(ks[5], (T, 1, dim)),
        # v0 head (single set of weights)
        "vw1": _uinit(ks[6], (dim, H)),   "vb1": _uinit(ks[7], (1, H)),
        "vg1": ones((1, H)),              "vbe1": zeros((1, H)),
        "vw2": _uinit(ks[8], (H, H)),     "vb2": _uinit(ks[9], (1, H)),
        "vg2": ones((1, H)),              "vbe2": zeros((1, H)),
        "vw3": _uinit(ks[10], (H, 1)),    "vb3": _uinit(ks[11], (1, 1)),
        "vg3": ones((1, 1)),              "vbe3": zeros((1, 1)),
        # NOTE: b1/b2/vb1/vb2 are dead in the training-mode forward (cancelled
        # by BatchNorm's mean subtraction); kept only for parameter parity with
        # the PyTorch module — they are not passed to the kernel.
    }


if __name__ == "__main__":
    dim = 6
    B = 256                           # Monte-Carlo paths (lane-dense after transposition)
    n_points = 6                      # len(timegrid); T = 5 Euler steps
    T = n_points - 1
    timegrid = [0.1 * t for t in range(n_points)]
    kappa, sigma = 0.5, 1.0

    key = jax.random.PRNGKey(0)
    k_x, k_xi, k_law, k_par = jax.random.split(key, 4)

    x0 = jax.random.normal(k_x, (B, dim), jnp.float32)
    # pre-sampled Brownian increments (torch.randn inside the PyTorch forward)
    xi = jax.random.normal(k_xi, (T, B, dim), jnp.float32)
    law = 0.1 * jax.random.normal(k_law, (T, 1, dim), jnp.float32)
    params = make_params(k_par, dim, T)

    # num_batch_shards=1 keeps BatchNorm batch statistics identical to the
    # full-batch PyTorch forward; on v7x, num_batch_shards=2 uses both TCs.
    v, x_final, path = net_stacked_forward(params, x0, xi, law, timegrid,
                                           kappa, sigma, num_batch_shards=1)
    jax.block_until_ready((v, x_final, path))

    assert v.shape == (B, 1) and x_final.shape == (B, dim) and path.shape == (T + 1, B, dim)
    assert bool(jnp.all(jnp.isfinite(v))) and bool(jnp.all(jnp.isfinite(path)))
    print("KERNEL_OK")
</pallas_src>

<mosaic_0001>
module attributes {stable_mosaic.version = 11 : i64} {
  func.func @kernel(%arg0: i32, %arg1: memref<16x256xf32, #tpu.memory_space<vmem>>, %arg2: memref<5x16x256xf32, #tpu.memory_space<vmem>>, %arg3: memref<5x3x16x16xbf16, #tpu.memory_space<vmem>>, %arg4: memref<5x16x8xf32, #tpu.memory_space<vmem>>, %arg5: memref<2x16x16xbf16, #tpu.memory_space<vmem>>, %arg6: memref<16x8xf32, #tpu.memory_space<vmem>>, %arg7: memref<1x256xf32, #tpu.memory_space<vmem>>, %arg8: memref<6x16x256xf32, #tpu.memory_space<vmem>>) attributes {dimension_semantics = [#tpu.dimension_semantics<parallel>], iteration_bounds = array<i64: 1>, scalar_prefetch = 0 : i64, scratch_operands = 0 : i64, tpu.core_type = #tpu.core_type<tc>, window_params = [{transform_indices = @transform_0, window_bounds = array<i64: 16, 256>}, {transform_indices = @transform_1, window_bounds = array<i64: 5, 16, 256>}, {pipeline_mode = #tpu.pipeline_mode<synchronous>, transform_indices = @transform_2, window_bounds = array<i64: 5, 3, 16, 16>}, {pipeline_mode = #tpu.pipeline_mode<synchronous>, transform_indices = @transform_3, window_bounds = array<i64: 5, 16, 8>}, {pipeline_mode = #tpu.pipeline_mode<synchronous>, transform_indices = @transform_4, window_bounds = array<i64: 2, 16, 16>}, {pipeline_mode = #tpu.pipeline_mode<synchronous>, transform_indices = @transform_5, window_bounds = array<i64: 16, 8>}, {transform_indices = @transform_6, window_bounds = array<i64: 1, 256>}, {transform_indices = @transform_7, window_bounds = array<i64: 6, 16, 256>}]} {
    %c0 = arith.constant 0 : index
    %c0_0 = arith.constant 0 : index
    %0 = vector.load %arg1[%c0, %c0_0] : memref<16x256xf32, #tpu.memory_space<vmem>>, vector<16x256xf32>
    %c0_1 = arith.constant 0 : index
    %c0_2 = arith.constant 0 : index
    %c0_3 = arith.constant 0 : index
    %1 = vector.load %arg8[%c0_1, %c0_2, %c0_3] : memref<6x16x256xf32, #tpu.memory_space<vmem>>, vector<1x16x256xf32>
    %2 = vector.shape_cast %1 : vector<1x16x256xf32> to vector<16x256xf32>
    %3 = vector.shape_cast %0 : vector<16x256xf32> to vector<1x16x256xf32>
    tpu.vector_store %arg8[%c0_1, %c0_2, %c0_3], %3 {strides = array<i32>} : memref<6x16x256xf32, #tpu.memory_space<vmem>>, vector<1x16x256xf32>,
    %c0_4 = arith.constant 0 : index
    %c0_5 = arith.constant 0 : index
    %c0_6 = arith.constant 0 : index
    %c0_7 = arith.constant 0 : index
    %4 = vector.load %arg3[%c0_4, %c0_5, %c0_6, %c0_7] : memref<5x3x16x16xbf16, #tpu.memory_space<vmem>>, vector<1x3x16x16xbf16>
    %5 = vector.shape_cast %4 : vector<1x3x16x16xbf16> to vector<3x16x16xbf16>
    %c0_8 = arith.constant 0 : index
    %c0_9 = arith.constant 0 : index
    %c0_10 = arith.constant 0 : index
    %6 = vector.load %arg4[%c0_8, %c0_9, %c0_10] : memref<5x16x8xf32, #tpu.memory_space<vmem>>, vector<1x16x8xf32>
    %7 = vector.shape_cast %6 : vector<1x16x8xf32> to vector<16x8xf32>
    %8 = vector.extract_strided_slice %7 {offsets = [0, 0], sizes = [16, 1], strides = [1, 1]} : vector<16x8xf32> to vector<16x1xf32>
    %9 = vector.extract_strided_slice %7 {offsets = [0, 1], sizes = [16, 1], strides = [1, 1]} : vector<16x8xf32> to vector<16x1xf32>
    %10 = vector.extract_strided_slice %7 {offsets = [0, 2], sizes = [16, 1], strides = [1, 1]} : vector<16x8xf32> to vector<16x1xf32>
    %11 = vector.extract_strided_slice %7 {offsets = [0, 3], sizes = [16, 1], strides = [1, 1]} : vector<16x8xf32> to vector<16x1xf32>
    %12 = vector.extract_strided_slice %7 {offsets = [0, 4], sizes = [16, 1], strides = [1, 1]} : vector<16x8xf32> to vector<16x1xf32>
    %13 = vector.extract_strided_slice %7 {offsets = [0, 5], sizes = [16, 1], strides = [1, 1]} : vector<16x8xf32> to vector<16x1xf32>
    %14 = arith.truncf %0 : vector<16x256xf32> to vector<16x256xbf16>
    %15 = vector.extract_strided_slice %5 {offsets = [0, 0, 0], sizes = [1, 16, 16], strides = [1, 1, 1]} : vector<3x16x16xbf16> to vector<1x16x16xbf16>
    %16 = vector.shape_cast %15 : vector<1x16x16xbf16> to vector<16x16xbf16>
    %cst = arith.constant dense<0.000000e+00> : vector<16x256xf32>
    %17 = tpu.matmul %16, %14, %cst {dimension_numbers = #tpu.dot_dimension_numbers<[1], [0], [0], [1], [0, 0, 1, 1], [], []>} : vector<16x16xbf16>, vector<16x256xbf16>, vector<16x256xf32> -> vector<16x256xf32>
    %cst_11 = arith.constant dense<0.000000e+00> : vector<16xf32>
    %18 = vector.multi_reduction <add>, %17, %cst_11 [1] : vector<16x256xf32> to vector<16xf32>
    %19 = vector.shape_cast %18 : vector<16xf32> to vector<16x1xf32>
    %cst_12 = arith.constant 3.906250e-03 : f32
    %20 = vector.broadcast %cst_12 : f32 to vector<16x1xf32>
    %21 = arith.mulf %19, %20 : vector<16x1xf32>
    %22 = arith.mulf %17, %17 : vector<16x256xf32>
    %cst_13 = arith.constant dense<0.000000e+00> : vector<16xf32>
    %23 = vector.multi_reduction <add>, %22, %cst_13 [1] : vector<16x256xf32> to vector<16xf32>
    %24 = vector.shape_cast %23 : vector<16xf32> to vector<16x1xf32>
    %cst_14 = arith.constant 3.906250e-03 : f32
    %25 = vector.broadcast %cst_14 : f32 to vector<16x1xf32>
    %26 = arith.mulf %24, %25 : vector<16x1xf32>
    %27 = arith.mulf %21, %21 : vector<16x1xf32>
    %28 = arith.subf %26, %27 : vector<16x1xf32>
    %29 = vector.broadcast %21 : vector<16x1xf32> to vector<16x256xf32>
    %30 = arith.subf %17, %29 : vector<16x256xf32>
    %cst_15 = arith.constant 9.99999974E-6 : f32
    %31 = vector.broadcast %cst_15 : f32 to vector<16x1xf32>
    %32 = arith.addf %28, %31 : vector<16x1xf32>
    %33 = math.rsqrt %32 : vector<16x1xf32>
    %34 = vector.broadcast %33 : vector<16x1xf32> to vector<16x256xf32>
    %35 = arith.mulf %30, %34 : vector<16x256xf32>
    %36 = vector.broadcast %8 : vector<16x1xf32> to vector<16x256xf32>
    %37 = arith.mulf %35, %36 : vector<16x256xf32>
    %38 = vector.broadcast %9 : vector<16x1xf32> to vector<16x256xf32>
    %39 = arith.addf %37, %38 : vector<16x256xf32>
    %cst_16 = arith.constant 0.000000e+00 : f32
    %40 = vector.broadcast %cst_16 : f32 to vector<16x256xf32>
    %41 = arith.maximumf %39, %40 : vector<16x256xf32>
    %42 = vector.extract_strided_slice %5 {offsets = [1, 0, 0], sizes = [1, 16, 16], strides = [1, 1, 1]} : vector<3x16x16xbf16> to vector<1x16x16xbf16>
    %43 = vector.shape_cast %42 : vector<1x16x16xbf16> to vector<16x16xbf16>
    %44 = arith.truncf %41 : vector<16x256xf32> to vector<16x256xbf16>
    %cst_17 = arith.constant dense<0.000000e+00> : vector<16x256xf32>
    %45 = tpu.matmul %43, %44, %cst_17 {dimension_numbers = #tpu.dot_dimension_numbers<[1], [0], [0], [1], [0, 0, 1, 1], [], []>} : vector<16x16xbf16>, vector<16x256xbf16>, vector<16x256xf32> -> vector<16x256xf32>
    %cst_18 = arith.constant dense<0.000000e+00> : vector<16xf32>
    %46 = vector.multi_reduction <add>, %45, %cst_18 [1] : vector<16x256xf32> to vector<16xf32>
    %47 = vector.shape_cast %46 : vector<16xf32> to vector<16x1xf32>
    %cst_19 = arith.constant 3.906250e-03 : f32
    %48 = vector.broadcast %cst_19 : f32 to vector<16x1xf32>
    %49 = arith.mulf %47, %48 : vector<16x1xf32>
    %50 = arith.mulf %45, %45 : vector<16x256xf32>
    %cst_20 = arith.constant dense<0.000000e+00> : vector<16xf32>
    %51 = vector.multi_reduction <add>, %50, %cst_20 [1] : vector<16x256xf32> to vector<16xf32>
    %52 = vector.shape_cast %51 : vector<16xf32> to vector<16x1xf32>
    %cst_21 = arith.constant 3.906250e-03 : f32
    %53 = vector.broadcast %cst_21 : f32 to vector<16x1xf32>
    %54 = arith.mulf %52, %53 : vector<16x1xf32>
    %55 = arith.mulf %49, %49 : vector<16x1xf32>
    %56 = arith.subf %54, %55 : vector<16x1xf32>
    %57 = vector.broadcast %49 : vector<16x1xf32> to vector<16x256xf32>
    %58 = arith.subf %45, %57 : vector<16x256xf32>
    %cst_22 = arith.constant 9.99999974E-6 : f32
    %59 = vector.broadcast %cst_22 : f32 to vector<16x1xf32>
    %60 = arith.addf %56, %59 : vector<16x1xf32>
    %61 = math.rsqrt %60 : vector<16x1xf32>
    %62 = vector.broadcast %61 : vector<16x1xf32> to vector<16x256xf32>
    %63 = arith.mulf %58, %62 : vector<16x256xf32>
    %64 = vector.broadcast %10 : vector<16x1xf32> to vector<16x256xf32>
    %65 = arith.mulf %63, %64 : vector<16x256xf32>
    %66 = vector.broadcast %11 : vector<16x1xf32> to vector<16x256xf32>
    %67 = arith.addf %65, %66 : vector<16x256xf32>
    %cst_23 = arith.constant 0.000000e+00 : f32
    %68 = vector.broadcast %cst_23 : f32 to vector<16x256xf32>
    %69 = arith.maximumf %67, %68 : vector<16x256xf32>
    %70 = vector.extract_strided_slice %5 {offsets = [2, 0, 0], sizes = [1, 16, 16], strides = [1, 1, 1]} : vector<3x16x16xbf16> to vector<1x16x16xbf16>
    %71 = vector.shape_cast %70 : vector<1x16x16xbf16> to vector<16x16xbf16>
    %72 = arith.truncf %69 : vector<16x256xf32> to vector<16x256xbf16>
    %cst_24 = arith.constant dense<0.000000e+00> : vector<16x256xf32>
    %73 = tpu.matmul %71, %72, %cst_24 {dimension_numbers = #tpu.dot_dimension_numbers<[1], [0], [0], [1], [0, 0, 1, 1], [], []>} : vector<16x16xbf16>, vector<16x256xbf16>, vector<16x256xf32> -> vector<16x256xf32>
    %74 = vector.broadcast %12 : vector<16x1xf32> to vector<16x256xf32>
    %75 = arith.addf %73, %74 : vector<16x256xf32>
    %c0_25 = arith.constant 0 : index
    %c0_26 = arith.constant 0 : index
    %c0_27 = arith.constant 0 : index
    %76 = vector.load %arg2[%c0_25, %c0_26, %c0_27] : memref<5x16x256xf32, #tpu.memory_space<vmem>>, vector<1x16x256xf32>
    %77 = vector.shape_cast %76 : vector<1x16x256xf32> to vector<16x256xf32>
    %78 = vector.broadcast %13 : vector<16x1xf32> to vector<16x256xf32>
    %79 = arith.subf %0, %78 : vector<16x256xf32>
    %c0_28 = arith.constant 0 : index
    %c0_29 = arith.constant 0 : index
    %c0_30 = arith.constant 0 : index
    %80 = vector.load %arg5[%c0_28, %c0_29, %c0_30] : memref<2x16x16xbf16, #tpu.memory_space<vmem>>, vector<2x16x16xbf16>
    %c0_31 = arith.constant 0 : index
    %c0_32 = arith.constant 0 : index
    %81 = vector.load %arg6[%c0_31, %c0_32] : memref<16x8xf32, #tpu.memory_space<vmem>>, vector<16x8xf32>
    %82 = vector.extract_strided_slice %80 {offsets = [0, 0, 0], sizes = [1, 16, 16], strides = [1, 1, 1]} : vector<2x16x16xbf16> to vector<1x16x16xbf16>
    %83 = vector.shape_cast %82 : vector<1x16x16xbf16> to vector<16x16xbf16>
    %cst_33 = arith.constant dense<0.000000e+00> : vector<16x256xf32>
    %84 = tpu.matmul %83, %14, %cst_33 {dimension_numbers = #tpu.dot_dimension_numbers<[1], [0], [0], [1], [0, 0, 1, 1], [], []>} : vector<16x16xbf16>, vector<16x256xbf16>, vector<16x256xf32> -> vector<16x256xf32>
    %85 = vector.extract_strided_slice %81 {offsets = [0, 0], sizes = [16, 1], strides = [1, 1]} : vector<16x8xf32> to vector<16x1xf32>
    %86 = vector.extract_strided_slice %81 {offsets = [0, 1], sizes = [16, 1], strides = [1, 1]} : vector<16x8xf32> to vector<16x1xf32>
    %cst_34 = arith.constant dense<0.000000e+00> : vector<16xf32>
    %87 = vector.multi_reduction <add>, %84, %cst_34 [1] : vector<16x256xf32> to vector<16xf32>
    %88 = vector.shape_cast %87 : vector<16xf32> to vector<16x1xf32>
    %cst_35 = arith.constant 3.906250e-03 : f32
    %89 = vector.broadcast %cst_35 : f32 to vector<16x1xf32>
    %90 = arith.mulf %88, %89 : vector<16x1xf32>
    %91 = arith.mulf %84, %84 : vector<16x256xf32>
    %cst_36 = arith.constant dense<0.000000e+00> : vector<16xf32>
    %92 = vector.multi_reduction <add>, %91, %cst_36 [1] : vector<16x256xf32> to vector<16xf32>
    %93 = vector.shape_cast %92 : vector<16xf32> to vector<16x1xf32>
    %cst_37 = arith.constant 3.906250e-03 : f32
    %94 = vector.broadcast %cst_37 : f32 to vector<16x1xf32>
    %95 = arith.mulf %93, %94 : vector<16x1xf32>
    %96 = arith.mulf %90, %90 : vector<16x1xf32>
    %97 = arith.subf %95, %96 : vector<16x1xf32>
    %98 = vector.broadcast %90 : vector<16x1xf32> to vector<16x256xf32>
    %99 = arith.subf %84, %98 : vector<16x256xf32>
    %cst_38 = arith.constant 9.99999974E-6 : f32
    %100 = vector.broadcast %cst_38 : f32 to vector<16x1xf32>
    %101 = arith.addf %97, %100 : vector<16x1xf32>
    %102 = math.rsqrt %101 : vector<16x1xf32>
    %103 = vector.broadcast %102 : vector<16x1xf32> to vector<16x256xf32>
    %104 = arith.mulf %99, %103 : vector<16x256xf32>
    %105 = vector.broadcast %85 : vector<16x1xf32> to vector<16x256xf32>
    %106 = arith.mulf %104, %105 : vector<16x256xf32>
    %107 = vector.broadcast %86 : vector<16x1xf32> to vector<16x256xf32>
    %108 = arith.addf %106, %107 : vector<16x256xf32>
    %cst_39 = arith.constant 0.000000e+00 : f32
    %109 = vector.broadcast %cst_39 : f32 to vector<16x256xf32>
    %110 = arith.maximumf %108, %109 : vector<16x256xf32>
    %111 = vector.extract_strided_slice %80 {offsets = [1, 0, 0], sizes = [1, 16, 16], strides = [1, 1, 1]} : vector<2x16x16xbf16> to vector<1x16x16xbf16>
    %112 = vector.shape_cast %111 : vector<1x16x16xbf16> to vector<16x16xbf16>
    %113 = arith.truncf %110 : vector<16x256xf32> to vector<16x256xbf16>
    %cst_40 = arith.constant dense<0.000000e+00> : vector<16x256xf32>
    %114 = tpu.matmul %112, %113, %cst_40 {dimension_numbers = #tpu.dot_dimension_numbers<[1], [0], [0], [1], [0, 0, 1, 1], [], []>} : vector<16x16xbf16>, vector<16x256xbf16>, vector<16x256xf32> -> vector<16x256xf32>
    %115 = vector.extract_strided_slice %81 {offsets = [0, 2], sizes = [16, 1], strides = [1, 1]} : vector<16x8xf32> to vector<16x1xf32>
    %116 = vector.extract_strided_slice %81 {offsets = [0, 3], sizes = [16, 1], strides = [1, 1]} : vector<16x8xf32> to vector<16x1xf32>
    %cst_41 = arith.constant dense<0.000000e+00> : vector<16xf32>
    %117 = vector.multi_reduction <add>, %114, %cst_41 [1] : vector<16x256xf32> to vector<16xf32>
    %118 = vector.shape_cast %117 : vector<16xf32> to vector<16x1xf32>
    %cst_42 = arith.constant 3.906250e-03 : f32
    %119 = vector.broadcast %cst_42 : f32 to vector<16x1xf32>
    %120 = arith.mulf %118, %119 : vector<16x1xf32>
    %121 = arith.mulf %114, %114 : vector<16x256xf32>
    %cst_43 = arith.constant dense<0.000000e+00> : vector<16xf32>
    %122 = vector.multi_reduction <add>, %121, %cst_43 [1] : vector<16x256xf32> to vector<16xf32>
    %123 = vector.shape_cast %122 : vector<16xf32> to vector<16x1xf32>
    %cst_44 = arith.constant 3.906250e-03 : f32
    %124 = vector.broadcast %cst_44 : f32 to vector<16x1xf32>
    %125 = arith.mulf %123, %124 : vector<16x1xf32>
    %126 = arith.mulf %120, %120 : vector<16x1xf32>
    %127 = arith.subf %125, %126 : vector<16x1xf32>
    %128 = vector.broadcast %120 : vector<16x1xf32> to vector<16x256xf32>
    %129 = arith.subf %114, %128 : vector<16x256xf32>
    %cst_45 = arith.constant 9.99999974E-6 : f32
    %130 = vector.broadcast %cst_45 : f32 to vector<16x1xf32>
    %131 = arith.addf %127, %130 : vector<16x1xf32>
    %132 = math.rsqrt %131 : vector<16x1xf32>
    %133 = vector.broadcast %132 : vector<16x1xf32> to vector<16x256xf32>
    %134 = arith.mulf %129, %133 : vector<16x256xf32>
    %135 = vector.broadcast %115 : vector<16x1xf32> to vector<16x256xf32>
    %136 = arith.mulf %134, %135 : vector<16x256xf32>
    %137 = vector.broadcast %116 : vector<16x1xf32> to vector<16x256xf32>
    %138 = arith.addf %136, %137 : vector<16x256xf32>
    %cst_46 = arith.constant 0.000000e+00 : f32
    %139 = vector.broadcast %cst_46 : f32 to vector<16x256xf32>
    %140 = arith.maximumf %138, %139 : vector<16x256xf32>
    %141 = vector.extract_strided_slice %81 {offsets = [0, 4], sizes = [16, 1], strides = [1, 1]} : vector<16x8xf32> to vector<16x1xf32>
    %142 = vector.broadcast %141 : vector<16x1xf32> to vector<16x256xf32>
    %143 = arith.mulf %140, %142 : vector<16x256xf32>
    %cst_47 = arith.constant dense<0.000000e+00> : vector<256xf32>
    %144 = vector.multi_reduction <add>, %143, %cst_47 [0] : vector<16x256xf32> to vector<256xf32>
    %145 = vector.shape_cast %144 : vector<256xf32> to vector<1x256xf32>
    %146 = vector.extract_strided_slice %81 {offsets = [0, 5], sizes = [1, 1], strides = [1, 1]} : vector<16x8xf32> to vector<1x1xf32>
    %147 = vector.broadcast %146 : vector<1x1xf32> to vector<1x256xf32>
    %148 = arith.addf %145, %147 : vector<1x256xf32>
    %149 = vector.extract_strided_slice %81 {offsets = [1, 5], sizes = [1, 1], strides = [1, 1]} : vector<16x8xf32> to vector<1x1xf32>
    %150 = vector.extract_strided_slice %81 {offsets = [2, 5], sizes = [1, 1], strides = [1, 1]} : vector<16x8xf32> to vector<1x1xf32>
    %cst_48 = arith.constant dense<0.000000e+00> : vector<1xf32>
    %151 = vector.multi_reduction <add>, %148, %cst_48 [1] : vector<1x256xf32> to vector<1xf32>
    %152 = vector.shape_cast %151 : vector<1xf32> to vector<1x1xf32>
    %cst_49 = arith.constant 3.906250e-03 : f32
    %153 = vector.broadcast %cst_49 : f32 to vector<1x1xf32>
    %154 = arith.mulf %152, %153 : vector<1x1xf32>
    %155 = arith.mulf %148, %148 : vector<1x256xf32>
    %cst_50 = arith.constant dense<0.000000e+00> : vector<1xf32>
    %156 = vector.multi_reduction <add>, %155, %cst_50 [1] : vector<1x256xf32> to vector<1xf32>
    %157 = vector.shape_cast %156 : vector<1xf32> to vector<1x1xf32>
    %cst_51 = arith.constant 3.906250e-03 : f32
    %158 = vector.broadcast %cst_51 : f32 to vector<1x1xf32>
    %159 = arith.mulf %157, %158 : vector<1x1xf32>
    %160 = arith.mulf %154, %154 : vector<1x1xf32>
    %161 = arith.subf %159, %160 : vector<1x1xf32>
    %162 = vector.broadcast %154 : vector<1x1xf32> to vector<1x256xf32>
    %163 = arith.subf %148, %162 : vector<1x256xf32>
    %cst_52 = arith.constant 9.99999974E-6 : f32
    %164 = vector.broadcast %cst_52 : f32 to vector<1x1xf32>
    %165 = arith.addf %161, %164 : vector<1x1xf32>
    %166 = math.rsqrt %165 : vector<1x1xf32>
    %167 = vector.broadcast %166 : vector<1x1xf32> to vector<1x256xf32>
    %168 = arith.mulf %163, %167 : vector<1x256xf32>
    %169 = vector.broadcast %149 : vector<1x1xf32> to vector<1x256xf32>
    %170 = arith.mulf %168, %169 : vector<1x256xf32>
    %171 = vector.broadcast %150 : vector<1x1xf32> to vector<1x256xf32>
    %172 = arith.addf %170, %171 : vector<1x256xf32>
    %cst_53 = arith.constant 0.000000e+00 : f32
    %173 = vector.broadcast %cst_53 : f32 to vector<1x256xf32>
    %174 = arith.maximumf %172, %173 : vector<1x256xf32>
    %cst_54 = arith.constant 0.316227764 : f32
    %175 = vector.broadcast %cst_54 : f32 to vector<16x256xf32>
    %176 = arith.mulf %175, %75 : vector<16x256xf32>
    %177 = arith.mulf %176, %77 : vector<16x256xf32>
    %cst_55 = arith.constant 1.250000e-01 : f32
    %178 = vector.broadcast %cst_55 : f32 to vector<16x256xf32>
    %179 = arith.mulf %178, %79 : vector<16x256xf32>
    %180 = arith.mulf %179, %79 : vector<16x256xf32>
    %cst_56 = arith.constant 5.000000e-01 : f32
    %181 = vector.broadcast %cst_56 : f32 to vector<16x256xf32>
    %182 = arith.mulf %181, %75 : vector<16x256xf32>
    %183 = arith.mulf %182, %75 : vector<16x256xf32>
    %184 = arith.addf %180, %183 : vector<16x256xf32>
    %cst_57 = arith.constant 1.000000e-01 : f32
    %185 = vector.broadcast %cst_57 : f32 to vector<16x256xf32>
    %186 = arith.mulf %185, %184 : vector<16x256xf32>
    %187 = arith.subf %177, %186 : vector<16x256xf32>
    %cst_58 = arith.constant dense<0.000000e+00> : vector<256xf32>
    %188 = vector.multi_reduction <add>, %187, %cst_58 [0] : vector<16x256xf32> to vector<256xf32>
    %189 = vector.shape_cast %188 : vector<256xf32> to vector<1x256xf32>
    %190 = arith.addf %174, %189 : vector<1x256xf32>
    %cst_59 = arith.constant 0.316227764 : f32
    %191 = vector.broadcast %cst_59 : f32 to vector<16x256xf32>
    %192 = arith.mulf %191, %77 : vector<16x256xf32>
    %193 = arith.addf %0, %192 : vector<16x256xf32>
    %cst_60 = arith.constant 1.000000e-01 : f32
    %194 = vector.broadcast %cst_60 : f32 to vector<16x256xf32>
    %195 = arith.mulf %194, %75 : vector<16x256xf32>
    %196 = arith.subf %193, %195 : vector<16x256xf32>
    %c1 = arith.constant 1 : index
    %c0_61 = arith.constant 0 : index
    %c0_62 = arith.constant 0 : index
    %197 = vector.load %arg8[%c1, %c0_61, %c0_62] : memref<6x16x256xf32, #tpu.memory_space<vmem>>, vector<1x16x256xf32>
    %198 = vector.shape_cast %197 : vector<1x16x256xf32> to vector<16x256xf32>
    %199 = vector.shape_cast %196 : vector<16x256xf32> to vector<1x16x256xf32>
    tpu.vector_store %arg8[%c1, %c0_61, %c0_62], %199 {strides = array<i32>} : memref<6x16x256xf32, #tpu.memory_space<vmem>>, vector<1x16x256xf32>,
    %c1_63 = arith.constant 1 : index
    %c0_64 = arith.constant 0 : index
    %c0_65 = arith.constant 0 : index
    %c0_66 = arith.constant 0 : index
    %200 = vector.load %arg3[%c1_63, %c0_64, %c0_65, %c0_66] : memref<5x3x16x16xbf16, #tpu.memory_space<vmem>>, vector<1x3x16x16xbf16>
    %201 = vector.shape_cast %200 : vector<1x3x16x16xbf16> to vector<3x16x16xbf16>
    %c1_67 = arith.constant 1 : index
    %c0_68 = arith.constant 0 : index
    %c0_69 = arith.constant 0 : index
    %202 = vector.load %arg4[%c1_67, %c0_68, %c0_69] : memref<5x16x8xf32, #tpu.memory_space<vmem>>, vector<1x16x8xf32>
    %203 = vector.shape_cast %202 : vector<1x16x8xf32> to vector<16x8xf32>
    %204 = vector.extract_strided_slice %203 {offsets = [0, 0], sizes = [16, 1], strides = [1, 1]} : vector<16x8xf32> to vector<16x1xf32>
    %205 = vector.extract_strided_slice %203 {offsets = [0, 1], sizes = [16, 1], strides = [1, 1]} : vector<16x8xf32> to vector<16x1xf32>
    %206 = vector.extract_strided_slice %203 {offsets = [0, 2], sizes = [16, 1], strides = [1, 1]} : vector<16x8xf32> to vector<16x1xf32>
    %207 = vector.extract_strided_slice %203 {offsets = [0, 3], sizes = [16, 1], strides = [1, 1]} : vector<16x8xf32> to vector<16x1xf32>
    %208 = vector.extract_strided_slice %203 {offsets = [0, 4], sizes = [16, 1], strides = [1, 1]} : vector<16x8xf32> to vector<16x1xf32>
    %209 = vector.extract_strided_slice %203 {offsets = [0, 5], sizes = [16, 1], strides = [1, 1]} : vector<16x8xf32> to vector<16x1xf32>
    %210 = arith.truncf %196 : vector<16x256xf32> to vector<16x256xbf16>
    %211 = vector.extract_strided_slice %201 {offsets = [0, 0, 0], sizes = [1, 16, 16], strides = [1, 1, 1]} : vector<3x16x16xbf16> to vector<1x16x16xbf16>
    %212 = vector.shape_cast %211 : vector<1x16x16xbf16> to vector<16x16xbf16>
    %cst_70 = arith.constant dense<0.000000e+00> : vector<16x256xf32>
    %213 = tpu.matmul %212, %210, %cst_70 {dimension_numbers = #tpu.dot_dimension_numbers<[1], [0], [0], [1], [0, 0, 1, 1], [], []>} : vector<16x16xbf16>, vector<16x256xbf16>, vector<16x256xf32> -> vector<16x256xf32>
    %cst_71 = arith.constant dense<0.000000e+00> : vector<16xf32>
    %214 = vector.multi_reduction <add>, %213, %cst_71 [1] : vector<16x256xf32> to vector<16xf32>
    %215 = vector.shape_cast %214 : vector<16xf32> to vector<16x1xf32>
    %cst_72 = arith.constant 3.906250e-03 : f32
    %216 = vector.broadcast %cst_72 : f32 to vector<16x1xf32>
    %217 = arith.mulf %215, %216 : vector<16x1xf32>
    %218 = arith.mulf %213, %213 : vector<16x256xf32>
    %cst_73 = arith.constant dense<0.000000e+00> : vector<16xf32>
    %219 = vector.multi_reduction <add>, %218, %cst_73 [1] : vector<16x256xf32> to vector<16xf32>
    %220 = vector.shape_cast %219 : vector<16xf32> to vector<16x1xf32>
    %cst_74 = arith.constant 3.906250e-03 : f32
    %221 = vector.broadcast %cst_74 : f32 to vector<16x1xf32>
    %222 = arith.mulf %220, %221 : vector<16x1xf32>
    %223 = arith.mulf %217, %217 : vector<16x1xf32>
    %224 = arith.subf %222, %223 : vector<16x1xf32>
    %225 = vector.broadcast %217 : vector<16x1xf32> to vector<16x256xf32>
    %226 = arith.subf %213, %225 : vector<16x256xf32>
    %cst_75 = arith.constant 9.99999974E-6 : f32
    %227 = vector.broadcast %cst_75 : f32 to vector<16x1xf32>
    %228 = arith.addf %224, %227 : vector<16x1xf32>
    %229 = math.rsqrt %228 : vector<16x1xf32>
    %230 = vector.broadcast %229 : vector<16x1xf32> to vector<16x256xf32>
    %231 = arith.mulf %226, %230 : vector<16x256xf32>
    %232 = vector.broadcast %204 : vector<16x1xf32> to vector<16x256xf32>
    %233 = arith.mulf %231, %232 : vector<16x256xf32>
    %234 = vector.broadcast %205 : vector<16x1xf32> to vector<16x256xf32>
    %235 = arith.addf %233, %234 : vector<16x256xf32>
    %cst_76 = arith.constant 0.000000e+00 : f32
    %236 = vector.broadcast %cst_76 : f32 to vector<16x256xf32>
    %237 = arith.maximumf %235, %236 : vector<16x256xf32>
    %238 = vector.extract_strided_slice %201 {offsets = [1, 0, 0], sizes = [1, 16, 16], strides = [1, 1, 1]} : vector<3x16x16xbf16> to vector<1x16x16xbf16>
    %239 = vector.shape_cast %238 : vector<1x16x16xbf16> to vector<16x16xbf16>
    %240 = arith.truncf %237 : vector<16x256xf32> to vector<16x256xbf16>
    %cst_77 = arith.constant dense<0.000000e+00> : vector<16x256xf32>
    %241 = tpu.matmul %239, %240, %cst_77 {dimension_numbers = #tpu.dot_dimension_numbers<[1], [0], [0], [1], [0, 0, 1, 1], [], []>} : vector<16x16xbf16>, vector<16x256xbf16>, vector<16x256xf32> -> vector<16x256xf32>
    %cst_78 = arith.constant dense<0.000000e+00> : vector<16xf32>
    %242 = vector.multi_reduction <add>, %241, %cst_78 [1] : vector<16x256xf32> to vector<16xf32>
    %243 = vector.shape_cast %242 : vector<16xf32> to vector<16x1xf32>
    %cst_79 = arith.constant 3.906250e-03 : f32
    %244 = vector.broadcast %cst_79 : f32 to vector<16x1xf32>
    %245 = arith.mulf %243, %244 : vector<16x1xf32>
    %246 = arith.mulf %241, %241 : vector<16x256xf32>
    %cst_80 = arith.constant dense<0.000000e+00> : vector<16xf32>
    %247 = vector.multi_reduction <add>, %246, %cst_80 [1] : vector<16x256xf32> to vector<16xf32>
    %248 = vector.shape_cast %247 : vector<16xf32> to vector<16x1xf32>
    %cst_81 = arith.constant 3.906250e-03 : f32
    %249 = vector.broadcast %cst_81 : f32 to vector<16x1xf32>
    %250 = arith.mulf %248, %249 : vector<16x1xf32>
    %251 = arith.mulf %245, %245 : vector<16x1xf32>
    %252 = arith.subf %250, %251 : vector<16x1xf32>
    %253 = vector.broadcast %245 : vector<16x1xf32> to vector<16x256xf32>
    %254 = arith.subf %241, %253 : vector<16x256xf32>
    %cst_82 = arith.constant 9.99999974E-6 : f32
    %255 = vector.broadcast %cst_82 : f32 to vector<16x1xf32>
    %256 = arith.addf %252, %255 : vector<16x1xf32>
    %257 = math.rsqrt %256 : vector<16x1xf32>
    %258 = vector.broadcast %257 : vector<16x1xf32> to vector<16x256xf32>
    %259 = arith.mulf %254, %258 : vector<16x256xf32>
    %260 = vector.broadcast %206 : vector<16x1xf32> to vector<16x256xf32>
    %261 = arith.mulf %259, %260 : vector<16x256xf32>
    %262 = vector.broadcast %207 : vector<16x1xf32> to vector<16x256xf32>
    %263 = arith.addf %261, %262 : vector<16x256xf32>
    %cst_83 = arith.constant 0.000000e+00 : f32
    %264 = vector.broadcast %cst_83 : f32 to vector<16x256xf32>
    %265 = arith.maximumf %263, %264 : vector<16x256xf32>
    %266 = vector.extract_strided_slice %201 {offsets = [2, 0, 0], sizes = [1, 16, 16], strides = [1, 1, 1]} : vector<3x16x16xbf16> to vector<1x16x16xbf16>
    %267 = vector.shape_cast %266 : vector<1x16x16xbf16> to vector<16x16xbf16>
    %268 = arith.truncf %265 : vector<16x256xf32> to vector<16x256xbf16>
    %cst_84 = arith.constant dense<0.000000e+00> : vector<16x256xf32>
    %269 = tpu.matmul %267, %268, %cst_84 {dimension_numbers = #tpu.dot_dimension_numbers<[1], [0], [0], [1], [0, 0, 1, 1], [], []>} : vector<16x16xbf16>, vector<16x256xbf16>, vector<16x256xf32> -> vector<16x256xf32>
    %270 = vector.broadcast %208 : vector<16x1xf32> to vector<16x256xf32>
    %271 = arith.addf %269, %270 : vector<16x256xf32>
    %c1_85 = arith.constant 1 : index
    %c0_86 = arith.constant 0 : index
    %c0_87 = arith.constant 0 : index
    %272 = vector.load %arg2[%c1_85, %c0_86, %c0_87] : memref<5x16x256xf32, #tpu.memory_space<vmem>>, vector<1x16x256xf32>
    %273 = vector.shape_cast %272 : vector<1x16x256xf32> to vector<16x256xf32>
    %274 = vector.broadcast %209 : vector<16x1xf32> to vector<16x256xf32>
    %275 = arith.subf %196, %274 : vector<16x256xf32>
    %cst_88 = arith.constant 0.316227764 : f32
    %276 = vector.broadcast %cst_88 : f32 to vector<16x256xf32>
    %277 = arith.mulf %276, %271 : vector<16x256xf32>
    %278 = arith.mulf %277, %273 : vector<16x256xf32>
    %cst_89 = arith.constant 1.250000e-01 : f32
    %279 = vector.broadcast %cst_89 : f32 to vector<16x256xf32>
    %280 = arith.mulf %279, %275 : vector<16x256xf32>
    %281 = arith.mulf %280, %275 : vector<16x256xf32>
    %cst_90 = arith.constant 5.000000e-01 : f32
    %282 = vector.broadcast %cst_90 : f32 to vector<16x256xf32>
    %283 = arith.mulf %282, %271 : vector<16x256xf32>
    %284 = arith.mulf %283, %271 : vector<16x256xf32>
    %285 = arith.addf %281, %284 : vector<16x256xf32>
    %cst_91 = arith.constant 1.000000e-01 : f32
    %286 = vector.broadcast %cst_91 : f32 to vector<16x256xf32>
    %287 = arith.mulf %286, %285 : vector<16x256xf32>
    %288 = arith.subf %278, %287 : vector<16x256xf32>
    %cst_92 = arith.constant dense<0.000000e+00> : vector<256xf32>
    %289 = vector.multi_reduction <add>, %288, %cst_92 [0] : vector<16x256xf32> to vector<256xf32>
    %290 = vector.shape_cast %289 : vector<256xf32> to vector<1x256xf32>
    %291 = arith.addf %190, %290 : vector<1x256xf32>
    %cst_93 = arith.constant 0.316227764 : f32
    %292 = vector.broadcast %cst_93 : f32 to vector<16x256xf32>
    %293 = arith.mulf %292, %273 : vector<16x256xf32>
    %294 = arith.addf %196, %293 : vector<16x256xf32>
    %cst_94 = arith.constant 1.000000e-01 : f32
    %295 = vector.broadcast %cst_94 : f32 to vector<16x256xf32>
    %296 = arith.mulf %295, %271 : vector<16x256xf32>
    %297 = arith.subf %294, %296 : vector<16x256xf32>
    %c2 = arith.constant 2 : index
    %c0_95 = arith.constant 0 : index
    %c0_96 = arith.constant 0 : index
    %298 = vector.load %arg8[%c2, %c0_95, %c0_96] : memref<6x16x256xf32, #tpu.memory_space<vmem>>, vector<1x16x256xf32>
    %299 = vector.shape_cast %298 : vector<1x16x256xf32> to vector<16x256xf32>
    %300 = vector.shape_cast %297 : vector<16x256xf32> to vector<1x16x256xf32>
    tpu.vector_store %arg8[%c2, %c0_95, %c0_96], %300 {strides = array<i32>} : memref<6x16x256xf32, #tpu.memory_space<vmem>>, vector<1x16x256xf32>,
    %c2_97 = arith.constant 2 : index
    %c0_98 = arith.constant 0 : index
    %c0_99 = arith.constant 0 : index
    %c0_100 = arith.constant 0 : index
    %301 = vector.load %arg3[%c2_97, %c0_98, %c0_99, %c0_100] : memref<5x3x16x16xbf16, #tpu.memory_space<vmem>>, vector<1x3x16x16xbf16>
    %302 = vector.shape_cast %301 : vector<1x3x16x16xbf16> to vector<3x16x16xbf16>
    %c2_101 = arith.constant 2 : index
    %c0_102 = arith.constant 0 : index
    %c0_103 = arith.constant 0 : index
    %303 = vector.load %arg4[%c2_101, %c0_102, %c0_103] : memref<5x16x8xf32, #tpu.memory_space<vmem>>, vector<1x16x8xf32>
    %304 = vector.shape_cast %303 : vector<1x16x8xf32> to vector<16x8xf32>
    %305 = vector.extract_strided_slice %304 {offsets = [0, 0], sizes = [16, 1], strides = [1, 1]} : vector<16x8xf32> to vector<16x1xf32>
    %306 = vector.extract_strided_slice %304 {offsets = [0, 1], sizes = [16, 1], strides = [1, 1]} : vector<16x8xf32> to vector<16x1xf32>
    %307 = vector.extract_strided_slice %304 {offsets = [0, 2], sizes = [16, 1], strides = [1, 1]} : vector<16x8xf32> to vector<16x1xf32>
    %308 = vector.extract_strided_slice %304 {offsets = [0, 3], sizes = [16, 1], strides = [1, 1]} : vector<16x8xf32> to vector<16x1xf32>
    %309 = vector.extract_strided_slice %304 {offsets = [0, 4], sizes = [16, 1], strides = [1, 1]} : vector<16x8xf32> to vector<16x1xf32>
    %310 = vector.extract_strided_slice %304 {offsets = [0, 5], sizes = [16, 1], strides = [1, 1]} : vector<16x8xf32> to vector<16x1xf32>
    %311 = arith.truncf %297 : vector<16x256xf32> to vector<16x256xbf16>
    %312 = vector.extract_strided_slice %302 {offsets = [0, 0, 0], sizes = [1, 16, 16], strides = [1, 1, 1]} : vector<3x16x16xbf16> to vector<1x16x16xbf16>
    %313 = vector.shape_cast %312 : vector<1x16x16xbf16> to vector<16x16xbf16>
    %cst_104 = arith.constant dense<0.000000e+00> : vector<16x256xf32>
    %314 = tpu.matmul %313, %311, %cst_104 {dimension_numbers = #tpu.dot_dimension_numbers<[1], [0], [0], [1], [0, 0, 1, 1], [], []>} : vector<16x16xbf16>, vector<16x256xbf16>, vector<16x256xf32> -> vector<16x256xf32>
    %cst_105 = arith.constant dense<0.000000e+00> : vector<16xf32>
    %315 = vector.multi_reduction <add>, %314, %cst_105 [1] : vector<16x256xf32> to vector<16xf32>
    %316 = vector.shape_cast %315 : vector<16xf32> to vector<16x1xf32>
    %cst_106 = arith.constant 3.906250e-03 : f32
    %317 = vector.broadcast %cst_106 : f32 to vector<16x1xf32>
    %318 = arith.mulf %316, %317 : vector<16x1xf32>
    %319 = arith.mulf %314, %314 : vector<16x256xf32>
    %cst_107 = arith.constant dense<0.000000e+00> : vector<16xf32>
    %320 = vector.multi_reduction <add>, %319, %cst_107 [1] : vector<16x256xf32> to vector<16xf32>
    %321 = vector.shape_cast %320 : vector<16xf32> to vector<16x1xf32>
    %cst_108 = arith.constant 3.906250e-03 : f32
    %322 = vector.broadcast %cst_108 : f32 to vector<16x1xf32>
    %323 = arith.mulf %321, %322 : vector<16x1xf32>
    %324 = arith.mulf %318, %318 : vector<16x1xf32>
    %325 = arith.subf %323, %324 : vector<16x1xf32>
    %326 = vector.broadcast %318 : vector<16x1xf32> to vector<16x256xf32>
    %327 = arith.subf %314, %326 : vector<16x256xf32>
    %cst_109 = arith.constant 9.99999974E-6 : f32
    %328 = vector.broadcast %cst_109 : f32 to vector<16x1xf32>
    %329 = arith.addf %325, %328 : vector<16x1xf32>
    %330 = math.rsqrt %329 : vector<16x1xf32>
    %331 = vector.broadcast %330 : vector<16x1xf32> to vector<16x256xf32>
    %332 = arith.mulf %327, %331 : vector<16x256xf32>
    %333 = vector.broadcast %305 : vector<16x1xf32> to vector<16x256xf32>
    %334 = arith.mulf %332, %333 : vector<16x256xf32>
    %335 = vector.broadcast %306 : vector<16x1xf32> to vector<16x256xf32>
    %336 = arith.addf %334, %335 : vector<16x256xf32>
    %cst_110 = arith.constant 0.000000e+00 : f32
    %337 = vector.broadcast %cst_110 : f32 to vector<16x256xf32>
    %338 = arith.maximumf %336, %337 : vector<16x256xf32>
    %339 = vector.extract_strided_slice %302 {offsets = [1, 0, 0], sizes = [1, 16, 16], strides = [1, 1, 1]} : vector<3x16x16xbf16> to vector<1x16x16xbf16>
    %340 = vector.shape_cast %339 : vector<1x16x16xbf16> to vector<16x16xbf16>
    %341 = arith.truncf %338 : vector<16x256xf32> to vector<16x256xbf16>
    %cst_111 = arith.constant dense<0.000000e+00> : vector<16x256xf32>
    %342 = tpu.matmul %340, %341, %cst_111 {dimension_numbers = #tpu.dot_dimension_numbers<[1], [0], [0], [1], [0, 0, 1, 1], [], []>} : vector<16x16xbf16>, vector<16x256xbf16>, vector<16x256xf32> -> vector<16x256xf32>
    %cst_112 = arith.constant dense<0.000000e+00> : vector<16xf32>
    %343 = vector.multi_reduction <add>, %342, %cst_112 [1] : vector<16x256xf32> to vector<16xf32>
    %344 = vector.shape_cast %343 : vector<16xf32> to vector<16x1xf32>
    %cst_113 = arith.constant 3.906250e-03 : f32
    %345 = vector.broadcast %cst_113 : f32 to vector<16x1xf32>
    %346 = arith.mulf %344, %345 : vector<16x1xf32>
    %347 = arith.mulf %342, %342 : vector<16x256xf32>
    %cst_114 = arith.constant dense<0.000000e+00> : vector<16xf32>
    %348 = vector.multi_reduction <add>, %347, %cst_114 [1] : vector<16x256xf32> to vector<16xf32>
    %349 = vector.shape_cast %348 : vector<16xf32> to vector<16x1xf32>
    %cst_115 = arith.constant 3.906250e-03 : f32
    %350 = vector.broadcast %cst_115 : f32 to vector<16x1xf32>
    %351 = arith.mulf %349, %350 : vector<16x1xf32>
    %352 = arith.mulf %346, %346 : vector<16x1xf32>
    %353 = arith.subf %351, %352 : vector<16x1xf32>
    %354 = vector.broadcast %346 : vector<16x1xf32> to vector<16x256xf32>
    %355 = arith.subf %342, %354 : vector<16x256xf32>
    %cst_116 = arith.constant 9.99999974E-6 : f32
    %356 = vector.broadcast %cst_116 : f32 to vector<16x1xf32>
    %357 = arith.addf %353, %356 : vector<16x1xf32>
    %358 = math.rsqrt %357 : vector<16x1xf32>
    %359 = vector.broadcast %358 : vector<16x1xf32> to vector<16x256xf32>
    %360 = arith.mulf %355, %359 : vector<16x256xf32>
    %361 = vector.broadcast %307 : vector<16x1xf32> to vector<16x256xf32>
    %362 = arith.mulf %360, %361 : vector<16x256xf32>
    %363 = vector.broadcast %308 : vector<16x1xf32> to vector<16x256xf32>
    %364 = arith.addf %362, %363 : vector<16x256xf32>
    %cst_117 = arith.constant 0.000000e+00 : f32
    %365 = vector.broadcast %cst_117 : f32 to vector<16x256xf32>
    %366 = arith.maximumf %364, %365 : vector<16x256xf32>
    %367 = vector.extract_strided_slice %302 {offsets = [2, 0, 0], sizes = [1, 16, 16], strides = [1, 1, 1]} : vector<3x16x16xbf16> to vector<1x16x16xbf16>
    %368 = vector.shape_cast %367 : vector<1x16x16xbf16> to vector<16x16xbf16>
    %369 = arith.truncf %366 : vector<16x256xf32> to vector<16x256xbf16>
    %cst_118 = arith.constant dense<0.000000e+00> : vector<16x256xf32>
    %370 = tpu.matmul %368, %369, %cst_118 {dimension_numbers = #tpu.dot_dimension_numbers<[1], [0], [0], [1], [0, 0, 1, 1], [], []>} : vector<16x16xbf16>, vector<16x256xbf16>, vector<16x256xf32> -> vector<16x256xf32>
    %371 = vector.broadcast %309 : vector<16x1xf32> to vector<16x256xf32>
    %372 = arith.addf %370, %371 : vector<16x256xf32>
    %c2_119 = arith.constant 2 : index
    %c0_120 = arith.constant 0 : index
    %c0_121 = arith.constant 0 : index
    %373 = vector.load %arg2[%c2_119, %c0_120, %c0_121] : memref<5x16x256xf32, #tpu.memory_space<vmem>>, vector<1x16x256xf32>
    %374 = vector.shape_cast %373 : vector<1x16x256xf32> to vector<16x256xf32>
    %375 = vector.broadcast %310 : vector<16x1xf32> to vector<16x256xf32>
    %376 = arith.subf %297, %375 : vector<16x256xf32>
    %cst_122 = arith.constant 0.316227764 : f32
    %377 = vector.broadcast %cst_122 : f32 to vector<16x256xf32>
    %378 = arith.mulf %377, %372 : vector<16x256xf32>
    %379 = arith.mulf %378, %374 : vector<16x256xf32>
    %cst_123 = arith.constant 1.250000e-01 : f32
    %380 = vector.broadcast %cst_123 : f32 to vector<16x256xf32>
    %381 = arith.mulf %380, %376 : vector<16x256xf32>
    %382 = arith.mulf %381, %376 : vector<16x256xf32>
    %cst_124 = arith.constant 5.000000e-01 : f32
    %383 = vector.broadcast %cst_124 : f32 to vector<16x256xf32>
    %384 = arith.mulf %383, %372 : vector<16x256xf32>
    %385 = arith.mulf %384, %372 : vector<16x256xf32>
    %386 = arith.addf %382, %385 : vector<16x256xf32>
    %cst_125 = arith.constant 1.000000e-01 : f32
    %387 = vector.broadcast %cst_125 : f32 to vector<16x256xf32>
    %388 = arith.mulf %387, %386 : vector<16x256xf32>
    %389 = arith.subf %379, %388 : vector<16x256xf32>
    %cst_126 = arith.constant dense<0.000000e+00> : vector<256xf32>
    %390 = vector.multi_reduction <add>, %389, %cst_126 [0] : vector<16x256xf32> to vector<256xf32>
    %391 = vector.shape_cast %390 : vector<256xf32> to vector<1x256xf32>
    %392 = arith.addf %291, %391 : vector<1x256xf32>
    %cst_127 = arith.constant 0.316227764 : f32
    %393 = vector.broadcast %cst_127 : f32 to vector<16x256xf32>
    %394 = arith.mulf %393, %374 : vector<16x256xf32>
    %395 = arith.addf %297, %394 : vector<16x256xf32>
    %cst_128 = arith.constant 1.000000e-01 : f32
    %396 = vector.broadcast %cst_128 : f32 to vector<16x256xf32>
    %397 = arith.mulf %396, %372 : vector<16x256xf32>
    %398 = arith.subf %395, %397 : vector<16x256xf32>
    %c3 = arith.constant 3 : index
    %c0_129 = arith.constant 0 : index
    %c0_130 = arith.constant 0 : index
    %399 = vector.load %arg8[%c3, %c0_129, %c0_130] : memref<6x16x256xf32, #tpu.memory_space<vmem>>, vector<1x16x256xf32>
    %400 = vector.shape_cast %399 : vector<1x16x256xf32> to vector<16x256xf32>
    %401 = vector.shape_cast %398 : vector<16x256xf32> to vector<1x16x256xf32>
    tpu.vector_store %arg8[%c3, %c0_129, %c0_130], %401 {strides = array<i32>} : memref<6x16x256xf32, #tpu.memory_space<vmem>>, vector<1x16x256xf32>,
    %c3_131 = arith.constant 3 : index
    %c0_132 = arith.constant 0 : index
    %c0_133 = arith.constant 0 : index
    %c0_134 = arith.constant 0 : index
    %402 = vector.load %arg3[%c3_131, %c0_132, %c0_133, %c0_134] : memref<5x3x16x16xbf16, #tpu.memory_space<vmem>>, vector<1x3x16x16xbf16>
    %403 = vector.shape_cast %402 : vector<1x3x16x16xbf16> to vector<3x16x16xbf16>
    %c3_135 = arith.constant 3 : index
    %c0_136 = arith.constant 0 : index
    %c0_137 = arith.constant 0 : index
    %404 = vector.load %arg4[%c3_135, %c0_136, %c0_137] : memref<5x16x8xf32, #tpu.memory_space<vmem>>, vector<1x16x8xf32>
    %405 = vector.shape_cast %404 : vector<1x16x8xf32> to vector<16x8xf32>
    %406 = vector.extract_strided_slice %405 {offsets = [0, 0], sizes = [16, 1], strides = [1, 1]} : vector<16x8xf32> to vector<16x1xf32>
    %407 = vector.extract_strided_slice %405 {offsets = [0, 1], sizes = [16, 1], strides = [1, 1]} : vector<16x8xf32> to vector<16x1xf32>
    %408 = vector.extract_strided_slice %405 {offsets = [0, 2], sizes = [16, 1], strides = [1, 1]} : vector<16x8xf32> to vector<16x1xf32>
    %409 = vector.extract_strided_slice %405 {offsets = [0, 3], sizes = [16, 1], strides = [1, 1]} : vector<16x8xf32> to vector<16x1xf32>
    %410 = vector.extract_strided_slice %405 {offsets = [0, 4], sizes = [16, 1], strides = [1, 1]} : vector<16x8xf32> to vector<16x1xf32>
    %411 = vector.extract_strided_slice %405 {offsets = [0, 5], sizes = [16, 1], strides = [1, 1]} : vector<16x8xf32> to vector<16x1xf32>
    %412 = arith.truncf %398 : vector<16x256xf32> to vector<16x256xbf16>
    %413 = vector.extract_strided_slice %403 {offsets = [0, 0, 0], sizes = [1, 16, 16], strides = [1, 1, 1]} : vector<3x16x16xbf16> to vector<1x16x16xbf16>
    %414 = vector.shape_cast %413 : vector<1x16x16xbf16> to vector<16x16xbf16>
    %cst_138 = arith.constant dense<0.000000e+00> : vector<16x256xf32>
    %415 = tpu.matmul %414, %412, %cst_138 {dimension_numbers = #tpu.dot_dimension_numbers<[1], [0], [0], [1], [0, 0, 1, 1], [], []>} : vector<16x16xbf16>, vector<16x256xbf16>, vector<16x256xf32> -> vector<16x256xf32>
    %cst_139 = arith.constant dense<0.000000e+00> : vector<16xf32>
    %416 = vector.multi_reduction <add>, %415, %cst_139 [1] : vector<16x256xf32> to vector<16xf32>
    %417 = vector.shape_cast %416 : vector<16xf32> to vector<16x1xf32>
    %cst_140 = arith.constant 3.906250e-03 : f32
    %418 = vector.broadcast %cst_140 : f32 to vector<16x1xf32>
    %419 = arith.mulf %417, %418 : vector<16x1xf32>
    %420 = arith.mulf %415, %415 : vector<16x256xf32>
    %cst_141 = arith.constant dense<0.000000e+00> : vector<16xf32>
    %421 = vector.multi_reduction <add>, %420, %cst_141 [1] : vector<16x256xf32> to vector<16xf32>
    %422 = vector.shape_cast %421 : vector<16xf32> to vector<16x1xf32>
    %cst_142 = arith.constant 3.906250e-03 : f32
    %423 = vector.broadcast %cst_142 : f32 to vector<16x1xf32>
    %424 = arith.mulf %422, %423 : vector<16x1xf32>
    %425 = arith.mulf %419, %419 : vector<16x1xf32>
    %426 = arith.subf %424, %425 : vector<16x1xf32>
    %427 = vector.broadcast %419 : vector<16x1xf32> to vector<16x256xf32>
    %428 = arith.subf %415, %427 : vector<16x256xf32>
    %cst_143 = arith.constant 9.99999974E-6 : f32
    %429 = vector.broadcast %cst_143 : f32 to vector<16x1xf32>
    %430 = arith.addf %426, %429 : vector<16x1xf32>
    %431 = math.rsqrt %430 : vector<16x1xf32>
    %432 = vector.broadcast %431 : vector<16x1xf32> to vector<16x256xf32>
    %433 = arith.mulf %428, %432 : vector<16x256xf32>
    %434 = vector.broadcast %406 : vector<16x1xf32> to vector<16x256xf32>
    %435 = arith.mulf %433, %434 : vector<16x256xf32>
    %436 = vector.broadcast %407 : vector<16x1xf32> to vector<16x256xf32>
    %437 = arith.addf %435, %436 : vector<16x256xf32>
    %cst_144 = arith.constant 0.000000e+00 : f32
    %438 = vector.broadcast %cst_144 : f32 to vector<16x256xf32>
    %439 = arith.maximumf %437, %438 : vector<16x256xf32>
    %440 = vector.extract_strided_slice %403 {offsets = [1, 0, 0], sizes = [1, 16, 16], strides = [1, 1, 1]} : vector<3x16x16xbf16> to vector<1x16x16xbf16>
    %441 = vector.shape_cast %440 : vector<1x16x16xbf16> to vector<16x16xbf16>
    %442 = arith.truncf %439 : vector<16x256xf32> to vector<16x256xbf16>
    %cst_145 = arith.constant dense<0.000000e+00> : vector<16x256xf32>
    %443 = tpu.matmul %441, %442, %cst_145 {dimension_numbers = #tpu.dot_dimension_numbers<[1], [0], [0], [1], [0, 0, 1, 1], [], []>} : vector<16x16xbf16>, vector<16x256xbf16>, vector<16x256xf32> -> vector<16x256xf32>
    %cst_146 = arith.constant dense<0.000000e+00> : vector<16xf32>
    %444 = vector.multi_reduction <add>, %443, %cst_146 [1] : vector<16x256xf32> to vector<16xf32>
    %445 = vector.shape_cast %444 : vector<16xf32> to vector<16x1xf32>
    %cst_147 = arith.constant 3.906250e-03 : f32
    %446 = vector.broadcast %cst_147 : f32 to vector<16x1xf32>
    %447 = arith.mulf %445, %446 : vector<16x1xf32>
    %448 = arith.mulf %443, %443 : vector<16x256xf32>
    %cst_148 = arith.constant dense<0.000000e+00> : vector<16xf32>
    %449 = vector.multi_reduction <add>, %448, %cst_148 [1] : vector<16x256xf32> to vector<16xf32>
    %450 = vector.shape_cast %449 : vector<16xf32> to vector<16x1xf32>
    %cst_149 = arith.constant 3.906250e-03 : f32
    %451 = vector.broadcast %cst_149 : f32 to vector<16x1xf32>
    %452 = arith.mulf %450, %451 : vector<16x1xf32>
    %453 = arith.mulf %447, %447 : vector<16x1xf32>
    %454 = arith.subf %452, %453 : vector<16x1xf32>
    %455 = vector.broadcast %447 : vector<16x1xf32> to vector<16x256xf32>
    %456 = arith.subf %443, %455 : vector<16x256xf32>
    %cst_150 = arith.constant 9.99999974E-6 : f32
    %457 = vector.broadcast %cst_150 : f32 to vector<16x1xf32>
    %458 = arith.addf %454, %457 : vector<16x1xf32>
    %459 = math.rsqrt %458 : vector<16x1xf32>
    %460 = vector.broadcast %459 : vector<16x1xf32> to vector<16x256xf32>
    %461 = arith.mulf %456, %460 : vector<16x256xf32>
    %462 = vector.broadcast %408 : vector<16x1xf32> to vector<16x256xf32>
    %463 = arith.mulf %461, %462 : vector<16x256xf32>
    %464 = vector.broadcast %409 : vector<16x1xf32> to vector<16x256xf32>
    %465 = arith.addf %463, %464 : vector<16x256xf32>
    %cst_151 = arith.constant 0.000000e+00 : f32
    %466 = vector.broadcast %cst_151 : f32 to vector<16x256xf32>
    %467 = arith.maximumf %465, %466 : vector<16x256xf32>
    %468 = vector.extract_strided_slice %403 {offsets = [2, 0, 0], sizes = [1, 16, 16], strides = [1, 1, 1]} : vector<3x16x16xbf16> to vector<1x16x16xbf16>
    %469 = vector.shape_cast %468 : vector<1x16x16xbf16> to vector<16x16xbf16>
    %470 = arith.truncf %467 : vector<16x256xf32> to vector<16x256xbf16>
    %cst_152 = arith.constant dense<0.000000e+00> : vector<16x256xf32>
    %471 = tpu.matmul %469, %470, %cst_152 {dimension_numbers = #tpu.dot_dimension_numbers<[1], [0], [0], [1], [0, 0, 1, 1], [], []>} : vector<16x16xbf16>, vector<16x256xbf16>, vector<16x256xf32> -> vector<16x256xf32>
    %472 = vector.broadcast %410 : vector<16x1xf32> to vector<16x256xf32>
    %473 = arith.addf %471, %472 : vector<16x256xf32>
    %c3_153 = arith.constant 3 : index
    %c0_154 = arith.constant 0 : index
    %c0_155 = arith.constant 0 : index
    %474 = vector.load %arg2[%c3_153, %c0_154, %c0_155] : memref<5x16x256xf32, #tpu.memory_space<vmem>>, vector<1x16x256xf32>
    %475 = vector.shape_cast %474 : vector<1x16x256xf32> to vector<16x256xf32>
    %476 = vector.broadcast %411 : vector<16x1xf32> to vector<16x256xf32>
    %477 = arith.subf %398, %476 : vector<16x256xf32>
    %cst_156 = arith.constant 0.316227764 : f32
    %478 = vector.broadcast %cst_156 : f32 to vector<16x256xf32>
    %479 = arith.mulf %478, %473 : vector<16x256xf32>
    %480 = arith.mulf %479, %475 : vector<16x256xf32>
    %cst_157 = arith.constant 1.250000e-01 : f32
    %481 = vector.broadcast %cst_157 : f32 to vector<16x256xf32>
    %482 = arith.mulf %481, %477 : vector<16x256xf32>
    %483 = arith.mulf %482, %477 : vector<16x256xf32>
    %cst_158 = arith.constant 5.000000e-01 : f32
    %484 = vector.broadcast %cst_158 : f32 to vector<16x256xf32>
    %485 = arith.mulf %484, %473 : vector<16x256xf32>
    %486 = arith.mulf %485, %473 : vector<16x256xf32>
    %487 = arith.addf %483, %486 : vector<16x256xf32>
    %cst_159 = arith.constant 1.000000e-01 : f32
    %488 = vector.broadcast %cst_159 : f32 to vector<16x256xf32>
    %489 = arith.mulf %488, %487 : vector<16x256xf32>
    %490 = arith.subf %480, %489 : vector<16x256xf32>
    %cst_160 = arith.constant dense<0.000000e+00> : vector<256xf32>
    %491 = vector.multi_reduction <add>, %490, %cst_160 [0] : vector<16x256xf32> to vector<256xf32>
    %492 = vector.shape_cast %491 : vector<256xf32> to vector<1x256xf32>
    %493 = arith.addf %392, %492 : vector<1x256xf32>
    %cst_161 = arith.constant 0.316227764 : f32
    %494 = vector.broadcast %cst_161 : f32 to vector<16x256xf32>
    %495 = arith.mulf %494, %475 : vector<16x256xf32>
    %496 = arith.addf %398, %495 : vector<16x256xf32>
    %cst_162 = arith.constant 1.000000e-01 : f32
    %497 = vector.broadcast %cst_162 : f32 to vector<16x256xf32>
    %498 = arith.mulf %497, %473 : vector<16x256xf32>
    %499 = arith.subf %496, %498 : vector<16x256xf32>
    %c4 = arith.constant 4 : index
    %c0_163 = arith.constant 0 : index
    %c0_164 = arith.constant 0 : index
    %500 = vector.load %arg8[%c4, %c0_163, %c0_164] : memref<6x16x256xf32, #tpu.memory_space<vmem>>, vector<1x16x256xf32>
    %501 = vector.shape_cast %500 : vector<1x16x256xf32> to vector<16x256xf32>
    %502 = vector.shape_cast %499 : vector<16x256xf32> to vector<1x16x256xf32>
    tpu.vector_store %arg8[%c4, %c0_163, %c0_164], %502 {strides = array<i32>} : memref<6x16x256xf32, #tpu.memory_space<vmem>>, vector<1x16x256xf32>,
    %c4_165 = arith.constant 4 : index
    %c0_166 = arith.constant 0 : index
    %c0_167 = arith.constant 0 : index
    %c0_168 = arith.constant 0 : index
    %503 = vector.load %arg3[%c4_165, %c0_166, %c0_167, %c0_168] : memref<5x3x16x16xbf16, #tpu.memory_space<vmem>>, vector<1x3x16x16xbf16>
    %504 = vector.shape_cast %503 : vector<1x3x16x16xbf16> to vector<3x16x16xbf16>
    %c4_169 = arith.constant 4 : index
    %c0_170 = arith.constant 0 : index
    %c0_171 = arith.constant 0 : index
    %505 = vector.load %arg4[%c4_169, %c0_170, %c0_171] : memref<5x16x8xf32, #tpu.memory_space<vmem>>, vector<1x16x8xf32>
    %506 = vector.shape_cast %505 : vector<1x16x8xf32> to vector<16x8xf32>
    %507 = vector.extract_strided_slice %506 {offsets = [0, 0], sizes = [16, 1], strides = [1, 1]} : vector<16x8xf32> to vector<16x1xf32>
    %508 = vector.extract_strided_slice %506 {offsets = [0, 1], sizes = [16, 1], strides = [1, 1]} : vector<16x8xf32> to vector<16x1xf32>
    %509 = vector.extract_strided_slice %506 {offsets = [0, 2], sizes = [16, 1], strides = [1, 1]} : vector<16x8xf32> to vector<16x1xf32>
    %510 = vector.extract_strided_slice %506 {offsets = [0, 3], sizes = [16, 1], strides = [1, 1]} : vector<16x8xf32> to vector<16x1xf32>
    %511 = vector.extract_strided_slice %506 {offsets = [0, 4], sizes = [16, 1], strides = [1, 1]} : vector<16x8xf32> to vector<16x1xf32>
    %512 = vector.extract_strided_slice %506 {offsets = [0, 5], sizes = [16, 1], strides = [1, 1]} : vector<16x8xf32> to vector<16x1xf32>
    %513 = arith.truncf %499 : vector<16x256xf32> to vector<16x256xbf16>
    %514 = vector.extract_strided_slice %504 {offsets = [0, 0, 0], sizes = [1, 16, 16], strides = [1, 1, 1]} : vector<3x16x16xbf16> to vector<1x16x16xbf16>
    %515 = vector.shape_cast %514 : vector<1x16x16xbf16> to vector<16x16xbf16>
    %cst_172 = arith.constant dense<0.000000e+00> : vector<16x256xf32>
    %516 = tpu.matmul %515, %513, %cst_172 {dimension_numbers = #tpu.dot_dimension_numbers<[1], [0], [0], [1], [0, 0, 1, 1], [], []>} : vector<16x16xbf16>, vector<16x256xbf16>, vector<16x256xf32> -> vector<16x256xf32>
    %cst_173 = arith.constant dense<0.000000e+00> : vector<16xf32>
    %517 = vector.multi_reduction <add>, %516, %cst_173 [1] : vector<16x256xf32> to vector<16xf32>
    %518 = vector.shape_cast %517 : vector<16xf32> to vector<16x1xf32>
    %cst_174 = arith.constant 3.906250e-03 : f32
    %519 = vector.broadcast %cst_174 : f32 to vector<16x1xf32>
    %520 = arith.mulf %518, %519 : vector<16x1xf32>
    %521 = arith.mulf %516, %516 : vector<16x256xf32>
    %cst_175 = arith.constant dense<0.000000e+00> : vector<16xf32>
    %522 = vector.multi_reduction <add>, %521, %cst_175 [1] : vector<16x256xf32> to vector<16xf32>
    %523 = vector.shape_cast %522 : vector<16xf32> to vector<16x1xf32>
    %cst_176 = arith.constant 3.906250e-03 : f32
    %524 = vector.broadcast %cst_176 : f32 to vector<16x1xf32>
    %525 = arith.mulf %523, %524 : vector<16x1xf32>
    %526 = arith.mulf %520, %520 : vector<16x1xf32>
    %527 = arith.subf %525, %526 : vector<16x1xf32>
    %528 = vector.broadcast %520 : vector<16x1xf32> to vector<16x256xf32>
    %529 = arith.subf %516, %528 : vector<16x256xf32>
    %cst_177 = arith.constant 9.99999974E-6 : f32
    %530 = vector.broadcast %cst_177 : f32 to vector<16x1xf32>
    %531 = arith.addf %527, %530 : vector<16x1xf32>
    %532 = math.rsqrt %531 : vector<16x1xf32>
    %533 = vector.broadcast %532 : vector<16x1xf32> to vector<16x256xf32>
    %534 = arith.mulf %529, %533 : vector<16x256xf32>
    %535 = vector.broadcast %507 : vector<16x1xf32> to vector<16x256xf32>
    %536 = arith.mulf %534, %535 : vector<16x256xf32>
    %537 = vector.broadcast %508 : vector<16x1xf32> to vector<16x256xf32>
    %538 = arith.addf %536, %537 : vector<16x256xf32>
    %cst_178 = arith.constant 0.000000e+00 : f32
    %539 = vector.broadcast %cst_178 : f32 to vector<16x256xf32>
    %540 = arith.maximumf %538, %539 : vector<16x256xf32>
    %541 = vector.extract_strided_slice %504 {offsets = [1, 0, 0], sizes = [1, 16, 16], strides = [1, 1, 1]} : vector<3x16x16xbf16> to vector<1x16x16xbf16>
    %542 = vector.shape_cast %541 : vector<1x16x16xbf16> to vector<16x16xbf16>
    %543 = arith.truncf %540 : vector<16x256xf32> to vector<16x256xbf16>
    %cst_179 = arith.constant dense<0.000000e+00> : vector<16x256xf32>
    %544 = tpu.matmul %542, %543, %cst_179 {dimension_numbers = #tpu.dot_dimension_numbers<[1], [0], [0], [1], [0, 0, 1, 1], [], []>} : vector<16x16xbf16>, vector<16x256xbf16>, vector<16x256xf32> -> vector<16x256xf32>
    %cst_180 = arith.constant dense<0.000000e+00> : vector<16xf32>
    %545 = vector.multi_reduction <add>, %544, %cst_180 [1] : vector<16x256xf32> to vector<16xf32>
    %546 = vector.shape_cast %545 : vector<16xf32> to vector<16x1xf32>
    %cst_181 = arith.constant 3.906250e-03 : f32
    %547 = vector.broadcast %cst_181 : f32 to vector<16x1xf32>
    %548 = arith.mulf %546, %547 : vector<16x1xf32>
    %549 = arith.mulf %544, %544 : vector<16x256xf32>
    %cst_182 = arith.constant dense<0.000000e+00> : vector<16xf32>
    %550 = vector.multi_reduction <add>, %549, %cst_182 [1] : vector<16x256xf32> to vector<16xf32>
    %551 = vector.shape_cast %550 : vector<16xf32> to vector<16x1xf32>
    %cst_183 = arith.constant 3.906250e-03 : f32
    %552 = vector.broadcast %cst_183 : f32 to vector<16x1xf32>
    %553 = arith.mulf %551, %552 : vector<16x1xf32>
    %554 = arith.mulf %548, %548 : vector<16x1xf32>
    %555 = arith.subf %553, %554 : vector<16x1xf32>
    %556 = vector.broadcast %548 : vector<16x1xf32> to vector<16x256xf32>
    %557 = arith.subf %544, %556 : vector<16x256xf32>
    %cst_184 = arith.constant 9.99999974E-6 : f32
    %558 = vector.broadcast %cst_184 : f32 to vector<16x1xf32>
    %559 = arith.addf %555, %558 : vector<16x1xf32>
    %560 = math.rsqrt %559 : vector<16x1xf32>
    %561 = vector.broadcast %560 : vector<16x1xf32> to vector<16x256xf32>
    %562 = arith.mulf %557, %561 : vector<16x256xf32>
    %563 = vector.broadcast %509 : vector<16x1xf32> to vector<16x256xf32>
    %564 = arith.mulf %562, %563 : vector<16x256xf32>
    %565 = vector.broadcast %510 : vector<16x1xf32> to vector<16x256xf32>
    %566 = arith.addf %564, %565 : vector<16x256xf32>
    %cst_185 = arith.constant 0.000000e+00 : f32
    %567 = vector.broadcast %cst_185 : f32 to vector<16x256xf32>
    %568 = arith.maximumf %566, %567 : vector<16x256xf32>
    %569 = vector.extract_strided_slice %504 {offsets = [2, 0, 0], sizes = [1, 16, 16], strides = [1, 1, 1]} : vector<3x16x16xbf16> to vector<1x16x16xbf16>
    %570 = vector.shape_cast %569 : vector<1x16x16xbf16> to vector<16x16xbf16>
    %571 = arith.truncf %568 : vector<16x256xf32> to vector<16x256xbf16>
    %cst_186 = arith.constant dense<0.000000e+00> : vector<16x256xf32>
    %572 = tpu.matmul %570, %571, %cst_186 {dimension_numbers = #tpu.dot_dimension_numbers<[1], [0], [0], [1], [0, 0, 1, 1], [], []>} : vector<16x16xbf16>, vector<16x256xbf16>, vector<16x256xf32> -> vector<16x256xf32>
    %573 = vector.broadcast %511 : vector<16x1xf32> to vector<16x256xf32>
    %574 = arith.addf %572, %573 : vector<16x256xf32>
    %c4_187 = arith.constant 4 : index
    %c0_188 = arith.constant 0 : index
    %c0_189 = arith.constant 0 : index
    %575 = vector.load %arg2[%c4_187, %c0_188, %c0_189] : memref<5x16x256xf32, #tpu.memory_space<vmem>>, vector<1x16x256xf32>
    %576 = vector.shape_cast %575 : vector<1x16x256xf32> to vector<16x256xf32>
    %577 = vector.broadcast %512 : vector<16x1xf32> to vector<16x256xf32>
    %578 = arith.subf %499, %577 : vector<16x256xf32>
    %cst_190 = arith.constant 0.316227764 : f32
    %579 = vector.broadcast %cst_190 : f32 to vector<16x256xf32>
    %580 = arith.mulf %579, %574 : vector<16x256xf32>
    %581 = arith.mulf %580, %576 : vector<16x256xf32>
    %cst_191 = arith.constant 1.250000e-01 : f32
    %582 = vector.broadcast %cst_191 : f32 to vector<16x256xf32>
    %583 = arith.mulf %582, %578 : vector<16x256xf32>
    %584 = arith.mulf %583, %578 : vector<16x256xf32>
    %cst_192 = arith.constant 5.000000e-01 : f32
    %585 = vector.broadcast %cst_192 : f32 to vector<16x256xf32>
    %586 = arith.mulf %585, %574 : vector<16x256xf32>
    %587 = arith.mulf %586, %574 : vector<16x256xf32>
    %588 = arith.addf %584, %587 : vector<16x256xf32>
    %cst_193 = arith.constant 1.000000e-01 : f32
    %589 = vector.broadcast %cst_193 : f32 to vector<16x256xf32>
    %590 = arith.mulf %589, %588 : vector<16x256xf32>
    %591 = arith.subf %581, %590 : vector<16x256xf32>
    %cst_194 = arith.constant dense<0.000000e+00> : vector<256xf32>
    %592 = vector.multi_reduction <add>, %591, %cst_194 [0] : vector<16x256xf32> to vector<256xf32>
    %593 = vector.shape_cast %592 : vector<256xf32> to vector<1x256xf32>
    %594 = arith.addf %493, %593 : vector<1x256xf32>
    %cst_195 = arith.constant 0.316227764 : f32
    %595 = vector.broadcast %cst_195 : f32 to vector<16x256xf32>
    %596 = arith.mulf %595, %576 : vector<16x256xf32>
    %597 = arith.addf %499, %596 : vector<16x256xf32>
    %cst_196 = arith.constant 1.000000e-01 : f32
    %598 = vector.broadcast %cst_196 : f32 to vector<16x256xf32>
    %599 = arith.mulf %598, %574 : vector<16x256xf32>
    %600 = arith.subf %597, %599 : vector<16x256xf32>
    %c5 = arith.constant 5 : index
    %c0_197 = arith.constant 0 : index
    %c0_198 = arith.constant 0 : index
    %601 = vector.load %arg8[%c5, %c0_197, %c0_198] : memref<6x16x256xf32, #tpu.memory_space<vmem>>, vector<1x16x256xf32>
    %602 = vector.shape_cast %601 : vector<1x16x256xf32> to vector<16x256xf32>
    %603 = vector.shape_cast %600 : vector<16x256xf32> to vector<1x16x256xf32>
    tpu.vector_store %arg8[%c5, %c0_197, %c0_198], %603 {strides = array<i32>} : memref<6x16x256xf32, #tpu.memory_space<vmem>>, vector<1x16x256xf32>,
    %c0_199 = arith.constant 0 : index
    %c0_200 = arith.constant 0 : index
    %604 = vector.load %arg7[%c0_199, %c0_200] : memref<1x256xf32, #tpu.memory_space<vmem>>, vector<1x256xf32>
    tpu.vector_store %arg7[%c0_199, %c0_200], %594 {strides = array<i32>} : memref<1x256xf32, #tpu.memory_space<vmem>>, vector<1x256xf32>,
    return
  }
  func.func @transform_0(%arg0: i32) -> (i32, i32) {
    %c0_i32 = arith.constant 0 : i32
    %c0_i32_0 = arith.constant 0 : i32
    return %c0_i32, %arg0 : i32, i32
  }
  func.func @transform_1(%arg0: i32) -> (i32, i32, i32) {
    %c0_i32 = arith.constant 0 : i32
    %c0_i32_0 = arith.constant 0 : i32
    %c0_i32_1 = arith.constant 0 : i32
    return %c0_i32, %c0_i32_0, %arg0 : i32, i32, i32
  }
  func.func @transform_2(%arg0: i32) -> (i32, i32, i32, i32) {
    %c0_i32 = arith.constant 0 : i32
    %c0_i32_0 = arith.constant 0 : i32
    %c0_i32_1 = arith.constant 0 : i32
    %c0_i32_2 = arith.constant 0 : i32
    %c0_i32_3 = arith.constant 0 : i32
    return %c0_i32, %c0_i32_0, %c0_i32_1, %c0_i32_2 : i32, i32, i32, i32
  }
  func.func @transform_3(%arg0: i32) -> (i32, i32, i32) {
    %c0_i32 = arith.constant 0 : i32
    %c0_i32_0 = arith.constant 0 : i32
    %c0_i32_1 = arith.constant 0 : i32
    %c0_i32_2 = arith.constant 0 : i32
    return %c0_i32, %c0_i32_0, %c0_i32_1 : i32, i32, i32
  }
  func.func @transform_4(%arg0: i32) -> (i32, i32, i32) {
    %c0_i32 = arith.constant 0 : i32
    %c0_i32_0 = arith.constant 0 : i32
    %c0_i32_1 = arith.constant 0 : i32
    %c0_i32_2 = arith.constant 0 : i32
    return %c0_i32, %c0_i32_0, %c0_i32_1 : i32, i32, i32
  }
  func.func @transform_5(%arg0: i32) -> (i32, i32) {
    %c0_i32 = arith.constant 0 : i32
    %c0_i32_0 = arith.constant 0 : i32
    %c0_i32_1 = arith.constant 0 : i32
    return %c0_i32, %c0_i32_0 : i32, i32
  }
  func.func @transform_6(%arg0: i32) -> (i32, i32) {
    %c0_i32 = arith.constant 0 : i32
    %c0_i32_0 = arith.constant 0 : i32
    return %c0_i32, %arg0 : i32, i32
  }
  func.func @transform_7(%arg0: i32) -> (i32, i32, i32) {
    %c0_i32 = arith.constant 0 : i32
    %c0_i32_0 = arith.constant 0 : i32
    %c0_i32_1 = arith.constant 0 : i32
    return %c0_i32, %c0_i32_0, %arg0 : i32, i32, i32
  }
}

</mosaic_0001>

<bundles_post_ra>
// kernel: tpu_custom_call.1
= control target key start
LH: loop header
LB: loop body
LE: loop exit
PB: predicated region body
PF: predicated region fallthrough
CT: control target
= control target key end

     0   :  { %13 = vsyncpa [#allocation3], 0  ;;  %s3857_s0 = inlined_call_operand.hbm [shape: f32[16,256], index: 0, kind: input, shape index: {}]   ;;  %s3858_s1 = inlined_call_operand.hbm [shape: f32[5,16,256], index: 1, kind: input, shape index: {}]   ;;  %s3859_s2 = inlined_call_operand.vmem [shape: bf16[5,3,16,16], index: 2, kind: input, shape index: {}]   ;;  %s3860_s3 = inlined_call_operand.vmem [shape: f32[5,16,8], index: 3, kind: input, shape index: {}]   ;;  %s3861_s4 = inlined_call_operand.vmem [shape: bf16[2,16,16], index: 4, kind: input, shape index: {}]   ;;  %s3862_s5 = inlined_call_operand.vmem [shape: f32[16,8], index: 5, kind: input, shape index: {}]   ;;  %s3863_s6 = inlined_call_operand.hbm [shape: f32[1,256], index: 6, kind: output, shape index: {0}]   ;;  %s3864_s7 = inlined_call_operand.hbm [shape: f32[6,16,256], index: 7, kind: output, shape index: {1}]  }
   0x1   :  { %14 = vsyncpa [#allocation6], 0 }
   0x2   :  { %15 = vsyncpa [#allocation4], 0 }
   0x3   :  { %16 = vsyncpa [#allocation9], 0  ;;  %s21_s26 = sshll.u32 %s3857_s0, 4  ;;  %s2790_s27 = smov [#allocation2]   ;;  %s22_s26 = int_to_ptr.hbm [resolvable:$true] %s21_s26 }
   0x4   :  { %s23_s28 = sshll.u32 %s2790_s27, 4  ;;  %s34_s8 = sshll.u32 %s3858_s1, 4  ;;  %s24_s28 = int_to_ptr.vmem [resolvable:$true] %s23_s28  ;;  %s35_s8 = int_to_ptr.hbm [resolvable:$true] %s34_s8 }
   0x5   :  { %s2791_s9 = smov 256   ;;  %s2792_s10 = smov 16  }
   0x6   :  { %29 = dma.hbm_to_vmem [thread:$0]  %s22_s26, 512, %s24_s28, [#allocation3], %s2791_s9, %s2791_s9, %s2792_s10  }
   0x7   :  { %s2793_s11 = smov [#allocation5]  }
   0x8   :  { %s36_s12 = sshll.u32 %s2793_s11, 4  ;;  %s37_s12 = int_to_ptr.vmem [resolvable:$true] %s36_s12 }
   0x9   :  { %42 = dma.hbm_to_vmem [thread:$0]  %s35_s8, 2560, %s37_s12, [#allocation6], %s2791_s9, %s2791_s9, %s2792_s10  }
   0xa   :  { %2782 = dma.done.wait [#allocation3], 512  }
   0xb   :  { %2783 = vsyncadd [#allocation3], 4294966784 }
   0xc   :  { %2784 = dma.done.wait [#allocation6], 2560  }
   0xd   :  { %2785 = vsyncadd [#allocation6], 4294964736  ;;  %v2854_v0 = vld [vmem:[#allocation2] sm:$0xff]  ;;  %v2856_v1 = vld [vmem:[#allocation2 + $0x10] sm:$0xff]  ;;  %vm83_vm0 = vcmask 130048   ;;  %v2794_v7 = vmov 1  }
   0xe   :  { %64 = vst [vmem:[#allocation8] sm:$0xff] %v2854_v0  ;;  %v2861_v2 = vpack.c.bf16 %v2856_v1, %v2854_v0  ;;  %v2863_v3 = vld [vmem:[#allocation2 + $0x8] sm:$0xff]  ;;  %v2865_v4 = vld [vmem:[#allocation2 + $0x18] sm:$0xff]  ;;  %v2506_v6 = vld [vmem:[%s3859_s2] sm:$0xff]  ;;  %2536 = vset.pattern.permute.xlu0 %v2794_v7  ;;  %2537 = vset.pattern.permute.xlu1 %v2794_v7  ;;  %v2795_v16 = vmov 0   ;;  %s2353_s14 = sshll.u32 %s3864_s7, 4  ;;  %s2354_s14 = int_to_ptr.hbm [resolvable:$true] %s2353_s14 }
   0xf   :  { %66 = vst [vmem:[#allocation8 + $0x10] sm:$0xff] %v2856_v1  ;;  %v2870_v5 = vpack.c.bf16 %v2865_v4, %v2863_v3  ;;  %v2888_v15 = vld [vmem:[%s3860_s3] sm:$0xff]  ;;  %2535 = vset.pattern.permute.xlu2 %v2795_v16  ;;  %v2898_v22 = vld [vmem:[%s3860_s3 + $0x8] sm:$0xff]  ;;  %s2801_s7 = smov [#allocation7]   ;;  %s2343_s16 = sshll.u32 %s3863_s6, 4  ;;  %s2344_s16 = int_to_ptr.hbm [resolvable:$true] %s2343_s16 }
  0x10   :  { %94 = vmatpush.bf16.msra.mxu0 %v2861_v2  ;;  %65 = vst [vmem:[#allocation8 + $0x8] sm:$0xff] %v2863_v3  ;;  %171 = vperm.xlu2 %2535, %v2888_v15  }
  0x11   :  { %67 = vst [vmem:[#allocation8 + $0x18] sm:$0xff] %v2865_v4  ;;  %108 = vmatpush.bf16.msra.mxu1 %v2870_v5 }
  0x13   :  { %2376 = vmatmul.msk.bf16.vlgmr.msra.gmra.mxu0 %vm83_vm0, %v2506_v6 }
  0x14   :  { %2377 = vmatmul.msk.bf16.vlgmr.msra.gmra.mxu1 %vm83_vm0, %v2506_v6 }
  0x18   :  { %176 = vperm.xlu2 %2535, %v2898_v22  }
  0x6a   :  { %v172_v46 = vpop.permute.xlu2 %171 }
  0x72   :  { %v177_v63 = vpop.permute.xlu2 %176 }
  0x90   :  { %v96_v8 = vpop.f32.mrf.mxu0 }
  0x91   :  { %v110_v9 = vpop.f32.mrf.mxu1  ;;  %v123_v10 = vmul.f32 %v96_v8, %v96_v8 }
  0x92   :  { %v115_v11 = vadd.f32 %v110_v9, %v96_v8  ;;  %v124_v12 = vmul.f32 %v110_v9, %v110_v9 }
  0x94   :  { %116 = vadd.xlane.f32.xlu0 %v115_v11  ;;  %v127_v13 = vadd.f32 %v124_v12, %v123_v10 }
  0x96   :  { %128 = vadd.xlane.f32.xlu1 %v127_v13 }
  0x98   :  { %v2883_v14 = vpop.f32.mrf.mxu0 }
  0x99   :  { %v112_v17 = vpop.f32.mrf.mxu1  ;;  %v125_v18 = vmul.f32 %v2883_v14, %v2883_v14 }
  0x9a   :  { %v118_v19 = vadd.f32 %v112_v17, %v2883_v14  ;;  %v126_v20 = vmul.f32 %v112_v17, %v112_v17 }
  0x9c   :  { %119 = vadd.xlane.f32.xlu0 %v118_v19  ;;  %v130_v21 = vadd.f32 %v126_v20, %v125_v18 }
  0x9e   :  { %131 = vadd.xlane.f32.xlu1 %v130_v21 }
  0xb0   :  { %184 = vperm.xlu0 %2536, %v2888_v15  }
  0xb7   :  { %188 = vperm.xlu1 %2537, %v2898_v22  }
 0x107   :  { %v117_v23 = vpop.xlane.xlu0 %116 }
 0x108   :  { %v121_v24 = vmul.f32 0.00390625, %v117_v23  ;;  %v2507_v23 = vld [vmem:[%s3859_s2 + $0x8] sm:$0xff] }
 0x109   :  { %v129_v25 = vpop.xlane.xlu1 %128 }
 0x10a   :  { %v133_v26 = vmul.f32 0.00390625, %v129_v25  ;;  %v135_v27 = vmul.f32 %v121_v24, %v121_v24  ;;  %v139_v48 = vsub.f32 %v96_v8, %v121_v24  ;;  %v140_v49 = vsub.f32 %v110_v9, %v121_v24 }
 0x10b   :  { %v2796_v24 = vmov 2  }
 0x10c   :  { %v137_v28 = vsub.f32 %v133_v26, %v135_v27  ;;  %2538 = vset.pattern.permute.xlu2 %v2796_v24  ;;  %2539 = vset.pattern.permute.xlu1 %v2796_v24 }
 0x10e   :  { %v143_v29 = vadd.f32 1e-05, %v137_v28 }
 0x10f   :  { %v120_v30 = vpop.xlane.xlu0 %119 }
 0x110   :  { %2596 = vrsqrt.f32 %v143_v29  ;;  %v122_v31 = vmul.f32 0.00390625, %v120_v30  ;;  %vm151_vm2 = vweird.f32 %v143_v29 }
 0x111   :  { %v132_v32 = vpop.xlane.xlu1 %131 }
 0x112   :  { %v134_v33 = vmul.f32 0.00390625, %v132_v32  ;;  %v136_v34 = vmul.f32 %v122_v31, %v122_v31  ;;  %v141_v55 = vsub.f32 %v2883_v14, %v122_v31  ;;  %v142_v56 = vsub.f32 %v112_v17, %v122_v31 }
 0x113   :  { %v2797_v32 = vmov 3  }
 0x114   :  { %v138_v35 = vsub.f32 %v134_v33, %v136_v34  ;;  %v2509_v33 = vld [vmem:[%s3861_s4] sm:$0xff] }
 0x116   :  { %v2597_v36 = vpop.eup %2596  ;;  %v144_v37 = vadd.f32 1e-05, %v138_v35 }
 0x117   :  { %v146_v38 = vmul.f32 %v2597_v36, %v143_v29  ;;  %vm152_vm1 = vweird.f32 %v2597_v36 }
 0x118   :  { %2598 = vrsqrt.f32 %v144_v37  ;;  %vm153_vm3 = vmor %vm151_vm2, %vm152_vm1  ;;  %vm161_vm5 = vweird.f32 %v144_v37 }
 0x119   :  { %v147_v39 = vmul.f32 %v2597_v36, %v146_v38  ;;  %v2947_v38 = vld [vmem:[%s3862_s5 + $0x8] sm:$0xff] }
 0x11b   :  { %v148_v40 = vmul.f32 0.5, %v147_v39 }
 0x11d   :  { %v149_v41 = vsub.f32 1.5, %v148_v40 }
 0x11e   :  { %v2599_v42 = vpop.eup %2598 }
 0x11f   :  { %v156_v43 = vmul.f32 %v2599_v42, %v144_v37  ;;  %v150_v44 = vmul.f32 %v2597_v36, %v149_v41  ;;  %vm162_vm4 = vweird.f32 %v2599_v42 }
 0x120   :  { %vm163_vm6 = vmor %vm161_vm5, %vm162_vm4 }
 0x121   :  { %v157_v45 = vmul.f32 %v2599_v42, %v156_v43  ;;  %v154_v47 = vsel %vm153_vm3, %v2597_v36, %v150_v44 }
 0x122   :  { %v165_v51 = vmul.f32 %v154_v47, %v139_v48  ;;  %v166_v52 = vmul.f32 %v154_v47, %v140_v49  ;;  %v185_v60 = vpop.permute.xlu0 %184 }
 0x123   :  { %v158_v50 = vmul.f32 0.5, %v157_v45 }
 0x124   :  { %v179_v57 = vmul.f32 %v172_v46, %v165_v51  ;;  %v180_v58 = vmul.f32 %v172_v46, %v166_v52 }
 0x125   :  { %v159_v53 = vsub.f32 1.5, %v158_v50 }
 0x126   :  { %v191_v10 = vadd.f32 %v185_v60, %v179_v57  ;;  %v192_v11 = vadd.f32 %v185_v60, %v180_v58  ;;  %v2798_v60 = vmov 4  }
 0x127   :  { %v160_v54 = vmul.f32 %v2599_v42, %v159_v53  ;;  %2541 = vset.pattern.permute.xlu0 %v2798_v60 }
 0x128   :  { %v195_v18 = vmax.f32 %v191_v10, 0.0  ;;  %v196_v20 = vmax.f32 %v192_v11, 0.0 }
 0x129   :  { %v164_v59 = vsel %vm163_vm6, %v2599_v42, %v160_v54  ;;  %v189_v6 = vpop.permute.xlu1 %188 }
 0x12a   :  { %v167_v61 = vmul.f32 %v164_v59, %v141_v55  ;;  %v168_v62 = vmul.f32 %v164_v59, %v142_v56 }
 0x12c   :  { %v181_v8 = vmul.f32 %v177_v63, %v167_v61  ;;  %v182_v9 = vmul.f32 %v177_v63, %v168_v62 }
 0x12e   :  { %v193_v12 = vadd.f32 %v189_v6, %v181_v8  ;;  %v194_v13 = vadd.f32 %v189_v6, %v182_v9  ;;  %v385_v9 = vld [vmem:[%s3862_s5] sm:$0xff] }
 0x130   :  { %v197_v19 = vmax.f32 %v193_v12, 0.0  ;;  %v198_v14 = vmax.f32 %v194_v13, 0.0 }
 0x132   :  { %v199_v17 = vpack.c.bf16 %v197_v19, %v195_v18  ;;  %v200_v21 = vpack.c.bf16 %v198_v14, %v196_v20 }
 0x134   :  { %216 = vmatpush.bf16.msra.mxu2 %v199_v17  ;;  %230 = vmatpush.bf16.msra.mxu3 %v200_v21 }
 0x137   :  { %2382 = vmatmul.msk.bf16.vlgmr.msra.gmra.mxu2 %vm83_vm0, %v2507_v23  ;;  %2383 = vmatmul.msk.bf16.vlgmr.msra.gmra.mxu3 %vm83_vm0, %v2507_v23 }
 0x138   :  { %402 = vmatpush.bf16.msrb.mxu2 %v2861_v2  ;;  %416 = vmatpush.bf16.msrb.mxu3 %v2870_v5 }
 0x147   :  { %2394 = vmatmul.msk.bf16.vlgmr.msrb.gmra.mxu2 %vm83_vm0, %v2509_v33  ;;  %2395 = vmatmul.msk.bf16.vlgmr.msrb.gmra.mxu3 %vm83_vm0, %v2509_v33 }
 0x1ba   :  { %v2913_v25 = vpop.f32.mrf.mxu2  ;;  %v2915_v26 = vpop.f32.mrf.mxu3 }
 0x1bb   :  { %v237_v27 = vadd.f32 %v2915_v26, %v2913_v25  ;;  %v245_v2 = vmul.f32 %v2913_v25, %v2913_v25  ;;  %v246_v5 = vmul.f32 %v2915_v26, %v2915_v26 }
 0x1bd   :  { %238 = vadd.xlane.f32.xlu2 %v237_v27  ;;  %v249_v28 = vadd.f32 %v246_v5, %v245_v2 }
 0x1bf   :  { %250 = vadd.xlane.f32.xlu0 %v249_v28 }
 0x1c2   :  { %v2923_v29 = vpop.f32.mrf.mxu2  ;;  %v2925_v30 = vpop.f32.mrf.mxu3 }
 0x1c3   :  { %v240_v31 = vadd.f32 %v2925_v30, %v2923_v29  ;;  %v247_v34 = vmul.f32 %v2923_v29, %v2923_v29  ;;  %v248_v35 = vmul.f32 %v2925_v30, %v2925_v30 }
 0x1c5   :  { %241 = vadd.xlane.f32.xlu1 %v240_v31  ;;  %v252_v36 = vadd.f32 %v248_v35, %v247_v34 }
 0x1ca   :  { %v2950_v58 = vpop.f32.mrf.mxu2  ;;  %v2952_v59 = vpop.f32.mrf.mxu3 }
 0x1cb   :  { %v423_v61 = vadd.f32 %v2952_v59, %v2950_v58 }
 0x1d3   :  { %322 = vperm.xlu0 %2541, %v2888_v15  }
 0x1d5   :  { %292 = vperm.xlu2 %2538, %v2888_v15  }
 0x1db   :  { %2545 = vset.pattern.permute.xlu0 %v2794_v7 }
 0x1dd   :  { %2540 = vset.pattern.permute.xlu2 %v2797_v32 }
 0x1de   :  { %304 = vperm.xlu2 %2540, %v2888_v15   ;;  %296 = vperm.xlu1 %2539, %v2898_v22  }
 0x1e6   :  { %2544 = vset.pattern.permute.xlu1 %v2795_v16 }
 0x1e7   :  { %484 = vperm.xlu1 %2544, %v2947_v38  }
 0x207   :  { %253 = vadd.xlane.f32.xlu2 %v252_v36 }
 0x211   :  { %424 = vadd.xlane.f32.xlu1 %v423_v61 }
 0x21f   :  { %308 = vperm.xlu2 %2540, %v2898_v22  }
 0x227   :  { %2542 = vset.pattern.permute.xlu2 %v2798_v60 }
 0x228   :  { %326 = vperm.xlu2 %2542, %v2898_v22  }
 0x230   :  { %v239_v37 = vpop.xlane.xlu2 %238  ;;  %2543 = vset.pattern.permute.xlu2 %v2795_v16 }
 0x231   :  { %v243_v39 = vmul.f32 0.00390625, %v239_v37  ;;  %479 = vperm.xlu2 %2543, %v385_v9  }
 0x232   :  { %v251_v40 = vpop.xlane.xlu0 %250 }
 0x233   :  { %v255_v41 = vmul.f32 0.00390625, %v251_v40  ;;  %v257_v42 = vmul.f32 %v243_v39, %v243_v39  ;;  %v261_v22 = vsub.f32 %v2913_v25, %v243_v39  ;;  %v262_v15 = vsub.f32 %v2915_v26, %v243_v39 }
 0x235   :  { %v259_v43 = vsub.f32 %v255_v41, %v257_v42  ;;  %v2974_v42 = vld [vmem:[%s3860_s3 + $0x18] sm:$0xff] }
 0x237   :  { %v265_v45 = vadd.f32 1e-05, %v259_v43  ;;  %v2508_v43 = vld [vmem:[%s3859_s2 + $0x10] sm:$0xff] }
 0x238   :  { %v293_v44 = vpop.permute.xlu2 %292  ;;  %v242_v48 = vpop.xlane.xlu1 %241 }
 0x239   :  { %2600 = vrsqrt.f32 %v265_v45  ;;  %v244_v50 = vmul.f32 0.00390625, %v242_v48  ;;  %vm273_vm8 = vweird.f32 %v265_v45  ;;  %2546 = vset.pattern.permute.xlu2 %v2794_v7  ;;  %v2997_v48 = vpop.f32.mrf.mxu3 }
 0x23a   :  { %496 = vperm.xlu2 %2546, %v2947_v38   ;;  %v2979_v38 = vld [vmem:[%s3860_s3 + $0x10] sm:$0xff] }
 0x23b   :  { %v258_v54 = vmul.f32 %v244_v50, %v244_v50  ;;  %v263_v21 = vsub.f32 %v2923_v29, %v244_v50  ;;  %v264_v23 = vsub.f32 %v2925_v30, %v244_v50  ;;  %878 = vperm.xlu1 %2544, %v2979_v38   ;;  %v434_v50 = vmul.f32 %v2997_v48, %v2997_v48 }
 0x23f   :  { %v2601_v47 = vpop.eup %2600 }
 0x240   :  { %v305_v46 = vpop.permute.xlu2 %304  ;;  %v268_v49 = vmul.f32 %v2601_v47, %v265_v45  ;;  %vm274_vm7 = vweird.f32 %v2601_v47  ;;  %v432_v45 = vmul.f32 %v2952_v59, %v2952_v59 }
 0x241   :  { %vm275_vm9 = vmor %vm273_vm8, %vm274_vm7 }
 0x242   :  { %v269_v51 = vmul.f32 %v2601_v47, %v268_v49  ;;  %2547 = vset.pattern.permute.xlu2 %v2795_v16 }
 0x243   :  { %883 = vperm.xlu2 %2547, %v2974_v42   ;;  %2548 = vset.pattern.permute.xlu1 %v2794_v7 }
 0x244   :  { %v270_v56 = vmul.f32 0.5, %v269_v51 }
 0x246   :  { %v271_v62 = vsub.f32 1.5, %v270_v56  ;;  %v323_v56 = vpop.permute.xlu0 %322 }
 0x248   :  { %v272_v63 = vmul.f32 %v2601_v47, %v271_v62 }
 0x24a   :  { %v276_v10 = vsel %vm275_vm9, %v2601_v47, %v272_v63  ;;  %v2995_v47 = vpop.f32.mrf.mxu2 }
 0x24b   :  { %v287_v13 = vmul.f32 %v276_v10, %v261_v22  ;;  %v288_v18 = vmul.f32 %v276_v10, %v262_v15  ;;  %2549 = vset.pattern.permute.xlu2 %v2794_v7  ;;  %v433_v49 = vmul.f32 %v2995_v47, %v2995_v47  ;;  %v426_v51 = vadd.f32 %v2997_v48, %v2995_v47 }
 0x24d   :  { %v299_v14 = vmul.f32 %v293_v44, %v287_v13  ;;  %v300_v17 = vmul.f32 %v293_v44, %v288_v18  ;;  %v431_v44 = vmul.f32 %v2950_v58, %v2950_v58 }
 0x24f   :  { %v311_v26 = vadd.f32 %v305_v46, %v299_v14  ;;  %v312_v28 = vadd.f32 %v305_v46, %v300_v17  ;;  %v435_v46 = vadd.f32 %v432_v45, %v431_v44 }
 0x250   :  { %v297_v2 = vpop.permute.xlu1 %296 }
 0x251   :  { %v315_v37 = vmax.f32 %v311_v26, 0.0  ;;  %v316_v29 = vmax.f32 %v312_v28, 0.0  ;;  %436 = vadd.xlane.f32.xlu0 %v435_v46 }
 0x265   :  { %492 = vperm.xlu0 %2545, %v385_v9  }
 0x26c   :  { %427 = vadd.xlane.f32.xlu2 %v426_v51 }
 0x26d   :  { %2551 = vset.pattern.permute.xlu0 %v2796_v24 }
 0x27a   :  { %v254_v52 = vpop.xlane.xlu2 %253 }
 0x27b   :  { %v256_v53 = vmul.f32 0.00390625, %v254_v52  ;;  %v438_v52 = vadd.f32 %v434_v50, %v433_v49 }
 0x27d   :  { %v260_v55 = vsub.f32 %v256_v53, %v258_v54  ;;  %439 = vadd.xlane.f32.xlu1 %v438_v52  ;;  %v3006_v53 = vpop.permute.xlu1 %484 }
 0x27f   :  { %v266_v57 = vadd.f32 1e-05, %v260_v55  ;;  %v365_v55 = vld [vmem:[#allocation5] sm:$0xff] }
 0x280   :  { %v753_v61 = vmul.f32 0.31622776, %v365_v55 }
 0x281   :  { %2602 = vrsqrt.f32 %v266_v57  ;;  %vm283_vm11 = vweird.f32 %v266_v57 }
 0x282   :  { %v309_v34 = vpop.permute.xlu2 %308 }
 0x287   :  { %v2603_v6 = vpop.eup %2602 }
 0x288   :  { %v278_v8 = vmul.f32 %v2603_v6, %v266_v57  ;;  %vm284_vm10 = vweird.f32 %v2603_v6  ;;  %v366_v57 = vld [vmem:[#allocation5 + $0x8] sm:$0xff] }
 0x289   :  { %vm285_vm12 = vmor %vm283_vm11, %vm284_vm10  ;;  %v754_v62 = vmul.f32 0.31622776, %v366_v57 }
 0x28a   :  { %v279_v11 = vmul.f32 %v2603_v6, %v278_v8  ;;  %v327_v54 = vpop.permute.xlu2 %326 }
 0x28b   :  { %v758_v13 = vadd.f32 %v754_v62, %v2863_v3 }
 0x28c   :  { %v280_v12 = vmul.f32 0.5, %v279_v11  ;;  %v757_v11 = vadd.f32 %v753_v61, %v2854_v0 }
 0x28e   :  { %v281_v19 = vsub.f32 1.5, %v280_v12  ;;  %v367_v12 = vld [vmem:[#allocation5 + $0x10] sm:$0xff] }
 0x290   :  { %v282_v20 = vmul.f32 %v2603_v6, %v281_v19  ;;  %v368_v19 = vld [vmem:[#allocation5 + $0x18] sm:$0xff] }
 0x291   :  { %v756_v0 = vmul.f32 0.31622776, %v368_v19 }
 0x292   :  { %v286_v27 = vsel %vm285_vm12, %v2603_v6, %v282_v20  ;;  %v3008_v63 = vpop.permute.xlu2 %479  ;;  %v425_v6 = vpop.xlane.xlu1 %424 }
 0x293   :  { %v289_v25 = vmul.f32 %v286_v27, %v263_v21  ;;  %v290_v5 = vmul.f32 %v286_v27, %v264_v23  ;;  %v3010_v10 = vmul.f32 0.00390625, %v425_v6  ;;  %v755_v23 = vmul.f32 0.31622776, %v367_v12 }
 0x295   :  { %v301_v31 = vmul.f32 %v297_v2, %v289_v25  ;;  %v302_v33 = vmul.f32 %v297_v2, %v290_v5  ;;  %v443_v21 = vmul.f32 %v3010_v10, %v3010_v10  ;;  %v759_v26 = vadd.f32 %v755_v23, %v2856_v1 }
 0x296   :  { %v447_v6 = vsub.f32 %v2950_v58, %v3010_v10 }
 0x297   :  { %v313_v35 = vadd.f32 %v309_v34, %v301_v31  ;;  %v314_v36 = vadd.f32 %v309_v34, %v302_v33  ;;  %v760_v34 = vadd.f32 %v756_v0, %v2865_v4  ;;  %v2511_v4 = vld [vmem:[%s3859_s2 + $0x18] sm:$0xff] }
 0x299   :  { %v317_v39 = vmax.f32 %v313_v35, 0.0  ;;  %v318_v30 = vmax.f32 %v314_v36, 0.0 }
 0x29a   :  { %v3033_v33 = vpop.permute.xlu2 %496 }
 0x29b   :  { %v319_v40 = vpack.c.bf16 %v317_v39, %v315_v37  ;;  %v320_v41 = vpack.c.bf16 %v318_v30, %v316_v29 }
 0x29d   :  { %344 = vmatpush.bf16.msrb.mxu0 %v319_v40  ;;  %358 = vmatpush.bf16.msrb.mxu1 %v320_v41 }
 0x2a0   :  { %2388 = vmatmul.msk.bf16.vlgmr.msrb.gmra.mxu0 %vm83_vm0, %v2508_v43  ;;  %2389 = vmatmul.msk.bf16.vlgmr.msrb.gmra.mxu1 %vm83_vm0, %v2508_v43 }
 0x2a2   :  { %v3051_v40 = vpop.permute.xlu2 %883 }
 0x2ad   :  { %v3054_v41 = vpop.permute.xlu1 %878 }
 0x2c4   :  { %v437_v18 = vpop.xlane.xlu0 %436 }
 0x2c5   :  { %v441_v17 = vmul.f32 0.00390625, %v437_v18 }
 0x2c7   :  { %v445_v5 = vsub.f32 %v441_v17, %v443_v21 }
 0x2c9   :  { %v451_v37 = vadd.f32 1e-05, %v445_v5 }
 0x2cb   :  { %2604 = vrsqrt.f32 %v451_v37  ;;  %vm459_vm13 = vweird.f32 %v451_v37 }
 0x2d1   :  { %v2605_v43 = vpop.eup %2604 }
 0x2d2   :  { %v454_v44 = vmul.f32 %v2605_v43, %v451_v37  ;;  %vm460_vm14 = vweird.f32 %v2605_v43 }
 0x2d3   :  { %vm461_vm15 = vmor %vm459_vm13, %vm460_vm14 }
 0x2d4   :  { %v455_v46 = vmul.f32 %v2605_v43, %v454_v44 }
 0x2df   :  { %v428_v45 = vpop.xlane.xlu2 %427 }
 0x2e0   :  { %v430_v49 = vmul.f32 0.00390625, %v428_v45 }
 0x2e2   :  { %v444_v52 = vmul.f32 %v430_v49, %v430_v49  ;;  %v450_v17 = vsub.f32 %v2997_v48, %v430_v49 }
 0x2f0   :  { %v440_v50 = vpop.xlane.xlu1 %439 }
 0x2f1   :  { %v442_v51 = vmul.f32 0.00390625, %v440_v50 }
 0x2f3   :  { %v446_v55 = vsub.f32 %v442_v51, %v444_v52 }
 0x31d   :  { %v346_v8 = vpop.f32.mrf.mxu0  ;;  %v360_v9 = vpop.f32.mrf.mxu1 }
 0x31e   :  { %v3013_v22 = vadd.f32 %v346_v8, %v323_v56  ;;  %v3015_v15 = vadd.f32 %v360_v9, %v323_v56  ;;  %v452_v56 = vadd.f32 1e-05, %v446_v55  ;;  %v448_v8 = vsub.f32 %v2952_v59, %v3010_v10  ;;  %v493_v59 = vpop.permute.xlu0 %492  ;;  %v2510_v55 = vld [vmem:[%s3861_s4 + $0x8] sm:$0xff] }
 0x320   :  { %v761_v20 = vmul.f32 0.1, %v3013_v22  ;;  %v762_v14 = vmul.f32 0.1, %v3015_v15  ;;  %2606 = vrsqrt.f32 %v452_v56  ;;  %vm469_vm1 = vweird.f32 %v452_v56 }
 0x322   :  { %v3022_v27 = vsub.f32 %v757_v11, %v761_v20  ;;  %v3024_v2 = vsub.f32 %v758_v13, %v762_v14  ;;  %v449_v14 = vsub.f32 %v2995_v47, %v430_v49 }
 0x324   :  { %770 = vst [vmem:[#allocation8 + $0x20] sm:$0xff] %v3022_v27 }
 0x325   :  { %771 = vst [vmem:[#allocation8 + $0x28] sm:$0xff] %v3024_v2  ;;  %v348_v3 = vpop.f32.mrf.mxu0  ;;  %v362_v25 = vpop.f32.mrf.mxu1 }
 0x326   :  { %v3029_v28 = vadd.f32 %v348_v3, %v327_v54  ;;  %v3031_v31 = vadd.f32 %v362_v25, %v327_v54  ;;  %v456_v54 = vmul.f32 0.5, %v455_v46  ;;  %v2607_v62 = vpop.eup %2606 }
 0x327   :  { %v464_v9 = vmul.f32 %v2607_v62, %v452_v56  ;;  %vm470_vm2 = vweird.f32 %v2607_v62 }
 0x328   :  { %v763_v35 = vmul.f32 0.1, %v3029_v28  ;;  %v764_v36 = vmul.f32 0.1, %v3031_v31  ;;  %v457_v57 = vsub.f32 1.5, %v456_v54  ;;  %vm471_vm3 = vmor %vm469_vm1, %vm470_vm2 }
 0x329   :  { %v465_v12 = vmul.f32 %v2607_v62, %v464_v9 }
 0x32a   :  { %v3038_v29 = vsub.f32 %v759_v26, %v763_v35  ;;  %v3040_v39 = vsub.f32 %v760_v34, %v764_v36  ;;  %v458_v61 = vmul.f32 %v2605_v43, %v457_v57 }
 0x32b   :  { %v466_v19 = vmul.f32 0.5, %v465_v12 }
 0x32c   :  { %772 = vst [vmem:[#allocation8 + $0x30] sm:$0xff] %v3038_v29  ;;  %v784_v1 = vpack.c.bf16 %v3038_v29, %v3022_v27  ;;  %v785_v30 = vpack.c.bf16 %v3040_v39, %v3024_v2  ;;  %v462_v11 = vsel %vm461_vm15, %v2605_v43, %v458_v61 }
 0x32d   :  { %773 = vst [vmem:[#allocation8 + $0x38] sm:$0xff] %v3040_v39  ;;  %v473_v13 = vmul.f32 %v462_v11, %v447_v6  ;;  %v474_v18 = vmul.f32 %v462_v11, %v448_v8  ;;  %v467_v20 = vsub.f32 1.5, %v466_v19 }
 0x32e   :  { %801 = vmatpush.bf16.msra.mxu2 %v784_v1  ;;  %815 = vmatpush.bf16.msra.mxu3 %v785_v30 }
 0x32f   :  { %v487_v21 = vmul.f32 %v3008_v63, %v473_v13  ;;  %v488_v58 = vmul.f32 %v3008_v63, %v474_v18  ;;  %v468_v23 = vmul.f32 %v2607_v62, %v467_v20 }
 0x331   :  { %2414 = vmatmul.msk.bf16.vlgmr.msra.gmra.mxu2 %vm83_vm0, %v2511_v4  ;;  %2415 = vmatmul.msk.bf16.vlgmr.msra.gmra.mxu3 %vm83_vm0, %v2511_v4  ;;  %v472_v10 = vsel %vm471_vm3, %v2607_v62, %v468_v23  ;;  %v499_v25 = vadd.f32 %v493_v59, %v487_v21  ;;  %v500_v5 = vadd.f32 %v493_v59, %v488_v58 }
 0x332   :  { %v475_v0 = vmul.f32 %v472_v10, %v449_v14  ;;  %v476_v3 = vmul.f32 %v472_v10, %v450_v17 }
 0x333   :  { %v503_v35 = vmax.f32 %v499_v25, 0.0  ;;  %v504_v36 = vmax.f32 %v500_v5, 0.0 }
 0x334   :  { %v489_v26 = vmul.f32 %v3006_v53, %v475_v0  ;;  %v490_v34 = vmul.f32 %v3006_v53, %v476_v3 }
 0x336   :  { %v501_v47 = vadd.f32 %v3033_v33, %v489_v26  ;;  %v502_v48 = vadd.f32 %v3033_v33, %v490_v34 }
 0x338   :  { %v505_v37 = vmax.f32 %v501_v47, 0.0  ;;  %v506_v1 = vmax.f32 %v502_v48, 0.0 }
 0x33a   :  { %v507_v63 = vpack.c.bf16 %v505_v37, %v503_v35  ;;  %v508_v30 = vpack.c.bf16 %v506_v1, %v504_v36 }
 0x33c   :  { %524 = vmatpush.bf16.msra.mxu0 %v507_v63  ;;  %538 = vmatpush.bf16.msra.mxu1 %v508_v30 }
 0x33f   :  { %2400 = vmatmul.msk.bf16.vlgmr.msra.gmra.mxu0 %vm83_vm0, %v2510_v55  ;;  %2401 = vmatmul.msk.bf16.vlgmr.msra.gmra.mxu1 %vm83_vm0, %v2510_v55 }
 0x3b4   :  { %v803_v4 = vpop.f32.mrf.mxu2  ;;  %v817_v43 = vpop.f32.mrf.mxu3 }
 0x3b5   :  { %v822_v44 = vadd.f32 %v817_v43, %v803_v4  ;;  %v830_v45 = vmul.f32 %v803_v4, %v803_v4  ;;  %v831_v46 = vmul.f32 %v817_v43, %v817_v43 }
 0x3b7   :  { %823 = vadd.xlane.f32.xlu2 %v822_v44  ;;  %v834_v50 = vadd.f32 %v831_v46, %v830_v45 }
 0x3bc   :  { %v3069_v49 = vpop.f32.mrf.mxu2  ;;  %v3071_v53 = vpop.f32.mrf.mxu3 }
 0x3bd   :  { %v825_v33 = vadd.f32 %v3071_v53, %v3069_v49  ;;  %v832_v51 = vmul.f32 %v3069_v49, %v3069_v49  ;;  %v833_v52 = vmul.f32 %v3071_v53, %v3071_v53 }
 0x3bf   :  { %835 = vadd.xlane.f32.xlu2 %v834_v50  ;;  %826 = vadd.xlane.f32.xlu1 %v825_v33  ;;  %v837_v54 = vadd.f32 %v833_v52, %v832_v51 }
 0x3c7   :  { %838 = vadd.xlane.f32.xlu1 %v837_v54 }
 0x3d7   :  { %895 = vperm.xlu2 %2549, %v2974_v42  }
 0x3df   :  { %2550 = vset.pattern.permute.xlu2 %v2796_v24 }
 0x3e0   :  { %891 = vperm.xlu1 %2548, %v2979_v38   ;;  %999 = vperm.xlu2 %2550, %v2979_v38  }
 0x3e8   :  { %2552 = vset.pattern.permute.xlu1 %v2797_v32  ;;  %2553 = vset.pattern.permute.xlu2 %v2797_v32 }
 0x42a   :  { %v824_v56 = vpop.xlane.xlu2 %823 }
 0x42b   :  { %v828_v57 = vmul.f32 0.00390625, %v824_v56 }
 0x42d   :  { %v842_v6 = vmul.f32 %v828_v57, %v828_v57  ;;  %v846_v34 = vsub.f32 %v803_v4, %v828_v57  ;;  %v847_v47 = vsub.f32 %v817_v43, %v828_v57 }
 0x432   :  { %v836_v61 = vpop.xlane.xlu2 %835  ;;  %v827_v62 = vpop.xlane.xlu1 %826 }
 0x433   :  { %v840_v8 = vmul.f32 0.00390625, %v836_v61  ;;  %v829_v12 = vmul.f32 0.00390625, %v827_v62 }
 0x435   :  { %v844_v9 = vsub.f32 %v840_v8, %v842_v6  ;;  %v843_v18 = vmul.f32 %v829_v12, %v829_v12  ;;  %v848_v1 = vsub.f32 %v3069_v49, %v829_v12  ;;  %v849_v63 = vsub.f32 %v3071_v53, %v829_v12  ;;  %v3101_v8 = vpop.f32.mrf.mxu0 }
 0x437   :  { %v850_v11 = vadd.f32 1e-05, %v844_v9 }
 0x439   :  { %2608 = vrsqrt.f32 %v850_v11  ;;  %vm858_vm5 = vweird.f32 %v850_v11 }
 0x43a   :  { %v839_v13 = vpop.xlane.xlu1 %838  ;;  %v896_v43 = vpop.permute.xlu2 %895 }
 0x43b   :  { %v841_v19 = vmul.f32 0.00390625, %v839_v13 }
 0x43d   :  { %v845_v20 = vsub.f32 %v841_v19, %v843_v18  ;;  %v3105_v9 = vpop.f32.mrf.mxu0 }
 0x43f   :  { %v2609_v14 = vpop.eup %2608  ;;  %v851_v17 = vadd.f32 1e-05, %v845_v20 }
 0x440   :  { %v853_v21 = vmul.f32 %v2609_v14, %v850_v11  ;;  %vm859_vm4 = vweird.f32 %v2609_v14 }
 0x441   :  { %2610 = vrsqrt.f32 %v851_v17  ;;  %vm860_vm6 = vmor %vm858_vm5, %vm859_vm4  ;;  %vm868_vm8 = vweird.f32 %v851_v17 }
 0x442   :  { %v854_v58 = vmul.f32 %v2609_v14, %v853_v21 }
 0x444   :  { %v855_v23 = vmul.f32 0.5, %v854_v58 }
 0x446   :  { %v856_v59 = vsub.f32 1.5, %v855_v23 }
 0x447   :  { %v2611_v10 = vpop.eup %2610 }
 0x448   :  { %v863_v0 = vmul.f32 %v2611_v10, %v851_v17  ;;  %v857_v3 = vmul.f32 %v2609_v14, %v856_v59  ;;  %vm869_vm7 = vweird.f32 %v2611_v10 }
 0x449   :  { %vm870_vm9 = vmor %vm868_vm8, %vm869_vm7 }
 0x44a   :  { %v864_v25 = vmul.f32 %v2611_v10, %v863_v0  ;;  %v861_v26 = vsel %vm860_vm6, %v2609_v14, %v857_v3  ;;  %v1000_v0 = vpop.permute.xlu2 %999 }
 0x44b   :  { %v872_v35 = vmul.f32 %v861_v26, %v846_v34  ;;  %v873_v36 = vmul.f32 %v861_v26, %v847_v47 }
 0x44c   :  { %v865_v5 = vmul.f32 0.5, %v864_v25 }
 0x44d   :  { %v886_v45 = vmul.f32 %v3054_v41, %v872_v35  ;;  %v887_v46 = vmul.f32 %v3054_v41, %v873_v36  ;;  %v2512_v41 = vld [vmem:[%s3859_s2 + $0x20] sm:$0xff] }
 0x44e   :  { %v866_v48 = vsub.f32 1.5, %v865_v5 }
 0x450   :  { %v867_v37 = vmul.f32 %v2611_v10, %v866_v48 }
 0x452   :  { %v892_v30 = vpop.permute.xlu1 %891  ;;  %v871_v44 = vsel %vm870_vm9, %v2611_v10, %v867_v37 }
 0x453   :  { %v874_v50 = vmul.f32 %v871_v44, %v848_v1  ;;  %v875_v4 = vmul.f32 %v871_v44, %v849_v63  ;;  %v898_v33 = vadd.f32 %v892_v30, %v886_v45  ;;  %v899_v51 = vadd.f32 %v892_v30, %v887_v46 }
 0x455   :  { %v888_v52 = vmul.f32 %v3051_v40, %v874_v50  ;;  %v889_v54 = vmul.f32 %v3051_v40, %v875_v4  ;;  %v902_v56 = vmax.f32 %v898_v33, 0.0  ;;  %v903_v53 = vmax.f32 %v899_v51, 0.0  ;;  %v3103_v40 = vpop.f32.mrf.mxu1 }
 0x457   :  { %v900_v55 = vadd.f32 %v896_v43, %v888_v52  ;;  %v901_v49 = vadd.f32 %v896_v43, %v889_v54 }
 0x459   :  { %v904_v57 = vmax.f32 %v900_v55, 0.0  ;;  %v905_v61 = vmax.f32 %v901_v49, 0.0 }
 0x45b   :  { %v906_v62 = vpack.c.bf16 %v904_v57, %v902_v56  ;;  %v907_v6 = vpack.c.bf16 %v905_v61, %v903_v53 }
 0x45d   :  { %923 = vmatpush.bf16.msrb.mxu0 %v906_v62  ;;  %937 = vmatpush.bf16.msrb.mxu1 %v907_v6  ;;  %v3107_v11 = vpop.f32.mrf.mxu1 }
 0x460   :  { %2420 = vmatmul.msk.bf16.vlgmr.msrb.gmra.mxu0 %vm83_vm0, %v2512_v41  ;;  %2421 = vmatmul.msk.bf16.vlgmr.msrb.gmra.mxu1 %vm83_vm0, %v2512_v41 }
 0x4dd   :  { %v925_v12 = vpop.f32.mrf.mxu0  ;;  %v939_v13 = vpop.f32.mrf.mxu1 }
 0x4de   :  { %v944_v18 = vadd.f32 %v939_v13, %v925_v12  ;;  %v952_v19 = vmul.f32 %v925_v12, %v925_v12  ;;  %v953_v20 = vmul.f32 %v939_v13, %v939_v13 }
 0x4e0   :  { %945 = vadd.xlane.f32.xlu1 %v944_v18  ;;  %v956_v14 = vadd.f32 %v953_v20, %v952_v19 }
 0x4e2   :  { %957 = vadd.xlane.f32.xlu0 %v956_v14 }
 0x4e5   :  { %v3109_v17 = vpop.f32.mrf.mxu0  ;;  %v3111_v21 = vpop.f32.mrf.mxu1 }
 0x4e6   :  { %v947_v58 = vadd.f32 %v3111_v21, %v3109_v17  ;;  %v954_v23 = vmul.f32 %v3109_v17, %v3109_v17  ;;  %v955_v59 = vmul.f32 %v3111_v21, %v3111_v21 }
 0x4e8   :  { %948 = vadd.xlane.f32.xlu2 %v947_v58  ;;  %v959_v10 = vadd.f32 %v955_v59, %v954_v23 }
 0x4ea   :  { %960 = vadd.xlane.f32.xlu1 %v959_v10 }
 0x4f6   :  { %1003 = vperm.xlu0 %2551, %v2974_v42  }
 0x4fe   :  { %2557 = vset.pattern.permute.xlu0 %v2795_v16 }
 0x500   :  { %1015 = vperm.xlu2 %2553, %v2974_v42  }
 0x503   :  { %1011 = vperm.xlu1 %2552, %v2979_v38  }
 0x508   :  { %2555 = vset.pattern.permute.xlu2 %v2798_v60 }
 0x509   :  { %1033 = vperm.xlu2 %2555, %v2974_v42  }
 0x50b   :  { %2554 = vset.pattern.permute.xlu1 %v2798_v60 }
 0x50c   :  { %1029 = vperm.xlu1 %2554, %v2979_v38  }
 0x511   :  { %2556 = vset.pattern.permute.xlu2 %v2795_v16 }
 0x514   :  { %2558 = vset.pattern.permute.xlu1 %v2794_v7 }
 0x553   :  { %v946_v3 = vpop.xlane.xlu1 %945 }
 0x554   :  { %v950_v25 = vmul.f32 0.00390625, %v946_v3 }
 0x555   :  { %v958_v5 = vpop.xlane.xlu0 %957 }
 0x556   :  { %v962_v26 = vmul.f32 0.00390625, %v958_v5  ;;  %v964_v34 = vmul.f32 %v950_v25, %v950_v25  ;;  %v968_v55 = vsub.f32 %v925_v12, %v950_v25  ;;  %v969_v49 = vsub.f32 %v939_v13, %v950_v25 }
 0x558   :  { %v966_v47 = vsub.f32 %v962_v26, %v964_v34 }
 0x55a   :  { %v972_v48 = vadd.f32 1e-05, %v966_v47 }
 0x55b   :  { %v949_v35 = vpop.xlane.xlu2 %948 }
 0x55c   :  { %2612 = vrsqrt.f32 %v972_v48  ;;  %v951_v36 = vmul.f32 0.00390625, %v949_v35  ;;  %vm980_vm11 = vweird.f32 %v972_v48  ;;  %v2513_v35 = vld [vmem:[%s3859_s2 + $0x28] sm:$0xff] }
 0x55d   :  { %v961_v42 = vpop.xlane.xlu1 %960 }
 0x55e   :  { %v963_v37 = vmul.f32 0.00390625, %v961_v42  ;;  %v965_v1 = vmul.f32 %v951_v36, %v951_v36  ;;  %v970_v62 = vsub.f32 %v3109_v17, %v951_v36  ;;  %v971_v6 = vsub.f32 %v3111_v21, %v951_v36  ;;  %v1073_v36 = vld [vmem:[#allocation5 + $0x20] sm:$0xff]  ;;  %v1074_v42 = vld [vmem:[#allocation5 + $0x28] sm:$0xff] }
 0x560   :  { %v967_v63 = vsub.f32 %v963_v37, %v965_v1  ;;  %v1141_v1 = vmul.f32 0.31622776, %v1073_v36 }
 0x562   :  { %v2613_v38 = vpop.eup %2612  ;;  %v973_v30 = vadd.f32 1e-05, %v967_v63 }
 0x563   :  { %v975_v44 = vmul.f32 %v2613_v38, %v972_v48  ;;  %vm981_vm10 = vweird.f32 %v2613_v38  ;;  %v1016_v12 = vpop.permute.xlu2 %1015 }
 0x564   :  { %2614 = vrsqrt.f32 %v973_v30  ;;  %vm982_vm12 = vmor %vm980_vm11, %vm981_vm10  ;;  %vm990_vm14 = vweird.f32 %v973_v30 }
 0x565   :  { %v976_v45 = vmul.f32 %v2613_v38, %v975_v44 }
 0x567   :  { %v977_v46 = vmul.f32 0.5, %v976_v45 }
 0x568   :  { %v1004_v18 = vpop.permute.xlu0 %1003 }
 0x569   :  { %v978_v50 = vsub.f32 1.5, %v977_v46  ;;  %v1145_v46 = vadd.f32 %v1141_v1, %v3022_v27 }
 0x56a   :  { %v2615_v4 = vpop.eup %2614 }
 0x56b   :  { %v985_v43 = vmul.f32 %v2615_v4, %v973_v30  ;;  %v979_v33 = vmul.f32 %v2613_v38, %v978_v50  ;;  %vm991_vm13 = vweird.f32 %v2615_v4  ;;  %v1142_v30 = vmul.f32 0.31622776, %v1074_v42 }
 0x56c   :  { %vm992_vm15 = vmor %vm990_vm14, %vm991_vm13 }
 0x56d   :  { %v986_v51 = vmul.f32 %v2615_v4, %v985_v43  ;;  %v983_v54 = vsel %vm982_vm12, %v2613_v38, %v979_v33  ;;  %v1075_v33 = vld [vmem:[#allocation5 + $0x30] sm:$0xff] }
 0x56e   :  { %v994_v53 = vmul.f32 %v983_v54, %v968_v55  ;;  %v995_v57 = vmul.f32 %v983_v54, %v969_v49  ;;  %v1034_v55 = vpop.permute.xlu2 %1033  ;;  %v1143_v49 = vmul.f32 0.31622776, %v1075_v33 }
 0x56f   :  { %v987_v52 = vmul.f32 0.5, %v986_v51 }
 0x570   :  { %v1006_v20 = vmul.f32 %v1000_v0, %v994_v53  ;;  %v1007_v14 = vmul.f32 %v1000_v0, %v995_v57  ;;  %v3139_v0 = vld [vmem:[%s3860_s3 + $0x20] sm:$0xff] }
 0x571   :  { %v988_v56 = vsub.f32 1.5, %v987_v52  ;;  %1266 = vperm.xlu2 %2556, %v3139_v0   ;;  %v1076_v52 = vld [vmem:[#allocation5 + $0x38] sm:$0xff] }
 0x572   :  { %v1144_v53 = vmul.f32 0.31622776, %v1076_v52 }
 0x573   :  { %v989_v61 = vmul.f32 %v2615_v4, %v988_v56 }
 0x575   :  { %v1012_v41 = vpop.permute.xlu1 %1011  ;;  %v993_v19 = vsel %vm992_vm15, %v2615_v4, %v989_v61  ;;  %v1146_v4 = vadd.f32 %v1142_v30, %v3024_v2  ;;  %v1147_v61 = vadd.f32 %v1143_v49, %v3038_v29 }
 0x576   :  { %v996_v58 = vmul.f32 %v993_v19, %v970_v62  ;;  %v997_v23 = vmul.f32 %v993_v19, %v971_v6  ;;  %v1018_v13 = vadd.f32 %v1012_v41, %v1006_v20  ;;  %v1019_v59 = vadd.f32 %v1012_v41, %v1007_v14 }
 0x577   :  { %v1148_v6 = vadd.f32 %v1144_v53, %v3040_v39  ;;  %v2514_v39 = vld [vmem:[%s3859_s2 + $0x30] sm:$0xff] }
 0x578   :  { %v1008_v10 = vmul.f32 %v1004_v18, %v996_v58  ;;  %v1009_v3 = vmul.f32 %v1004_v18, %v997_v23  ;;  %v1022_v26 = vmax.f32 %v1018_v13, 0.0  ;;  %v1023_v34 = vmax.f32 %v1019_v59, 0.0 }
 0x579   :  { %2559 = vset.pattern.permute.xlu2 %v2794_v7 }
 0x57a   :  { %v1020_v25 = vadd.f32 %v1016_v12, %v1008_v10  ;;  %v1021_v5 = vadd.f32 %v1016_v12, %v1009_v3 }
 0x57c   :  { %v1024_v17 = vmax.f32 %v1020_v25, 0.0  ;;  %v1025_v47 = vmax.f32 %v1021_v5, 0.0 }
 0x57e   :  { %v1026_v21 = vpack.c.bf16 %v1024_v17, %v1022_v26  ;;  %v1027_v48 = vpack.c.bf16 %v1025_v47, %v1023_v34  ;;  %v1030_v37 = vpop.permute.xlu1 %1029  ;;  %v3193_v17 = vld [vmem:[%s3860_s3 + $0x28] sm:$0xff] }
 0x580   :  { %1051 = vmatpush.bf16.msrb.mxu2 %v1026_v21  ;;  %1065 = vmatpush.bf16.msrb.mxu3 %v1027_v48 }
 0x583   :  { %2426 = vmatmul.msk.bf16.vlgmr.msrb.gmra.mxu2 %vm83_vm0, %v2513_v35  ;;  %2427 = vmatmul.msk.bf16.vlgmr.msrb.gmra.mxu3 %vm83_vm0, %v2513_v35 }
 0x5cb   :  { %v1267_v47 = vpop.permute.xlu2 %1266 }
 0x606   :  { %v1053_v63 = vpop.f32.mrf.mxu2  ;;  %v1067_v38 = vpop.f32.mrf.mxu3 }
 0x607   :  { %v3143_v44 = vadd.f32 %v1053_v63, %v1030_v37  ;;  %v3145_v45 = vadd.f32 %v1067_v38, %v1030_v37 }
 0x609   :  { %v1149_v50 = vmul.f32 0.1, %v3143_v44  ;;  %v1150_v43 = vmul.f32 0.1, %v3145_v45 }
 0x60b   :  { %v3151_v51 = vsub.f32 %v1145_v46, %v1149_v50  ;;  %v3153_v54 = vsub.f32 %v1146_v4, %v1150_v43 }
 0x60d   :  { %1158 = vst [vmem:[#allocation8 + $0x40] sm:$0xff] %v3151_v51 }
 0x60e   :  { %1159 = vst [vmem:[#allocation8 + $0x48] sm:$0xff] %v3153_v54  ;;  %v1055_v56 = vpop.f32.mrf.mxu2  ;;  %v1069_v27 = vpop.f32.mrf.mxu3 }
 0x60f   :  { %v3157_v57 = vadd.f32 %v1055_v56, %v1034_v55  ;;  %v3159_v2 = vadd.f32 %v1069_v27, %v1034_v55 }
 0x611   :  { %v1151_v62 = vmul.f32 0.1, %v3157_v57  ;;  %v1152_v41 = vmul.f32 0.1, %v3159_v2 }
 0x613   :  { %v3165_v18 = vsub.f32 %v1147_v61, %v1151_v62  ;;  %v3167_v19 = vsub.f32 %v1148_v6, %v1152_v41 }
 0x615   :  { %1160 = vst [vmem:[#allocation8 + $0x50] sm:$0xff] %v3165_v18  ;;  %v1172_v20 = vpack.c.bf16 %v3165_v18, %v3151_v51  ;;  %v1173_v29 = vpack.c.bf16 %v3167_v19, %v3153_v54 }
 0x616   :  { %1161 = vst [vmem:[#allocation8 + $0x58] sm:$0xff] %v3167_v19 }
 0x617   :  { %1189 = vmatpush.bf16.msra.mxu0 %v1172_v20  ;;  %1203 = vmatpush.bf16.msra.mxu1 %v1173_v29 }
 0x61a   :  { %2440 = vmatmul.msk.bf16.vlgmr.msra.gmra.mxu0 %vm83_vm0, %v2514_v39  ;;  %2441 = vmatmul.msk.bf16.vlgmr.msra.gmra.mxu1 %vm83_vm0, %v2514_v39 }
 0x697   :  { %v1191_v14 = vpop.f32.mrf.mxu0  ;;  %v1205_v58 = vpop.f32.mrf.mxu1 }
 0x698   :  { %v1218_v23 = vmul.f32 %v1191_v14, %v1191_v14  ;;  %v1210_v12 = vadd.f32 %v1205_v58, %v1191_v14  ;;  %v1219_v13 = vmul.f32 %v1205_v58, %v1205_v58 }
 0x69a   :  { %1211 = vadd.xlane.f32.xlu1 %v1210_v12  ;;  %v1222_v59 = vadd.f32 %v1219_v13, %v1218_v23 }
 0x69c   :  { %1223 = vadd.xlane.f32.xlu0 %v1222_v59 }
 0x69f   :  { %v3180_v10 = vpop.f32.mrf.mxu0  ;;  %v3182_v3 = vpop.f32.mrf.mxu1 }
 0x6a0   :  { %v1220_v25 = vmul.f32 %v3180_v10, %v3180_v10  ;;  %v1213_v5 = vadd.f32 %v3182_v3, %v3180_v10  ;;  %v1221_v26 = vmul.f32 %v3182_v3, %v3182_v3 }
 0x6a2   :  { %1214 = vadd.xlane.f32.xlu2 %v1213_v5  ;;  %v1225_v34 = vadd.f32 %v1221_v26, %v1220_v25 }
 0x6a4   :  { %1226 = vadd.xlane.f32.xlu1 %v1225_v34 }
 0x6b0   :  { %1271 = vperm.xlu0 %2557, %v3193_v17  }
 0x6b8   :  { %2562 = vset.pattern.permute.xlu0 %v2797_v32 }
 0x6ba   :  { %1283 = vperm.xlu2 %2559, %v3193_v17  }
 0x6bd   :  { %1279 = vperm.xlu1 %2558, %v3139_v0  }
 0x6c2   :  { %2561 = vset.pattern.permute.xlu2 %v2796_v24 }
 0x6c5   :  { %2560 = vset.pattern.permute.xlu1 %v2796_v24 }
 0x6c6   :  { %1387 = vperm.xlu1 %2560, %v3139_v0  }
 0x6ce   :  { %2563 = vset.pattern.permute.xlu1 %v2797_v32 }
 0x70d   :  { %v1212_v21 = vpop.xlane.xlu1 %1211 }
 0x70e   :  { %v1216_v48 = vmul.f32 0.00390625, %v1212_v21 }
 0x70f   :  { %v1224_v35 = vpop.xlane.xlu0 %1223 }
 0x710   :  { %v1228_v36 = vmul.f32 0.00390625, %v1224_v35  ;;  %v1230_v42 = vmul.f32 %v1216_v48, %v1216_v48  ;;  %v1234_v20 = vsub.f32 %v1191_v14, %v1216_v48  ;;  %v1235_v29 = vsub.f32 %v1205_v58, %v1216_v48 }
 0x712   :  { %v1232_v37 = vsub.f32 %v1228_v36, %v1230_v42 }
 0x714   :  { %v1238_v1 = vadd.f32 1e-05, %v1232_v37 }
 0x715   :  { %v1215_v63 = vpop.xlane.xlu2 %1214 }
 0x716   :  { %2616 = vrsqrt.f32 %v1238_v1  ;;  %v1217_v38 = vmul.f32 0.00390625, %v1215_v63  ;;  %vm1246_vm2 = vweird.f32 %v1238_v1 }
 0x717   :  { %v1227_v30 = vpop.xlane.xlu1 %1226 }
 0x718   :  { %v1229_v46 = vmul.f32 0.00390625, %v1227_v30  ;;  %v1231_v50 = vmul.f32 %v1217_v38, %v1217_v38  ;;  %v1236_v59 = vsub.f32 %v3180_v10, %v1217_v38  ;;  %v1237_v25 = vsub.f32 %v3182_v3, %v1217_v38 }
 0x71a   :  { %v1233_v4 = vsub.f32 %v1229_v46, %v1231_v50 }
 0x71c   :  { %v2617_v43 = vpop.eup %2616  ;;  %v1239_v33 = vadd.f32 1e-05, %v1233_v4 }
 0x71d   :  { %v1241_v52 = vmul.f32 %v2617_v43, %v1238_v1  ;;  %vm1247_vm1 = vweird.f32 %v2617_v43  ;;  %v1284_v14 = vpop.permute.xlu2 %1283 }
 0x71e   :  { %2618 = vrsqrt.f32 %v1239_v33  ;;  %vm1248_vm3 = vmor %vm1246_vm2, %vm1247_vm1  ;;  %vm1256_vm5 = vweird.f32 %v1239_v33 }
 0x71f   :  { %v1242_v55 = vmul.f32 %v2617_v43, %v1241_v52 }
 0x721   :  { %v1243_v49 = vmul.f32 0.5, %v1242_v55 }
 0x722   :  { %v1272_v26 = vpop.permute.xlu0 %1271 }
 0x723   :  { %v1244_v56 = vsub.f32 1.5, %v1243_v49 }
 0x724   :  { %v2619_v27 = vpop.eup %2618 }
 0x725   :  { %v1251_v53 = vmul.f32 %v2619_v27, %v1239_v33  ;;  %v1245_v61 = vmul.f32 %v2617_v43, %v1244_v56  ;;  %vm1257_vm4 = vweird.f32 %v2619_v27 }
 0x726   :  { %vm1258_vm6 = vmor %vm1256_vm5, %vm1257_vm4 }
 0x727   :  { %v1252_v62 = vmul.f32 %v2619_v27, %v1251_v53  ;;  %v1249_v41 = vsel %vm1248_vm3, %v2617_v43, %v1245_v61  ;;  %v2515_v43 = vld [vmem:[%s3859_s2 + $0x38] sm:$0xff] }
 0x728   :  { %v1260_v23 = vmul.f32 %v1249_v41, %v1234_v20  ;;  %v1261_v12 = vmul.f32 %v1249_v41, %v1235_v29 }
 0x729   :  { %v1253_v6 = vmul.f32 0.5, %v1252_v62 }
 0x72a   :  { %v1274_v21 = vmul.f32 %v1267_v47, %v1260_v23  ;;  %v1275_v35 = vmul.f32 %v1267_v47, %v1261_v12 }
 0x72b   :  { %v1254_v39 = vsub.f32 1.5, %v1253_v6 }
 0x72d   :  { %v1255_v13 = vmul.f32 %v2619_v27, %v1254_v39 }
 0x72f   :  { %v1280_v5 = vpop.permute.xlu1 %1279  ;;  %v1259_v34 = vsel %vm1258_vm6, %v2619_v27, %v1255_v13 }
 0x730   :  { %v1262_v36 = vmul.f32 %v1259_v34, %v1236_v59  ;;  %v1263_v42 = vmul.f32 %v1259_v34, %v1237_v25  ;;  %v1286_v58 = vadd.f32 %v1280_v5, %v1274_v21  ;;  %v1287_v48 = vadd.f32 %v1280_v5, %v1275_v35 }
 0x732   :  { %v1276_v37 = vmul.f32 %v1272_v26, %v1262_v36  ;;  %v1277_v1 = vmul.f32 %v1272_v26, %v1263_v42  ;;  %v1290_v46 = vmax.f32 %v1286_v58, 0.0  ;;  %v1291_v50 = vmax.f32 %v1287_v48, 0.0 }
 0x734   :  { %v1288_v63 = vadd.f32 %v1284_v14, %v1276_v37  ;;  %v1289_v30 = vadd.f32 %v1284_v14, %v1277_v1 }
 0x736   :  { %v1292_v10 = vmax.f32 %v1288_v63, 0.0  ;;  %v1293_v4 = vmax.f32 %v1289_v30, 0.0 }
 0x738   :  { %v1294_v3 = vpack.c.bf16 %v1292_v10, %v1290_v46  ;;  %v1295_v38 = vpack.c.bf16 %v1293_v4, %v1291_v50  ;;  %v1388_v20 = vpop.permute.xlu1 %1387 }
 0x73a   :  { %1311 = vmatpush.bf16.msra.mxu2 %v1294_v3  ;;  %1325 = vmatpush.bf16.msra.mxu3 %v1295_v38 }
 0x73d   :  { %2446 = vmatmul.msk.bf16.vlgmr.msra.gmra.mxu2 %vm83_vm0, %v2515_v43  ;;  %2447 = vmatmul.msk.bf16.vlgmr.msra.gmra.mxu3 %vm83_vm0, %v2515_v43 }
 0x7c0   :  { %v1313_v47 = vpop.f32.mrf.mxu2  ;;  %v1327_v33 = vpop.f32.mrf.mxu3 }
 0x7c1   :  { %v1332_v52 = vadd.f32 %v1327_v33, %v1313_v47  ;;  %v1340_v55 = vmul.f32 %v1313_v47, %v1313_v47  ;;  %v1341_v49 = vmul.f32 %v1327_v33, %v1327_v33 }
 0x7c3   :  { %1333 = vadd.xlane.f32.xlu2 %v1332_v52  ;;  %v1344_v56 = vadd.f32 %v1341_v49, %v1340_v55 }
 0x7c5   :  { %1345 = vadd.xlane.f32.xlu0 %v1344_v56 }
 0x7c8   :  { %v3210_v27 = vpop.f32.mrf.mxu2  ;;  %v3212_v53 = vpop.f32.mrf.mxu3 }
 0x7c9   :  { %v1335_v61 = vadd.f32 %v3212_v53, %v3210_v27  ;;  %v1342_v62 = vmul.f32 %v3210_v27, %v3210_v27  ;;  %v1343_v6 = vmul.f32 %v3212_v53, %v3212_v53 }
 0x7cb   :  { %1336 = vadd.xlane.f32.xlu1 %v1335_v61  ;;  %v1347_v41 = vadd.f32 %v1343_v6, %v1342_v62 }
 0x7cd   :  { %1348 = vadd.xlane.f32.xlu2 %v1347_v41 }
 0x7d9   :  { %1399 = vperm.xlu0 %2562, %v3139_v0  }
 0x7e1   :  { %2568 = vset.pattern.permute.xlu0 %v2794_v7 }
 0x7e4   :  { %1403 = vperm.xlu1 %2563, %v3193_v17  }
 0x7e5   :  { %1391 = vperm.xlu2 %2561, %v3193_v17  }
 0x7ec   :  { %2565 = vset.pattern.permute.xlu1 %v2798_v60 }
 0x7ed   :  { %1421 = vperm.xlu1 %2565, %v3193_v17   ;;  %2564 = vset.pattern.permute.xlu2 %v2798_v60 }
 0x7ee   :  { %1417 = vperm.xlu2 %2564, %v3139_v0  }
 0x7f5   :  { %2566 = vset.pattern.permute.xlu1 %v2795_v16 }
 0x7f6   :  { %2567 = vset.pattern.permute.xlu2 %v2795_v16 }
 0x836   :  { %v1334_v29 = vpop.xlane.xlu2 %1333 }
 0x837   :  { %v1338_v39 = vmul.f32 0.00390625, %v1334_v29 }
 0x838   :  { %v1346_v23 = vpop.xlane.xlu0 %1345 }
 0x839   :  { %v1350_v12 = vmul.f32 0.00390625, %v1346_v23  ;;  %v1352_v13 = vmul.f32 %v1338_v39, %v1338_v39  ;;  %v1356_v50 = vsub.f32 %v1313_v47, %v1338_v39  ;;  %v1357_v10 = vsub.f32 %v1327_v33, %v1338_v39 }
 0x83b   :  { %v1354_v59 = vsub.f32 %v1350_v12, %v1352_v13 }
 0x83d   :  { %v1360_v25 = vadd.f32 1e-05, %v1354_v59 }
 0x83e   :  { %v1337_v5 = vpop.xlane.xlu1 %1336 }
 0x83f   :  { %2620 = vrsqrt.f32 %v1360_v25  ;;  %v1339_v26 = vmul.f32 0.00390625, %v1337_v5  ;;  %vm1368_vm8 = vweird.f32 %v1360_v25 }
 0x840   :  { %v1349_v17 = vpop.xlane.xlu2 %1348 }
 0x841   :  { %v1351_v34 = vmul.f32 0.00390625, %v1349_v17  ;;  %v1353_v21 = vmul.f32 %v1339_v26, %v1339_v26  ;;  %v1358_v55 = vsub.f32 %v3210_v27, %v1339_v26  ;;  %v1359_v49 = vsub.f32 %v3212_v53, %v1339_v26 }
 0x843   :  { %v1355_v35 = vsub.f32 %v1351_v34, %v1353_v21  ;;  %v3240_v21 = vld [vmem:[%s3860_s3 + $0x30] sm:$0xff] }
 0x844   :  { %1654 = vperm.xlu1 %2566, %v3240_v21  }
 0x845   :  { %v2621_v0 = vpop.eup %2620  ;;  %v1361_v36 = vadd.f32 1e-05, %v1355_v35  ;;  %v1461_v35 = vld [vmem:[#allocation5 + $0x40] sm:$0xff] }
 0x846   :  { %v1363_v42 = vmul.f32 %v2621_v0, %v1360_v25  ;;  %vm1369_vm7 = vweird.f32 %v2621_v0 }
 0x847   :  { %2622 = vrsqrt.f32 %v1361_v36  ;;  %vm1370_vm9 = vmor %vm1368_vm8, %vm1369_vm7  ;;  %vm1378_vm11 = vweird.f32 %v1361_v36 }
 0x848   :  { %v1364_v14 = vmul.f32 %v2621_v0, %v1363_v42  ;;  %v1392_v6 = vpop.permute.xlu2 %1391  ;;  %v1529_v42 = vmul.f32 0.31622776, %v1461_v35 }
 0x84a   :  { %v1365_v58 = vmul.f32 0.5, %v1364_v14 }
 0x84b   :  { %v1400_v62 = vpop.permute.xlu0 %1399 }
 0x84c   :  { %v1366_v48 = vsub.f32 1.5, %v1365_v58  ;;  %2569 = vset.pattern.permute.xlu1 %v2794_v7 }
 0x84d   :  { %v2623_v37 = vpop.eup %2622 }
 0x84e   :  { %v1373_v1 = vmul.f32 %v2623_v37, %v1361_v36  ;;  %v1367_v63 = vmul.f32 %v2621_v0, %v1366_v48  ;;  %vm1379_vm10 = vweird.f32 %v2623_v37 }
 0x84f   :  { %vm1380_vm12 = vmor %vm1378_vm11, %vm1379_vm10 }
 0x850   :  { %v1374_v30 = vmul.f32 %v2623_v37, %v1373_v1  ;;  %v1371_v46 = vsel %vm1370_vm9, %v2621_v0, %v1367_v63  ;;  %v1462_v0 = vld [vmem:[#allocation5 + $0x48] sm:$0xff]  ;;  %v1418_v36 = vpop.permute.xlu2 %1417  ;;  %v1533_v63 = vadd.f32 %v1529_v42, %v3151_v51 }
 0x851   :  { %v1382_v3 = vmul.f32 %v1371_v46, %v1356_v50  ;;  %v1383_v38 = vmul.f32 %v1371_v46, %v1357_v10  ;;  %v1530_v48 = vmul.f32 0.31622776, %v1462_v0  ;;  %v1463_v10 = vld [vmem:[#allocation5 + $0x50] sm:$0xff] }
 0x852   :  { %v1375_v4 = vmul.f32 0.5, %v1374_v30 }
 0x853   :  { %v1394_v56 = vmul.f32 %v1388_v20, %v1382_v3  ;;  %v1395_v61 = vmul.f32 %v1388_v20, %v1383_v38  ;;  %v2516_v20 = vld [vmem:[%s3859_s2 + $0x40] sm:$0xff]  ;;  %v1534_v46 = vadd.f32 %v1530_v48, %v3153_v54  ;;  %v1464_v3 = vld [vmem:[#allocation5 + $0x58] sm:$0xff] }
 0x854   :  { %v1376_v43 = vsub.f32 1.5, %v1375_v4 }
 0x855   :  { %v1406_v39 = vadd.f32 %v1400_v62, %v1394_v56  ;;  %v1407_v23 = vadd.f32 %v1400_v62, %v1395_v61 }
 0x856   :  { %v1377_v52 = vmul.f32 %v2623_v37, %v1376_v43  ;;  %v1404_v33 = vpop.permute.xlu1 %1403 }
 0x857   :  { %v1410_v5 = vmax.f32 %v1406_v39, 0.0  ;;  %v1411_v17 = vmax.f32 %v1407_v23, 0.0 }
 0x858   :  { %v1381_v41 = vsel %vm1380_vm12, %v2623_v37, %v1377_v52  ;;  %v1531_v52 = vmul.f32 0.31622776, %v1463_v10 }
 0x859   :  { %v1384_v29 = vmul.f32 %v1381_v41, %v1358_v55  ;;  %v1385_v47 = vmul.f32 %v1381_v41, %v1359_v49  ;;  %v1532_v49 = vmul.f32 0.31622776, %v1464_v3 }
 0x85a   :  { %v1535_v61 = vadd.f32 %v1531_v52, %v3165_v18 }
 0x85b   :  { %v1396_v12 = vmul.f32 %v1392_v6, %v1384_v29  ;;  %v1397_v13 = vmul.f32 %v1392_v6, %v1385_v47  ;;  %v1536_v6 = vadd.f32 %v1532_v49, %v3167_v19  ;;  %v2517_v19 = vld [vmem:[%s3859_s2 + $0x48] sm:$0xff] }
 0x85d   :  { %v1408_v59 = vadd.f32 %v1404_v33, %v1396_v12  ;;  %v1409_v25 = vadd.f32 %v1404_v33, %v1397_v13 }
 0x85f   :  { %v1412_v27 = vmax.f32 %v1408_v59, 0.0  ;;  %v1413_v34 = vmax.f32 %v1409_v25, 0.0  ;;  %v1422_v43 = vpop.permute.xlu1 %1421 }
 0x861   :  { %v1414_v53 = vpack.c.bf16 %v1412_v27, %v1410_v5  ;;  %v1415_v26 = vpack.c.bf16 %v1413_v34, %v1411_v17 }
 0x863   :  { %1439 = vmatpush.bf16.msrb.mxu0 %v1414_v53  ;;  %1453 = vmatpush.bf16.msrb.mxu1 %v1415_v26 }
 0x866   :  { %2452 = vmatmul.msk.bf16.vlgmr.msrb.gmra.mxu0 %vm83_vm0, %v2516_v20  ;;  %2453 = vmatmul.msk.bf16.vlgmr.msrb.gmra.mxu1 %vm83_vm0, %v2516_v20  ;;  %v3295_v20 = vld [vmem:[%s3860_s3 + $0x38] sm:$0xff] }
 0x8b6   :  { %v1655_v35 = vpop.permute.xlu1 %1654 }
 0x8e3   :  { %v1441_v14 = vpop.f32.mrf.mxu0  ;;  %v1455_v58 = vpop.f32.mrf.mxu1 }
 0x8e4   :  { %v3244_v37 = vadd.f32 %v1441_v14, %v1418_v36  ;;  %v3246_v1 = vadd.f32 %v1455_v58, %v1418_v36 }
 0x8e6   :  { %v1537_v30 = vmul.f32 0.1, %v3244_v37  ;;  %v1538_v50 = vmul.f32 0.1, %v3246_v1 }
 0x8e8   :  { %v3252_v4 = vsub.f32 %v1533_v63, %v1537_v30  ;;  %v3254_v38 = vsub.f32 %v1534_v46, %v1538_v50 }
 0x8ea   :  { %1546 = vst [vmem:[#allocation8 + $0x60] sm:$0xff] %v3252_v4 }
 0x8eb   :  { %1547 = vst [vmem:[#allocation8 + $0x68] sm:$0xff] %v3254_v38  ;;  %v1443_v55 = vpop.f32.mrf.mxu0  ;;  %v1457_v51 = vpop.f32.mrf.mxu1 }
 0x8ec   :  { %v3258_v56 = vadd.f32 %v1443_v55, %v1422_v43  ;;  %v3260_v54 = vadd.f32 %v1457_v51, %v1422_v43 }
 0x8ee   :  { %v1539_v62 = vmul.f32 0.1, %v3258_v56  ;;  %v1540_v41 = vmul.f32 0.1, %v3260_v54 }
 0x8f0   :  { %v3266_v29 = vsub.f32 %v1535_v61, %v1539_v62  ;;  %v3268_v47 = vsub.f32 %v1536_v6, %v1540_v41 }
 0x8f2   :  { %1548 = vst [vmem:[#allocation8 + $0x70] sm:$0xff] %v3266_v29  ;;  %v1560_v33 = vpack.c.bf16 %v3266_v29, %v3252_v4  ;;  %v1561_v18 = vpack.c.bf16 %v3268_v47, %v3254_v38 }
 0x8f3   :  { %1549 = vst [vmem:[#allocation8 + $0x78] sm:$0xff] %v3268_v47 }
 0x8f4   :  { %1577 = vmatpush.bf16.msrb.mxu2 %v1560_v33  ;;  %1591 = vmatpush.bf16.msrb.mxu3 %v1561_v18 }
 0x8f7   :  { %2466 = vmatmul.msk.bf16.vlgmr.msrb.gmra.mxu2 %vm83_vm0, %v2517_v19  ;;  %2467 = vmatmul.msk.bf16.vlgmr.msrb.gmra.mxu3 %vm83_vm0, %v2517_v19 }
 0x97a   :  { %v1579_v39 = vpop.f32.mrf.mxu2  ;;  %v1593_v23 = vpop.f32.mrf.mxu3 }
 0x97b   :  { %v1606_v12 = vmul.f32 %v1579_v39, %v1579_v39  ;;  %v1598_v13 = vadd.f32 %v1593_v23, %v1579_v39  ;;  %v1607_v59 = vmul.f32 %v1593_v23, %v1593_v23 }
 0x97d   :  { %1599 = vadd.xlane.f32.xlu2 %v1598_v13  ;;  %v1610_v25 = vadd.f32 %v1607_v59, %v1606_v12 }
 0x97f   :  { %1611 = vadd.xlane.f32.xlu0 %v1610_v25 }
 0x982   :  { %v3281_v5 = vpop.f32.mrf.mxu2  ;;  %v3283_v17 = vpop.f32.mrf.mxu3 }
 0x983   :  { %v1608_v27 = vmul.f32 %v3281_v5, %v3281_v5  ;;  %v1601_v34 = vadd.f32 %v3283_v17, %v3281_v5  ;;  %v1609_v53 = vmul.f32 %v3283_v17, %v3283_v17 }
 0x985   :  { %1602 = vadd.xlane.f32.xlu1 %v1601_v34  ;;  %v1613_v26 = vadd.f32 %v1609_v53, %v1608_v27 }
 0x987   :  { %1614 = vadd.xlane.f32.xlu2 %v1613_v26 }
 0x993   :  { %1667 = vperm.xlu0 %2568, %v3240_v21  }
 0x99b   :  { %2572 = vset.pattern.permute.xlu0 %v2797_v32 }
 0x99e   :  { %1671 = vperm.xlu1 %2569, %v3295_v20  }
 0x99f   :  { %1659 = vperm.xlu2 %2567, %v3295_v20  }
 0x9a6   :  { %2570 = vset.pattern.permute.xlu1 %v2796_v24 }
 0x9a7   :  { %1775 = vperm.xlu1 %2570, %v3240_v21   ;;  %2571 = vset.pattern.permute.xlu2 %v2796_v24 }
 0x9af   :  { %2573 = vset.pattern.permute.xlu1 %v2797_v32 }
 0x9f0   :  { %v1600_v0 = vpop.xlane.xlu2 %1599 }
 0x9f1   :  { %v1604_v36 = vmul.f32 0.00390625, %v1600_v0 }
 0x9f2   :  { %v1612_v42 = vpop.xlane.xlu0 %1611 }
 0x9f3   :  { %v1616_v14 = vmul.f32 0.00390625, %v1612_v42  ;;  %v1618_v58 = vmul.f32 %v1604_v36, %v1604_v36  ;;  %v1622_v12 = vsub.f32 %v1579_v39, %v1604_v36  ;;  %v1623_v13 = vsub.f32 %v1593_v23, %v1604_v36 }
 0x9f5   :  { %v1620_v48 = vsub.f32 %v1616_v14, %v1618_v58 }
 0x9f7   :  { %v1626_v63 = vadd.f32 1e-05, %v1620_v48 }
 0x9f8   :  { %v1603_v30 = vpop.xlane.xlu1 %1602 }
 0x9f9   :  { %2624 = vrsqrt.f32 %v1626_v63  ;;  %v1605_v46 = vmul.f32 0.00390625, %v1603_v30  ;;  %vm1634_vm14 = vweird.f32 %v1626_v63 }
 0x9fa   :  { %v1615_v50 = vpop.xlane.xlu2 %1614 }
 0x9fb   :  { %v1617_v10 = vmul.f32 0.00390625, %v1615_v50  ;;  %v1619_v3 = vmul.f32 %v1605_v46, %v1605_v46  ;;  %v1624_v26 = vsub.f32 %v3281_v5, %v1605_v46  ;;  %v1625_v0 = vsub.f32 %v3283_v17, %v1605_v46 }
 0x9fd   :  { %v1621_v43 = vsub.f32 %v1617_v10, %v1619_v3 }
 0x9ff   :  { %v2625_v52 = vpop.eup %2624  ;;  %v1627_v55 = vadd.f32 1e-05, %v1621_v43 }
 0xa00   :  { %v1629_v51 = vmul.f32 %v2625_v52, %v1626_v63  ;;  %vm1635_vm13 = vweird.f32 %v2625_v52 }
 0xa01   :  { %2626 = vrsqrt.f32 %v1627_v55  ;;  %vm1636_vm15 = vmor %vm1634_vm14, %vm1635_vm13  ;;  %vm1644_vm2 = vweird.f32 %v1627_v55 }
 0xa02   :  { %v1630_v49 = vmul.f32 %v2625_v52, %v1629_v51  ;;  %v1660_v48 = vpop.permute.xlu2 %1659 }
 0xa04   :  { %v1631_v61 = vmul.f32 0.5, %v1630_v49 }
 0xa05   :  { %v1668_v58 = vpop.permute.xlu0 %1667 }
 0xa06   :  { %v1632_v62 = vsub.f32 1.5, %v1631_v61 }
 0xa07   :  { %v2627_v6 = vpop.eup %2626 }
 0xa08   :  { %v1639_v41 = vmul.f32 %v2627_v6, %v1627_v55  ;;  %v1633_v33 = vmul.f32 %v2625_v52, %v1632_v62  ;;  %vm1645_vm1 = vweird.f32 %v2627_v6 }
 0xa09   :  { %vm1646_vm3 = vmor %vm1644_vm2, %vm1645_vm1 }
 0xa0a   :  { %v1640_v18 = vmul.f32 %v2627_v6, %v1639_v41  ;;  %v1637_v19 = vsel %vm1636_vm15, %v2625_v52, %v1633_v33 }
 0xa0b   :  { %v1648_v25 = vmul.f32 %v1637_v19, %v1622_v12  ;;  %v1649_v27 = vmul.f32 %v1637_v19, %v1623_v13 }
 0xa0c   :  { %v1641_v59 = vmul.f32 0.5, %v1640_v18 }
 0xa0d   :  { %v1662_v42 = vmul.f32 %v1655_v35, %v1648_v25  ;;  %v1663_v14 = vmul.f32 %v1655_v35, %v1649_v27  ;;  %v2518_v35 = vld [vmem:[%s3859_s2 + $0x50] sm:$0xff] }
 0xa0e   :  { %v1642_v34 = vsub.f32 1.5, %v1641_v59 }
 0xa0f   :  { %v1674_v36 = vadd.f32 %v1668_v58, %v1662_v42  ;;  %v1675_v50 = vadd.f32 %v1668_v58, %v1663_v14 }
 0xa10   :  { %v1643_v53 = vmul.f32 %v2627_v6, %v1642_v34  ;;  %v1672_v23 = vpop.permute.xlu1 %1671 }
 0xa11   :  { %v1678_v55 = vmax.f32 %v1674_v36, 0.0  ;;  %v1679_v51 = vmax.f32 %v1675_v50, 0.0 }
 0xa12   :  { %v1647_v63 = vsel %vm1646_vm3, %v2627_v6, %v1643_v53 }
 0xa13   :  { %v1650_v30 = vmul.f32 %v1647_v63, %v1624_v26  ;;  %v1651_v39 = vmul.f32 %v1647_v63, %v1625_v0 }
 0xa15   :  { %v1664_v10 = vmul.f32 %v1660_v48, %v1650_v30  ;;  %v1665_v3 = vmul.f32 %v1660_v48, %v1651_v39 }
 0xa17   :  { %v1676_v43 = vadd.f32 %v1672_v23, %v1664_v10  ;;  %v1677_v52 = vadd.f32 %v1672_v23, %v1665_v3 }
 0xa19   :  { %v1680_v5 = vmax.f32 %v1676_v43, 0.0  ;;  %v1681_v49 = vmax.f32 %v1677_v52, 0.0  ;;  %v1776_v34 = vpop.permute.xlu1 %1775 }
 0xa1b   :  { %v1682_v17 = vpack.c.bf16 %v1680_v5, %v1678_v55  ;;  %v1683_v46 = vpack.c.bf16 %v1681_v49, %v1679_v51 }
 0xa1d   :  { %1699 = vmatpush.bf16.msra.mxu0 %v1682_v17  ;;  %1713 = vmatpush.bf16.msra.mxu1 %v1683_v46 }
 0xa20   :  { %2472 = vmatmul.msk.bf16.vlgmr.msra.gmra.mxu0 %vm83_vm0, %v2518_v35  ;;  %2473 = vmatmul.msk.bf16.vlgmr.msra.gmra.mxu1 %vm83_vm0, %v2518_v35 }
 0xa9d   :  { %v1701_v61 = vpop.f32.mrf.mxu0  ;;  %v1715_v62 = vpop.f32.mrf.mxu1 }
 0xa9e   :  { %v1720_v6 = vadd.f32 %v1715_v62, %v1701_v61  ;;  %v1728_v41 = vmul.f32 %v1701_v61, %v1701_v61  ;;  %v1729_v33 = vmul.f32 %v1715_v62, %v1715_v62 }
 0xaa0   :  { %1721 = vadd.xlane.f32.xlu2 %v1720_v6  ;;  %v1732_v18 = vadd.f32 %v1729_v33, %v1728_v41 }
 0xaa2   :  { %1733 = vadd.xlane.f32.xlu0 %v1732_v18 }
 0xaa5   :  { %v3311_v19 = vpop.f32.mrf.mxu0  ;;  %v3313_v12 = vpop.f32.mrf.mxu1 }
 0xaa6   :  { %v1723_v13 = vadd.f32 %v3313_v12, %v3311_v19  ;;  %v1730_v59 = vmul.f32 %v3311_v19, %v3311_v19  ;;  %v1731_v25 = vmul.f32 %v3313_v12, %v3313_v12 }
 0xaa8   :  { %1724 = vadd.xlane.f32.xlu1 %v1723_v13  ;;  %v1735_v27 = vadd.f32 %v1731_v25, %v1730_v59 }
 0xaaa   :  { %1736 = vadd.xlane.f32.xlu2 %v1735_v27 }
 0xab6   :  { %1787 = vperm.xlu0 %2572, %v3240_v21  }
 0xabe   :  { %2578 = vset.pattern.permute.xlu0 %v2794_v7 }
 0xac1   :  { %1791 = vperm.xlu1 %2573, %v3295_v20  }
 0xac2   :  { %1779 = vperm.xlu2 %2571, %v3295_v20  }
 0xac9   :  { %2575 = vset.pattern.permute.xlu1 %v2798_v60 }
 0xaca   :  { %1809 = vperm.xlu1 %2575, %v3295_v20   ;;  %2574 = vset.pattern.permute.xlu2 %v2798_v60 }
 0xacb   :  { %1805 = vperm.xlu2 %2574, %v3240_v21  }
 0xad2   :  { %2576 = vset.pattern.permute.xlu1 %v2795_v16 }
 0xad3   :  { %2577 = vset.pattern.permute.xlu2 %v2795_v16 }
 0xb13   :  { %v1722_v53 = vpop.xlane.xlu2 %1721 }
 0xb14   :  { %v1726_v26 = vmul.f32 0.00390625, %v1722_v53 }
 0xb15   :  { %v1734_v0 = vpop.xlane.xlu0 %1733 }
 0xb16   :  { %v1738_v42 = vmul.f32 0.00390625, %v1734_v0  ;;  %v1740_v14 = vmul.f32 %v1726_v26, %v1726_v26  ;;  %v1744_v35 = vsub.f32 %v1701_v61, %v1726_v26  ;;  %v1745_v6 = vsub.f32 %v1715_v62, %v1726_v26 }
 0xb18   :  { %v1742_v58 = vsub.f32 %v1738_v42, %v1740_v14 }
 0xb1a   :  { %v1748_v48 = vadd.f32 1e-05, %v1742_v58 }
 0xb1b   :  { %v1725_v63 = vpop.xlane.xlu1 %1724 }
 0xb1c   :  { %2628 = vrsqrt.f32 %v1748_v48  ;;  %v1727_v30 = vmul.f32 0.00390625, %v1725_v63  ;;  %vm1756_vm5 = vweird.f32 %v1748_v48 }
 0xb1d   :  { %v1737_v39 = vpop.xlane.xlu2 %1736 }
 0xb1e   :  { %v1739_v23 = vmul.f32 0.00390625, %v1737_v39  ;;  %v1741_v36 = vmul.f32 %v1727_v30, %v1727_v30  ;;  %v1746_v25 = vsub.f32 %v3311_v19, %v1727_v30  ;;  %v1747_v27 = vsub.f32 %v3313_v12, %v1727_v30 }
 0xb20   :  { %v1743_v50 = vsub.f32 %v1739_v23, %v1741_v36 }
 0xb22   :  { %v2629_v10 = vpop.eup %2628  ;;  %v1749_v3 = vadd.f32 1e-05, %v1743_v50 }
 0xb23   :  { %v1751_v43 = vmul.f32 %v2629_v10, %v1748_v48  ;;  %vm1757_vm4 = vweird.f32 %v2629_v10 }
 0xb24   :  { %2630 = vrsqrt.f32 %v1749_v3  ;;  %vm1758_vm6 = vmor %vm1756_vm5, %vm1757_vm4  ;;  %vm1766_vm8 = vweird.f32 %v1749_v3 }
 0xb25   :  { %v1752_v16 = vmul.f32 %v2629_v10, %v1751_v43  ;;  %v1780_v14 = vpop.permute.xlu2 %1779 }
 0xb27   :  { %v1753_v52 = vmul.f32 0.5, %v1752_v16  ;;  %v3338_v16 = vld [vmem:[#allocation5 + $0x60] sm:$0xff] }
 0xb28   :  { %v1788_v42 = vpop.permute.xlu0 %1787 }
 0xb29   :  { %v1754_v55 = vsub.f32 1.5, %v1753_v52  ;;  %v3340_v52 = vld [vmem:[#allocation5 + $0x68] sm:$0xff] }
 0xb2a   :  { %v2631_v51 = vpop.eup %2630 }
 0xb2b   :  { %v1761_v5 = vmul.f32 %v2631_v51, %v1749_v3  ;;  %v1755_v49 = vmul.f32 %v2629_v10, %v1754_v55  ;;  %vm1767_vm7 = vweird.f32 %v2631_v51 }
 0xb2c   :  { %vm1768_vm9 = vmor %vm1766_vm8, %vm1767_vm7 }
 0xb2d   :  { %v1762_v17 = vmul.f32 %v2631_v51, %v1761_v5  ;;  %v1759_v46 = vsel %vm1758_vm6, %v2629_v10, %v1755_v49  ;;  %v1806_v55 = vpop.permute.xlu2 %1805 }
 0xb2e   :  { %v1770_v33 = vmul.f32 %v1759_v46, %v1744_v35  ;;  %v1771_v18 = vmul.f32 %v1759_v46, %v1745_v6 }
 0xb2f   :  { %v1763_v41 = vmul.f32 0.5, %v1762_v17  ;;  %v1918_v17 = vmul.f32 0.31622776, %v3340_v52 }
 0xb30   :  { %v1782_v53 = vmul.f32 %v1776_v34, %v1770_v33  ;;  %v1783_v0 = vmul.f32 %v1776_v34, %v1771_v18  ;;  %v2519_v34 = vld [vmem:[%s3859_s2 + $0x58] sm:$0xff] }
 0xb31   :  { %v1764_v13 = vsub.f32 1.5, %v1763_v41  ;;  %v1922_v33 = vadd.f32 %v1918_v17, %v3254_v38 }
 0xb32   :  { %v1794_v26 = vadd.f32 %v1788_v42, %v1782_v53  ;;  %v1795_v63 = vadd.f32 %v1788_v42, %v1783_v0 }
 0xb33   :  { %v1765_v59 = vmul.f32 %v2631_v51, %v1764_v13  ;;  %v1792_v62 = vpop.permute.xlu1 %1791  ;;  %v3352_v13 = vld [vmem:[#allocation5 + $0x70] sm:$0xff] }
 0xb34   :  { %v1798_v10 = vmax.f32 %v1794_v26, 0.0  ;;  %v1799_v3 = vmax.f32 %v1795_v63, 0.0  ;;  %v1919_v0 = vmul.f32 0.31622776, %v3352_v13 }
 0xb35   :  { %v1769_v58 = vsel %vm1768_vm9, %v2631_v51, %v1765_v59  ;;  %v1917_v51 = vmul.f32 0.31622776, %v3338_v16 }
 0xb36   :  { %v1772_v48 = vmul.f32 %v1769_v58, %v1746_v25  ;;  %v1773_v61 = vmul.f32 %v1769_v58, %v1747_v27  ;;  %v3356_v25 = vld [vmem:[#allocation5 + $0x78] sm:$0xff] }
 0xb37   :  { %v1921_v6 = vadd.f32 %v1917_v51, %v3252_v4  ;;  %v1920_v38 = vmul.f32 0.31622776, %v3356_v25  ;;  %v3411_v51 = vld [vmem:[%s3860_s3 + $0x40] sm:$0xff] }
 0xb38   :  { %v1784_v39 = vmul.f32 %v1780_v14, %v1772_v48  ;;  %v1785_v23 = vmul.f32 %v1780_v14, %v1773_v61  ;;  %v1923_v48 = vadd.f32 %v1919_v0, %v3266_v29 }
 0xb3a   :  { %v1796_v36 = vadd.f32 %v1792_v62, %v1784_v39  ;;  %v1797_v50 = vadd.f32 %v1792_v62, %v1785_v23  ;;  %v1924_v62 = vadd.f32 %v1920_v38, %v3268_v47  ;;  %v2520_v47 = vld [vmem:[%s3859_s2 + $0x60] sm:$0xff] }
 0xb3c   :  { %v1800_v19 = vmax.f32 %v1796_v36, 0.0  ;;  %v1801_v43 = vmax.f32 %v1797_v50, 0.0  ;;  %v1810_v53 = vpop.permute.xlu1 %1809 }
 0xb3e   :  { %v1802_v12 = vpack.c.bf16 %v1800_v19, %v1798_v10  ;;  %v1803_v30 = vpack.c.bf16 %v1801_v43, %v1799_v3 }
 0xb40   :  { %1827 = vmatpush.bf16.msra.mxu2 %v1802_v12  ;;  %1841 = vmatpush.bf16.msra.mxu3 %v1803_v30 }
 0xb43   :  { %2478 = vmatmul.msk.bf16.vlgmr.msra.gmra.mxu2 %vm83_vm0, %v2519_v34  ;;  %2479 = vmatmul.msk.bf16.vlgmr.msra.gmra.mxu3 %vm83_vm0, %v2519_v34 }
 0xbc6   :  { %v1829_v5 = vpop.f32.mrf.mxu2  ;;  %v1843_v49 = vpop.f32.mrf.mxu3 }
 0xbc7   :  { %v3344_v46 = vadd.f32 %v1829_v5, %v1806_v55  ;;  %v3346_v35 = vadd.f32 %v1843_v49, %v1806_v55  ;;  %v3406_v55 = vld [vmem:[%s3860_s3 + $0x48] sm:$0xff] }
 0xbc9   :  { %v1925_v41 = vmul.f32 0.1, %v3344_v46  ;;  %v1926_v18 = vmul.f32 0.1, %v3346_v35 }
 0xbcb   :  { %v3354_v59 = vsub.f32 %v1921_v6, %v1925_v41  ;;  %v3358_v27 = vsub.f32 %v1922_v33, %v1926_v18 }
 0xbcd   :  { %1934 = vst [vmem:[#allocation8 + $0x80] sm:$0xff] %v3354_v59 }
 0xbce   :  { %1935 = vst [vmem:[#allocation8 + $0x88] sm:$0xff] %v3358_v27  ;;  %v1831_v4 = vpop.f32.mrf.mxu2  ;;  %v1845_v42 = vpop.f32.mrf.mxu3 }
 0xbcf   :  { %v3364_v14 = vadd.f32 %v1831_v4, %v1810_v53  ;;  %v3366_v58 = vadd.f32 %v1845_v42, %v1810_v53 }
 0xbd1   :  { %v1927_v61 = vmul.f32 0.1, %v3364_v14  ;;  %v1928_v26 = vmul.f32 0.1, %v3366_v58 }
 0xbd3   :  { %v3372_v63 = vsub.f32 %v1923_v48, %v1927_v61  ;;  %v3374_v39 = vsub.f32 %v1924_v62, %v1928_v26 }
 0xbd5   :  { %1936 = vst [vmem:[#allocation8 + $0x90] sm:$0xff] %v3372_v63  ;;  %v1948_v23 = vpack.c.bf16 %v3372_v63, %v3354_v59  ;;  %v1949_v29 = vpack.c.bf16 %v3374_v39, %v3358_v27 }
 0xbd6   :  { %1937 = vst [vmem:[#allocation8 + $0x98] sm:$0xff] %v3374_v39 }
 0xbd7   :  { %1965 = vmatpush.bf16.msrb.mxu0 %v1948_v23  ;;  %1979 = vmatpush.bf16.msrb.mxu1 %v1949_v29 }
 0xbda   :  { %2492 = vmatmul.msk.bf16.vlgmr.msrb.gmra.mxu0 %vm83_vm0, %v2520_v47  ;;  %2493 = vmatmul.msk.bf16.vlgmr.msrb.gmra.mxu1 %vm83_vm0, %v2520_v47 }
 0xc57   :  { %v3387_v36 = vpop.f32.mrf.mxu0  ;;  %v3389_v50 = vpop.f32.mrf.mxu1 }
 0xc58   :  { %v1994_v10 = vmul.f32 %v3387_v36, %v3387_v36  ;;  %v1986_v3 = vadd.f32 %v3389_v50, %v3387_v36  ;;  %v1995_v19 = vmul.f32 %v3389_v50, %v3389_v50 }
 0xc5a   :  { %1987 = vadd.xlane.f32.xlu2 %v1986_v3  ;;  %v1998_v43 = vadd.f32 %v1995_v19, %v1994_v10 }
 0xc5c   :  { %1999 = vadd.xlane.f32.xlu0 %v1998_v43 }
 0xc5f   :  { %v3397_v12 = vpop.f32.mrf.mxu0  ;;  %v3399_v30 = vpop.f32.mrf.mxu1 }
 0xc60   :  { %v1989_v34 = vadd.f32 %v3399_v30, %v3397_v12  ;;  %v1996_v5 = vmul.f32 %v3397_v12, %v3397_v12  ;;  %v1997_v49 = vmul.f32 %v3399_v30, %v3399_v30 }
 0xc62   :  { %1990 = vadd.xlane.f32.xlu1 %v1989_v34  ;;  %v2001_v17 = vadd.f32 %v1997_v49, %v1996_v5 }
 0xc70   :  { %2055 = vperm.xlu0 %2578, %v3411_v51  }
 0xc72   :  { %2047 = vperm.xlu2 %2577, %v3406_v55  }
 0xc78   :  { %2583 = vset.pattern.permute.xlu0 %v2797_v32 }
 0xc7a   :  { %2579 = vset.pattern.permute.xlu2 %v2794_v7 }
 0xc7b   :  { %2042 = vperm.xlu1 %2576, %v3411_v51  }
 0xc83   :  { %2581 = vset.pattern.permute.xlu1 %v2796_v24 }
 0xc9b   :  { %2002 = vadd.xlane.f32.xlu2 %v2001_v17 }
 0xcb3   :  { %2059 = vperm.xlu2 %2579, %v3406_v55  }
 0xcbb   :  { %2580 = vset.pattern.permute.xlu2 %v2796_v24 }
 0xcbc   :  { %2163 = vperm.xlu2 %2580, %v3411_v51  }
 0xcc4   :  { %2582 = vset.pattern.permute.xlu2 %v2797_v32 }
 0xccd   :  { %v1988_v7 = vpop.xlane.xlu2 %1987 }
 0xcce   :  { %v1992_v6 = vmul.f32 0.00390625, %v1988_v7 }
 0xccf   :  { %v2000_v41 = vpop.xlane.xlu0 %1999 }
 0xcd0   :  { %v2004_v33 = vmul.f32 0.00390625, %v2000_v41  ;;  %v2006_v18 = vmul.f32 %v1992_v6, %v1992_v6  ;;  %v2010_v41 = vsub.f32 %v3387_v36, %v1992_v6 }
 0xcd2   :  { %v2008_v53 = vsub.f32 %v2004_v33, %v2006_v18  ;;  %v2011_v33 = vsub.f32 %v3389_v50, %v1992_v6 }
 0xcd4   :  { %v2014_v0 = vadd.f32 1e-05, %v2008_v53 }
 0xcd5   :  { %v2048_v4 = vpop.permute.xlu2 %2047  ;;  %v1991_v42 = vpop.xlane.xlu1 %1990 }
 0xcd6   :  { %2632 = vrsqrt.f32 %v2014_v0  ;;  %v1993_v48 = vmul.f32 0.00390625, %v1991_v42  ;;  %vm2022_vm11 = vweird.f32 %v2014_v0 }
 0xcd8   :  { %v2007_v23 = vmul.f32 %v1993_v48, %v1993_v48 }
 0xcdc   :  { %v2633_v38 = vpop.eup %2632 }
 0xcdd   :  { %v2017_v61 = vmul.f32 %v2633_v38, %v2014_v0  ;;  %vm2023_vm10 = vweird.f32 %v2633_v38 }
 0xcde   :  { %vm2024_vm12 = vmor %vm2022_vm11, %vm2023_vm10 }
 0xcdf   :  { %v2018_v29 = vmul.f32 %v2633_v38, %v2017_v61 }
 0xce1   :  { %v2019_v3 = vmul.f32 0.5, %v2018_v29 }
 0xce3   :  { %v2020_v19 = vsub.f32 1.5, %v2019_v3 }
 0xce5   :  { %v2021_v34 = vmul.f32 %v2633_v38, %v2020_v19 }
 0xce7   :  { %v2025_v17 = vsel %vm2024_vm12, %v2633_v38, %v2021_v34  ;;  %v2056_v38 = vpop.permute.xlu0 %2055  ;;  %vm659_vm12 = vcmask 1040384  }
 0xce8   :  { %v2036_v42 = vmul.f32 %v2025_v17, %v2010_v41  ;;  %v2037_v61 = vmul.f32 %v2025_v17, %v2011_v33 }
 0xced   :  { %v2043_v18 = vpop.permute.xlu1 %2042 }
 0xcee   :  { %v2050_v0 = vmul.f32 %v2043_v18, %v2036_v42  ;;  %v2051_v29 = vmul.f32 %v2043_v18, %v2037_v61 }
 0xcf0   :  { %v2062_v50 = vadd.f32 %v2056_v38, %v2050_v0  ;;  %v2063_v6 = vadd.f32 %v2056_v38, %v2051_v29 }
 0xd0e   :  { %v2003_v62 = vpop.xlane.xlu2 %2002 }
 0xd0f   :  { %v2005_v26 = vmul.f32 0.00390625, %v2003_v62 }
 0xd11   :  { %v2009_v47 = vsub.f32 %v2005_v26, %v2007_v23  ;;  %v2012_v26 = vsub.f32 %v3397_v12, %v1993_v48  ;;  %v2013_v23 = vsub.f32 %v3399_v30, %v1993_v48  ;;  %v2521_v48 = vld [vmem:[%s3859_s2 + $0x68] sm:$0xff] }
 0xd13   :  { %v2015_v10 = vadd.f32 1e-05, %v2009_v47 }
 0xd15   :  { %2634 = vrsqrt.f32 %v2015_v10  ;;  %vm2032_vm14 = vweird.f32 %v2015_v10 }
 0xd16   :  { %v2060_v19 = vpop.permute.xlu2 %2059 }
 0xd1b   :  { %v2635_v43 = vpop.eup %2634 }
 0xd1c   :  { %v2027_v5 = vmul.f32 %v2635_v43, %v2015_v10  ;;  %vm2033_vm13 = vweird.f32 %v2635_v43  ;;  %v2066_v10 = vmax.f32 %v2062_v50, 0.0  ;;  %v545_v50 = vadd.f32 %v3103_v40, %v3101_v8 }
 0xd1d   :  { %vm2034_vm15 = vmor %vm2032_vm14, %vm2033_vm13 }
 0xd1e   :  { %v2028_v49 = vmul.f32 %v2635_v43, %v2027_v5 }
 0xd20   :  { %v2029_v7 = vmul.f32 0.5, %v2028_v49 }
 0xd22   :  { %v2030_v53 = vsub.f32 1.5, %v2029_v7  ;;  %v2067_v7 = vmax.f32 %v2063_v6, 0.0  ;;  %v555_v6 = vmul.f32 %v3105_v9, %v3105_v9 }
 0xd24   :  { %v2031_v62 = vmul.f32 %v2635_v43, %v2030_v53 }
 0xd26   :  { %v2035_v47 = vsel %vm2034_vm15, %v2635_v43, %v2031_v62 }
 0xd27   :  { %v2038_v3 = vmul.f32 %v2035_v47, %v2012_v26  ;;  %v2039_v36 = vmul.f32 %v2035_v47, %v2013_v23  ;;  %v553_v47 = vmul.f32 %v3101_v8, %v3101_v8 }
 0xd29   :  { %v2052_v34 = vmul.f32 %v2048_v4, %v2038_v3  ;;  %v2053_v5 = vmul.f32 %v2048_v4, %v2039_v36  ;;  %v554_v3 = vmul.f32 %v3103_v40, %v3103_v40 }
 0xd2b   :  { %v2064_v49 = vadd.f32 %v2060_v19, %v2052_v34  ;;  %v2065_v17 = vadd.f32 %v2060_v19, %v2053_v5  ;;  %v557_v36 = vadd.f32 %v554_v3, %v553_v47  ;;  %v548_v19 = vadd.f32 %v3107_v11, %v3105_v9  ;;  %v2646_v5 = vld [vmem:[%s3862_s5 + $0x8] sm:$0xff] }
 0xd2d   :  { %v2068_v41 = vmax.f32 %v2064_v49, 0.0  ;;  %v2069_v12 = vmax.f32 %v2065_v17, 0.0  ;;  %v2799_v49 = vmov 5   ;;  %v2647_v17 = vld [vmem:[%s3860_s3 + $0x10] sm:$0xff] }
 0xd2f   :  { %v2070_v33 = vpack.c.bf16 %v2068_v41, %v2066_v10  ;;  %v2071_v30 = vpack.c.bf16 %v2069_v12, %v2067_v7  ;;  %v2648_v10 = vld [vmem:[%s3862_s5] sm:$0xff]  ;;  %v2164_v41 = vpop.permute.xlu2 %2163 }
 0xd30   :  { %v2649_v7 = vld [vmem:[%s3860_s3 + $0x20] sm:$0xff] }
 0xd31   :  { %2087 = vmatpush.bf16.msrb.mxu2 %v2070_v33  ;;  %2101 = vmatpush.bf16.msrb.mxu3 %v2071_v30 }
 0xd34   :  { %2498 = vmatmul.msk.bf16.vlgmr.msrb.gmra.mxu2 %vm83_vm0, %v2521_v48  ;;  %2499 = vmatmul.msk.bf16.vlgmr.msrb.gmra.mxu3 %vm83_vm0, %v2521_v48 }
 0xdb7   :  { %v3436_v43 = vpop.f32.mrf.mxu2  ;;  %v3438_v4 = vpop.f32.mrf.mxu3 }
 0xdb8   :  { %v2108_v18 = vadd.f32 %v3438_v4, %v3436_v43  ;;  %v2116_v53 = vmul.f32 %v3436_v43, %v3436_v43  ;;  %v2117_v42 = vmul.f32 %v3438_v4, %v3438_v4 }
 0xdba   :  { %2109 = vadd.xlane.f32.xlu1 %v2108_v18  ;;  %v2120_v61 = vadd.f32 %v2117_v42, %v2116_v53 }
 0xdbc   :  { %2121 = vadd.xlane.f32.xlu0 %v2120_v61 }
 0xdbf   :  { %v3446_v62 = vpop.f32.mrf.mxu2  ;;  %v3448_v26 = vpop.f32.mrf.mxu3 }
 0xdc0   :  { %v2118_v23 = vmul.f32 %v3446_v62, %v3446_v62  ;;  %v2119_v0 = vmul.f32 %v3448_v26, %v3448_v26  ;;  %v2111_v29 = vadd.f32 %v3448_v26, %v3446_v62 }
 0xdc2   :  { %2112 = vadd.xlane.f32.xlu2 %v2111_v29  ;;  %v2123_v38 = vadd.f32 %v2119_v0, %v2118_v23 }
 0xdc4   :  { %2124 = vadd.xlane.f32.xlu1 %v2123_v38 }
 0xdd0   :  { %2179 = vperm.xlu0 %2583, %v3406_v55  }
 0xdd8   :  { %2588 = vset.pattern.permute.xlu0 %v2798_v60 }
 0xdda   :  { %2175 = vperm.xlu2 %2582, %v3411_v51  }
 0xddd   :  { %2167 = vperm.xlu1 %2581, %v3406_v55  }
 0xde2   :  { %2584 = vset.pattern.permute.xlu2 %v2796_v24  ;;  %v556_v24 = vmul.f32 %v3107_v11, %v3107_v11 }
 0xde4   :  { %v560_v34 = vadd.f32 %v556_v24, %v555_v6 }
 0xdfa   :  { %558 = vadd.xlane.f32.xlu0 %v557_v36 }
 0xe03   :  { %549 = vadd.xlane.f32.xlu2 %v548_v19 }
 0xe07   :  { %546 = vadd.xlane.f32.xlu1 %v545_v50 }
 0xe0e   :  { %632 = vperm.xlu0 %2588, %v2646_v5  }
 0xe0f   :  { %561 = vadd.xlane.f32.xlu1 %v560_v34 }
 0xe16   :  { %2591 = vset.pattern.permute.xlu0 %v2799_v49 }
 0xe17   :  { %1078 = vperm.xlu0 %2591, %v2647_v17  }
 0xe1b   :  { %600 = vperm.xlu2 %2584, %v2648_v10  }
 0xe1f   :  { %1466 = vperm.xlu0 %2591, %v2649_v7  }
 0xe23   :  { %2585 = vset.pattern.permute.xlu2 %v2797_v32 }
 0xe24   :  { %612 = vperm.xlu2 %2585, %v2648_v10  }
 0xe27   :  { %1854 = vperm.xlu0 %2591, %v3240_v21  }
 0xe28   :  { %604 = vperm.xlu1 %2581, %v2646_v5  }
 0xe2c   :  { %2587 = vset.pattern.permute.xlu2 %v2798_v60 }
 0xe2d   :  { %v2110_v12 = vpop.xlane.xlu1 %2109  ;;  %628 = vperm.xlu2 %2587, %v2648_v10  }
 0xe2e   :  { %v2114_v33 = vmul.f32 0.00390625, %v2110_v12 }
 0xe2f   :  { %1858 = vperm.xlu0 %2591, %v3295_v20   ;;  %v2122_v30 = vpop.xlane.xlu0 %2121 }
 0xe30   :  { %v2126_v48 = vmul.f32 0.00390625, %v2122_v30  ;;  %v2128_v18 = vmul.f32 %v2114_v33, %v2114_v33  ;;  %2586 = vset.pattern.permute.xlu1 %v2797_v32  ;;  %v2132_v17 = vsub.f32 %v3436_v43, %v2114_v33 }
 0xe31   :  { %616 = vperm.xlu1 %2586, %v2646_v5  }
 0xe32   :  { %v2130_v53 = vsub.f32 %v2126_v48, %v2128_v18 }
 0xe34   :  { %v2136_v42 = vadd.f32 1e-05, %v2130_v53 }
 0xe35   :  { %v2113_v61 = vpop.xlane.xlu2 %2112  ;;  %2590 = vset.pattern.permute.xlu2 %v2799_v49 }
 0xe36   :  { %2636 = vrsqrt.f32 %v2136_v42  ;;  %v2115_v21 = vmul.f32 0.00390625, %v2113_v61  ;;  %vm2144_vm2 = vweird.f32 %v2136_v42 }
 0xe37   :  { %v2125_v23 = vpop.xlane.xlu1 %2124  ;;  %2593 = vset.pattern.permute.xlu0 %v2798_v60 }
 0xe38   :  { %v2127_v0 = vmul.f32 0.00390625, %v2125_v23  ;;  %v2129_v29 = vmul.f32 %v2115_v21, %v2115_v21  ;;  %2197 = vperm.xlu0 %2593, %v3406_v55   ;;  %v2134_v53 = vsub.f32 %v3446_v62, %v2115_v21 }
 0xe39   :  { %2589 = vset.pattern.permute.xlu1 %v2799_v49 }
 0xe3a   :  { %v2131_v20 = vsub.f32 %v2127_v0, %v2129_v29  ;;  %654 = vperm.xlu1 %2589, %v2648_v10   ;;  %v2133_v10 = vsub.f32 %v3438_v4, %v2114_v33 }
 0xe3c   :  { %v2637_v32 = vpop.eup %2636  ;;  %v2137_v38 = vadd.f32 1e-05, %v2131_v20 }
 0xe3d   :  { %v2139_v47 = vmul.f32 %v2637_v32, %v2136_v42  ;;  %vm2145_vm1 = vweird.f32 %v2637_v32  ;;  %v2135_v42 = vsub.f32 %v3448_v26, %v2115_v21  ;;  %v2176_v29 = vpop.permute.xlu2 %2175 }
 0xe3e   :  { %2638 = vrsqrt.f32 %v2137_v38  ;;  %vm2146_vm3 = vmor %vm2144_vm2, %vm2145_vm1  ;;  %vm2154_vm5 = vweird.f32 %v2137_v38 }
 0xe3f   :  { %v2140_v3 = vmul.f32 %v2637_v32, %v2139_v47 }
 0xe40   :  { %2595 = vset.pattern.permute.xlu0 %v2799_v49 }
 0xe41   :  { %v2141_v36 = vmul.f32 0.5, %v2140_v3 }
 0xe42   :  { %v2180_v4 = vpop.permute.xlu0 %2179 }
 0xe43   :  { %v2142_v19 = vsub.f32 1.5, %v2141_v36 }
 0xe44   :  { %v2639_v50 = vpop.eup %2638 }
 0xe45   :  { %v2149_v6 = vmul.f32 %v2639_v50, %v2137_v38  ;;  %v2143_v24 = vmul.f32 %v2637_v32, %v2142_v19  ;;  %vm2155_vm4 = vweird.f32 %v2639_v50 }
 0xe46   :  { %vm2156_vm6 = vmor %vm2154_vm5, %vm2155_vm4 }
 0xe47   :  { %v2150_v34 = vmul.f32 %v2639_v50, %v2149_v6  ;;  %v2147_v5 = vsel %vm2146_vm3, %v2637_v32, %v2143_v24 }
 0xe48   :  { %v2158_v12 = vmul.f32 %v2147_v5, %v2132_v17  ;;  %v2159_v30 = vmul.f32 %v2147_v5, %v2133_v10 }
 0xe49   :  { %v2151_v7 = vmul.f32 0.5, %v2150_v34 }
 0xe4a   :  { %v2170_v61 = vmul.f32 %v2164_v41, %v2158_v12  ;;  %v2171_v23 = vmul.f32 %v2164_v41, %v2159_v30  ;;  %v2522_v41 = vld [vmem:[%s3859_s2 + $0x70] sm:$0xff] }
 0xe4b   :  { %v2152_v48 = vsub.f32 1.5, %v2151_v7 }
 0xe4c   :  { %v2182_v33 = vadd.f32 %v2176_v29, %v2170_v61  ;;  %v2183_v47 = vadd.f32 %v2176_v29, %v2171_v23 }
 0xe4d   :  { %v2153_v18 = vmul.f32 %v2639_v50, %v2152_v48 }
 0xe4e   :  { %v2186_v6 = vmax.f32 %v2182_v33, 0.0  ;;  %v2187_v24 = vmax.f32 %v2183_v47, 0.0  ;;  %v2650_v47 = vld [vmem:[#allocation8 + $0x20] sm:$0xff] }
 0xe4f   :  { %v2157_v0 = vsel %vm2156_vm6, %v2639_v50, %v2153_v18  ;;  %v2168_v32 = vpop.permute.xlu1 %2167 }
 0xe50   :  { %v2160_v20 = vmul.f32 %v2157_v0, %v2134_v53  ;;  %v2161_v43 = vmul.f32 %v2157_v0, %v2135_v42 }
 0xe52   :  { %v2172_v3 = vmul.f32 %v2168_v32, %v2160_v20  ;;  %v2173_v36 = vmul.f32 %v2168_v32, %v2161_v43  ;;  %v1105_v43 = vmul.f32 0.5, %v3143_v44 }
 0xe54   :  { %v2184_v19 = vadd.f32 %v2180_v4, %v2172_v3  ;;  %v2185_v38 = vadd.f32 %v2180_v4, %v2173_v36  ;;  %v1106_v4 = vmul.f32 0.5, %v3145_v45  ;;  %v2651_v36 = vld [vmem:[#allocation8 + $0x28] sm:$0xff] }
 0xe56   :  { %v2188_v62 = vmax.f32 %v2184_v19, 0.0  ;;  %v2189_v34 = vmax.f32 %v2185_v38, 0.0  ;;  %v1089_v38 = vmul.f32 0.31622776, %v3143_v44 }
 0xe58   :  { %v2190_v26 = vpack.c.bf16 %v2188_v62, %v2186_v6  ;;  %v2191_v21 = vpack.c.bf16 %v2189_v34, %v2187_v24  ;;  %v1090_v6 = vmul.f32 0.31622776, %v3145_v45 }
 0xe5a   :  { %2215 = vmatpush.bf16.msra.mxu0 %v2190_v26  ;;  %2229 = vmatpush.bf16.msra.mxu1 %v2191_v21  ;;  %v1109_v26 = vmul.f32 %v1105_v43, %v3143_v44  ;;  %v1110_v21 = vmul.f32 %v1106_v4, %v3145_v45  ;;  %v1493_v45 = vmul.f32 0.5, %v3244_v37  ;;  %v1494_v4 = vmul.f32 0.5, %v3246_v1 }
 0xe5d   :  { %2504 = vmatmul.msk.bf16.vlgmr.msra.gmra.mxu0 %vm83_vm0, %v2522_v41  ;;  %2505 = vmatmul.msk.bf16.vlgmr.msra.gmra.mxu1 %vm83_vm0, %v2522_v41 }
 0xe6d   :  { %v559_v50 = vpop.xlane.xlu0 %558 }
 0xe6e   :  { %v563_v7 = vmul.f32 0.00390625, %v559_v50 }
 0xe76   :  { %v550_v10 = vpop.xlane.xlu2 %549 }
 0xe77   :  { %v3509_v30 = vmul.f32 0.00390625, %v550_v10 }
 0xe79   :  { %v566_v23 = vmul.f32 %v3509_v30, %v3509_v30 }
 0xe7a   :  { %v547_v5 = vpop.xlane.xlu1 %546 }
 0xe7b   :  { %v3505_v17 = vmul.f32 0.00390625, %v547_v5 }
 0xe7d   :  { %v565_v12 = vmul.f32 %v3505_v17, %v3505_v17 }
 0xe7f   :  { %v567_v48 = vsub.f32 %v563_v7, %v565_v12  ;;  %v1477_v7 = vmul.f32 0.31622776, %v3244_v37  ;;  %v2652_v12 = vld [vmem:[#allocation5 + $0x20] sm:$0xff] }
 0xe80   :  { %v3511_v18 = vpop.permute.xlu0 %632 }
 0xe81   :  { %v573_v53 = vadd.f32 1e-05, %v567_v48  ;;  %v3527_v48 = vmul.f32 %v2652_v12, %v1089_v38  ;;  %v601_v38 = vpop.permute.xlu2 %600  ;;  %v1497_v12 = vmul.f32 %v1493_v45, %v3244_v37  ;;  %v1881_v37 = vmul.f32 0.5, %v3344_v46 }
 0xe82   :  { %v562_v42 = vpop.xlane.xlu1 %561 }
 0xe83   :  { %2640 = vrsqrt.f32 %v573_v53  ;;  %v564_v61 = vmul.f32 0.00390625, %v562_v42  ;;  %v2653_v42 = vld [vmem:[#allocation5 + $0x28] sm:$0xff]  ;;  %vm581_vm7 = vweird.f32 %v573_v53 }
 0xe85   :  { %v568_v0 = vsub.f32 %v564_v61, %v566_v23  ;;  %v3529_v61 = vmul.f32 %v2653_v42, %v1090_v6  ;;  %v2654_v6 = vld [vmem:[#allocation8 + $0x40] sm:$0xff] }
 0xe87   :  { %v3515_v29 = vadd.f32 1e-05, %v568_v0 }
 0xe89   :  { %v2641_v20 = vpop.eup %2640  ;;  %2642 = vrsqrt.f32 %v3515_v29  ;;  %v1079_v32 = vpop.permute.xlu0 %1078  ;;  %vm591_vm10 = vweird.f32 %v3515_v29 }
 0xe8a   :  { %v576_v33 = vmul.f32 %v2641_v20, %v573_v53  ;;  %v1085_v3 = vsub.f32 %v2650_v47, %v1079_v32  ;;  %v1086_v19 = vsub.f32 %v2651_v36, %v1079_v32  ;;  %v1478_v32 = vmul.f32 0.31622776, %v3246_v1 }
 0xe8b   :  { %vm582_vm0 = vweird.f32 %v2641_v20  ;;  %v570_v53 = vsub.f32 %v3103_v40, %v3505_v17  ;;  %v2658_v40 = vld [vmem:[#allocation8 + $0x60] sm:$0xff] }
 0xe8c   :  { %v1097_v24 = vmul.f32 0.125, %v1085_v3  ;;  %v1098_v62 = vmul.f32 0.125, %v1086_v19  ;;  %v577_v34 = vmul.f32 %v2641_v20, %v576_v33  ;;  %vm583_vm8 = vmor %vm581_vm7, %vm582_vm0 }
 0xe8e   :  { %v1101_v41 = vmul.f32 %v1097_v24, %v1085_v3  ;;  %v1102_v50 = vmul.f32 %v1098_v62, %v1086_v19  ;;  %v578_v5 = vmul.f32 0.5, %v577_v34  ;;  %v2655_v62 = vld [vmem:[#allocation8 + $0x48] sm:$0xff] }
 0xe8f   :  { %v3524_v10 = vpop.eup %2642 }
 0xe90   :  { %v586_v23 = vmul.f32 %v3524_v10, %v3515_v29  ;;  %v1113_v0 = vadd.f32 %v1109_v26, %v1101_v41  ;;  %v1114_v44 = vadd.f32 %v1110_v21, %v1102_v50  ;;  %v579_v43 = vsub.f32 1.5, %v578_v5  ;;  %v2656_v50 = vld [vmem:[#allocation5 + $0x40] sm:$0xff]  ;;  %v2676_v21 = vld [vmem:[#allocation8 + $0x30] sm:$0xff] }
 0xe91   :  { %v1467_v33 = vpop.permute.xlu0 %1466  ;;  %v3546_v5 = vmul.f32 %v2656_v50, %v1477_v7  ;;  %v1865_v50 = vmul.f32 0.31622776, %v3344_v46  ;;  %vm592_vm9 = vweird.f32 %v3524_v10  ;;  %v572_v29 = vsub.f32 %v3107_v11, %v3509_v30 }
 0xe92   :  { %v587_v47 = vmul.f32 %v3524_v10, %v586_v23  ;;  %v3537_v3 = vmul.f32 0.1, %v1113_v0  ;;  %v3539_v36 = vmul.f32 0.1, %v1114_v44  ;;  %v580_v19 = vmul.f32 %v2641_v20, %v579_v43  ;;  %v2657_v43 = vld [vmem:[#allocation5 + $0x48] sm:$0xff]  ;;  %vm593_vm11 = vmor %vm591_vm10, %vm592_vm9 }
 0xe93   :  { %v1473_v24 = vsub.f32 %v2654_v6, %v1467_v33  ;;  %v1474_v34 = vsub.f32 %v2655_v62, %v1467_v33  ;;  %v3549_v33 = vmul.f32 %v2657_v43, %v1478_v32  ;;  %v569_v6 = vsub.f32 %v3101_v8, %v3505_v17 }
 0xe94   :  { %v588_v26 = vmul.f32 0.5, %v587_v47  ;;  %v584_v44 = vsel %vm583_vm8, %v2641_v20, %v580_v19  ;;  %v1498_v47 = vmul.f32 %v1494_v4, %v3246_v1  ;;  %v1882_v8 = vmul.f32 0.5, %v3346_v35 }
 0xe95   :  { %v1485_v42 = vmul.f32 0.125, %v1473_v24  ;;  %v1486_v23 = vmul.f32 0.125, %v1474_v34  ;;  %3868 = vst [vmem:[#allocation14_spill] sm:$0xff] %v3549_v33  ;;  %v595_v20 = vmul.f32 %v584_v44, %v569_v6  ;;  %v596_v32 = vmul.f32 %v584_v44, %v570_v53  ;;  %v2677_v33 = vld [vmem:[#allocation8 + $0x38] sm:$0xff] }
 0xe96   :  { %v589_v0 = vsub.f32 1.5, %v588_v26 }
 0xe97   :  { %v1489_v62 = vmul.f32 %v1485_v42, %v1473_v24  ;;  %v1490_v7 = vmul.f32 %v1486_v23, %v1474_v34  ;;  %v2659_v24 = vld [vmem:[#allocation8 + $0x68] sm:$0xff]  ;;  %v1866_v42 = vmul.f32 0.31622776, %v3346_v35  ;;  %v571_v23 = vsub.f32 %v3105_v9, %v3509_v30 }
 0xe98   :  { %v590_v45 = vmul.f32 %v3524_v10, %v589_v0  ;;  %v607_v53 = vmul.f32 %v601_v38, %v595_v20  ;;  %v1884_v9 = vmul.f32 0.5, %v3366_v58 }
 0xe99   :  { %v1501_v19 = vadd.f32 %v1497_v12, %v1489_v62  ;;  %v1502_v1 = vadd.f32 %v1498_v47, %v1490_v7  ;;  %v1855_v4 = vpop.permute.xlu0 %1854  ;;  %v613_v12 = vpop.permute.xlu2 %612  ;;  %v608_v62 = vmul.f32 %v601_v38, %v596_v32  ;;  %v1883_v7 = vmul.f32 0.5, %v3364_v14 }
 0xe9a   :  { %v1861_v17 = vsub.f32 %v2658_v40, %v1855_v4  ;;  %v1862_v34 = vsub.f32 %v2659_v24, %v1855_v4  ;;  %v605_v26 = vpop.permute.xlu1 %604  ;;  %v594_v6 = vsel %vm593_vm11, %v3524_v10, %v590_v45  ;;  %v1869_v24 = vmul.f32 %v1865_v50, %v3338_v16 }
 0xe9b   :  { %v3565_v0 = vmul.f32 0.1, %v1501_v19  ;;  %v3567_v44 = vmul.f32 0.1, %v1502_v1  ;;  %v1885_v19 = vmul.f32 %v1881_v37, %v3344_v46  ;;  %v1886_v1 = vmul.f32 %v1882_v8, %v3346_v35  ;;  %v2660_v35 = vld [vmem:[#allocation8 + $0x70] sm:$0xff] }
 0xe9c   :  { %v1873_v43 = vmul.f32 0.125, %v1861_v17  ;;  %v1874_v47 = vmul.f32 0.125, %v1862_v34  ;;  %v597_v11 = vmul.f32 %v594_v6, %v571_v23  ;;  %v598_v30 = vmul.f32 %v594_v6, %v572_v29 }
 0xe9d   :  { %3869 = vst [vmem:[#allocation15_spill] sm:$0xff] %v3565_v0  ;;  %v1870_v10 = vmul.f32 %v1866_v42, %v3340_v52  ;;  %v619_v20 = vadd.f32 %v613_v12, %v607_v53  ;;  %v620_v32 = vadd.f32 %v613_v12, %v608_v62  ;;  %v1867_v23 = vmul.f32 0.31622776, %v3364_v14 }
 0xe9e   :  { %3870 = vst [vmem:[#allocation16_spill] sm:$0xff] %v3567_v44  ;;  %v1877_v4 = vmul.f32 %v1873_v43, %v1861_v17  ;;  %v1878_v40 = vmul.f32 %v1874_v47, %v1862_v34  ;;  %v2661_v17 = vld [vmem:[#allocation8 + $0x78] sm:$0xff]  ;;  %v1868_v16 = vmul.f32 0.31622776, %v3366_v58  ;;  %v609_v52 = vmul.f32 %v605_v26, %v597_v11 }
 0xe9f   :  { %v610_v50 = vmul.f32 %v605_v26, %v598_v30  ;;  %v623_v6 = vmax.f32 %v619_v20, 0.0  ;;  %v624_v53 = vmax.f32 %v620_v32, 0.0 }
 0xea0   :  { %v1889_v45 = vadd.f32 %v1885_v19, %v1877_v4  ;;  %v1890_v38 = vadd.f32 %v1886_v1, %v1878_v40  ;;  %v1888_v4 = vmul.f32 %v1884_v9, %v3366_v58  ;;  %v1872_v32 = vmul.f32 %v1868_v16, %v3356_v25 }
 0xea1   :  { %v1859_v41 = vpop.permute.xlu0 %1858  ;;  %v629_v1 = vpop.permute.xlu2 %628 }
 0xea2   :  { %v1893_v46 = vmul.f32 0.1, %v1889_v45  ;;  %v1894_v37 = vmul.f32 0.1, %v1890_v38  ;;  %v1863_v8 = vsub.f32 %v2660_v35, %v1859_v41  ;;  %v1864_v34 = vsub.f32 %v2661_v17, %v1859_v41 }
 0xea3   :  { %v617_v42 = vpop.permute.xlu1 %616  ;;  %v1887_v45 = vmul.f32 %v1883_v7, %v3364_v14  ;;  %v635_v30 = vmul.f32 %v629_v1, %v623_v6 }
 0xea4   :  { %v1897_v29 = vsub.f32 %v1869_v24, %v1893_v46  ;;  %v1898_v12 = vsub.f32 %v1870_v10, %v1894_v37  ;;  %v1875_v43 = vmul.f32 0.125, %v1863_v8  ;;  %v1876_v47 = vmul.f32 0.125, %v1864_v34 }
 0xea5   :  { %v621_v62 = vadd.f32 %v617_v42, %v609_v52  ;;  %v622_v19 = vadd.f32 %v617_v42, %v610_v50  ;;  %v636_v24 = vmul.f32 %v629_v1, %v624_v53  ;;  %v1871_v46 = vmul.f32 %v1867_v23, %v3352_v13 }
 0xea6   :  { %v1879_v40 = vmul.f32 %v1875_v43, %v1863_v8  ;;  %v1880_v41 = vmul.f32 %v1876_v47, %v1864_v34 }
 0xea7   :  { %v625_v38 = vmax.f32 %v621_v62, 0.0  ;;  %v626_v35 = vmax.f32 %v622_v19, 0.0 }
 0xea8   :  { %v1891_v11 = vadd.f32 %v1887_v45, %v1879_v40  ;;  %v1892_v26 = vadd.f32 %v1888_v4, %v1880_v41 }
 0xea9   :  { %v637_v10 = vmul.f32 %v3511_v18, %v625_v38  ;;  %v638_v20 = vmul.f32 %v3511_v18, %v626_v35 }
 0xeaa   :  { %v1895_v37 = vmul.f32 0.1, %v1891_v11  ;;  %v1896_v58 = vmul.f32 0.1, %v1892_v26  ;;  %v2662_v11 = vld [vmem:[%s3860_s3] sm:$0xff]  ;;  %v2663_v26 = vld [vmem:[%s3860_s3 + $0x8] sm:$0xff] }
 0xeab   :  { %v639_v9 = vadd.f32 %v637_v10, %v635_v30  ;;  %v646_v8 = vadd.f32 %v638_v20, %v636_v24  ;;  %v2664_v10 = vld [vmem:[%s3860_s3 + $0x18] sm:$0xff]  ;;  %v3627_v20 = vld [vmem:[#allocation5 + $0x90] sm:$0xff] }
 0xeac   :  { %v1899_v17 = vsub.f32 %v1871_v46, %v1895_v37  ;;  %v1900_v14 = vsub.f32 %v1872_v32, %v1896_v58  ;;  %v3596_v23 = vpop.permute.xlu1 %654  ;;  %v3629_v32 = vld [vmem:[#allocation5 + $0x98] sm:$0xff]  ;;  %v2198_v46 = vpop.permute.xlu0 %2197  ;;  %v2665_v37 = vld [vmem:[%s3860_s3 + $0x28] sm:$0xff]  ;;  %v2307_v58 = vmul.f32 0.31622776, %v3627_v20  ;;  %s2800_s3 = smov [#allocation8]  }
 0xead   :  { %v640_v7 = vrot.slane %v639_v9, 4  ;;  %v647_v34 = vrot.slane %v646_v8, 4  ;;  %s3818_s4 = sshll.u32 %s2800_s3, 4  ;;  %s2352_s4 = int_to_ptr.vmem [resolvable:$true] %s3818_s4 }
 0xeae   :  { %v3592_v52 = vadd.f32 %v1899_v17, %v1897_v29  ;;  %v3594_v50 = vadd.f32 %v1900_v14, %v1898_v12  ;;  %v2308_v17 = vmul.f32 0.31622776, %v3629_v32 }
 0xeaf   :  { %v641_v42 = vadd.f32 %v640_v7, %v639_v9  ;;  %v648_v43 = vadd.f32 %v647_v34, %v646_v8 }
 0xeb1   :  { %v642_v47 = vrot.slane %v641_v42, 2  ;;  %v649_v18 = vrot.slane %v648_v43, 2 }
 0xeb3   :  { %v643_v6 = vadd.f32 %v642_v47, %v641_v42  ;;  %v650_v25 = vadd.f32 %v649_v18, %v648_v43  ;;  %v2311_v42 = vadd.f32 %v2307_v58, %v3372_v63  ;;  %v2312_v47 = vadd.f32 %v2308_v17, %v3374_v39  ;;  %v2669_v17 = vld [vmem:[#allocation8 + $0x8] sm:$0xff] }
 0xeb4   :  { %v1092_v58 = vmul.f32 0.31622776, %v3159_v2 }
 0xeb5   :  { %v644_v16 = vrot.slane %v643_v6, 1  ;;  %v651_v13 = vrot.slane %v650_v25, 1 }
 0xeb7   :  { %v645_v53 = vadd.f32 %v644_v16, %v643_v6  ;;  %v652_v62 = vadd.f32 %v651_v13, %v650_v25 }
 0xeb9   :  { %v3599_v19 = vadd.f32 %v3596_v23, %v645_v53  ;;  %v3602_v29 = vadd.f32 %v3596_v23, %v652_v62  ;;  %v717_v53 = vmul.f32 0.5, %v3013_v22  ;;  %v702_v62 = vmul.f32 0.31622776, %v3015_v15 }
 0xebb   :  { %v660_v12 = vsel %vm659_vm12, %v3599_v19, 0.0  ;;  %v661_v1 = vsel %vm659_vm12, %v3602_v29, 0.0  ;;  %v666_v4 = vmul.f32 %v3599_v19, %v3599_v19  ;;  %v667_v40 = vmul.f32 %v3602_v29, %v3602_v29 }
 0xebc   :  { %v662_v41 = vadd.f32 %v661_v1, %v660_v12 }
 0xebd   :  { %v668_v45 = vsel %vm659_vm12, %v666_v4, 0.0  ;;  %v669_v38 = vsel %vm659_vm12, %v667_v40, 0.0  ;;  %v2666_v4 = vld [vmem:[#allocation5] sm:$0xff] }
 0xebe   :  { %663 = vadd.xlane.f32.xlu2 %v662_v41  ;;  %v670_v35 = vadd.f32 %v669_v38, %v668_v45  ;;  %v720_v41 = vmul.f32 0.5, %v3031_v31  ;;  %v1902_v45 = vrot.slane %v3592_v52, 4  ;;  %v3666_v38 = vmul.f32 %v717_v53, %v3013_v22  ;;  %v2671_v53 = vld [vmem:[#allocation5 + $0x30] sm:$0xff] }
 0xec0   :  { %671 = vadd.xlane.f32.xlu1 %v670_v35 }
 0xed6   :  { %370 = vperm.xlu2 %2590, %v2662_v11  }
 0xed9   :  { %374 = vperm.xlu1 %2589, %v2663_v26   ;;  %v704_v26 = vmul.f32 0.31622776, %v3031_v31 }
 0xeda   :  { %v3620_v30 = vpop.f32.mrf.mxu0  ;;  %v3622_v24 = vpop.f32.mrf.mxu1 }
 0xede   :  { %1082 = vperm.xlu2 %2590, %v2664_v10   ;;  %v1091_v10 = vmul.f32 0.31622776, %v3157_v57 }
 0xee1   :  { %1470 = vperm.xlu1 %2589, %v2665_v37  }
 0xee2   :  { %v2219_v9 = vpop.f32.mrf.mxu0  ;;  %v2233_v8 = vpop.f32.mrf.mxu1 }
 0xee3   :  { %v3636_v14 = vadd.f32 %v2219_v9, %v2198_v46  ;;  %v3638_v7 = vadd.f32 %v2233_v8, %v2198_v46  ;;  %v2667_v46 = vld [vmem:[#allocation5 + $0x8] sm:$0xff] }
 0xee4   :  { %v3674_v37 = vmul.f32 %v2667_v46, %v702_v62  ;;  %v2668_v9 = vld [vmem:[#allocation8] sm:$0xff]  ;;  %v2672_v62 = vld [vmem:[#allocation5 + $0x18] sm:$0xff] }
 0xee5   :  { %v2315_v34 = vmul.f32 0.1, %v3636_v14  ;;  %v2316_v43 = vmul.f32 0.1, %v3638_v7 }
 0xee6   :  { %2592 = vset.pattern.permute.xlu2 %v2798_v60  ;;  %v701_v60 = vmul.f32 0.31622776, %v3013_v22 }
 0xee7   :  { %2193 = vperm.xlu2 %2592, %v3411_v51   ;;  %v2319_v18 = vsub.f32 %v2311_v42, %v2315_v34  ;;  %v2320_v6 = vsub.f32 %v2312_v47, %v2316_v43  ;;  %v2670_v34 = vld [vmem:[#allocation5 + $0x10] sm:$0xff]  ;;  %v1107_v43 = vmul.f32 0.5, %v3157_v57  ;;  %v1108_v47 = vmul.f32 0.5, %v3159_v2 }
 0xee8   :  { %v3661_v40 = vmul.f32 %v2666_v4, %v701_v60  ;;  %v1903_v60 = vadd.f32 %v1902_v45, %v3592_v52 }
 0xee9   :  { %2242 = vperm.xlu1 %2589, %v3411_v51   ;;  %2324 = vst [vmem:[#allocation8 + $0xb0] sm:$0xff] %v2319_v18  ;;  %v718_v51 = vmul.f32 0.5, %v3015_v15  ;;  %v1111_v45 = vmul.f32 %v1107_v43, %v3157_v57 }
 0xeea   :  { %2325 = vst [vmem:[#allocation8 + $0xb8] sm:$0xff] %v2320_v6  ;;  %v3685_v6 = vld [vmem:[#allocation5 + $0x80] sm:$0xff] }
 0xeeb   :  { %v3669_v35 = vmul.f32 %v718_v51, %v3015_v15  ;;  %v1909_v15 = vrot.slane %v3594_v50, 4  ;;  %v3695_v51 = vmul.f32 %v2671_v53, %v1091_v10  ;;  %v1112_v10 = vmul.f32 %v1108_v47, %v3159_v2  ;;  %v2674_v53 = vld [vmem:[#allocation5 + $0x50] sm:$0xff] }
 0xeef   :  { %2594 = vset.pattern.permute.xlu2 %v2799_v49  ;;  %v703_v49 = vmul.f32 0.31622776, %v3029_v28 }
 0xef0   :  { %2246 = vperm.xlu2 %2594, %v3406_v55   ;;  %v719_v55 = vmul.f32 0.5, %v3029_v28 }
 0xef1   :  { %v3677_v42 = vmul.f32 %v2670_v34, %v703_v49  ;;  %v1496_v49 = vmul.f32 0.5, %v3260_v54 }
 0xef2   :  { %v3683_v18 = vmul.f32 %v719_v55, %v3029_v28  ;;  %v1495_v28 = vmul.f32 0.5, %v3258_v56 }
 0xef3   :  { %v3717_v2 = vmul.f32 %v1496_v49, %v3260_v54 }
 0xef4   :  { %v3714_v57 = vmul.f32 %v1495_v28, %v3258_v56 }
 0xf31   :  { %v664_v25 = vpop.xlane.xlu2 %663 }
 0xf32   :  { %v3649_v63 = vmul.f32 0.00390625, %v664_v25  ;;  %v1479_v25 = vmul.f32 0.31622776, %v3258_v56  ;;  %v691_v56 = vrot.slane %v3596_v23, 1 }
 0xf33   :  { %v672_v16 = vpop.xlane.xlu1 %671 }
 0xf34   :  { %v673_v13 = vmul.f32 0.00390625, %v672_v16  ;;  %v674_v39 = vmul.f32 %v3649_v63, %v3649_v63  ;;  %v1480_v16 = vmul.f32 0.31622776, %v3260_v54 }
 0xf36   :  { %v675_v12 = vsub.f32 %v673_v13, %v674_v39  ;;  %v3691_v13 = vmul.f32 %v720_v41, %v3031_v31  ;;  %v3693_v39 = vld [vmem:[#allocation5 + $0x88] sm:$0xff]  ;;  %v2305_v31 = vmul.f32 0.31622776, %v3685_v6  ;;  %v1910_v41 = vadd.f32 %v1909_v15, %v3594_v50 }
 0xf38   :  { %v3659_v1 = vadd.f32 1e-05, %v675_v12  ;;  %v3697_v12 = vmul.f32 %v2672_v62, %v704_v26  ;;  %v2306_v26 = vmul.f32 0.31622776, %v3693_v39  ;;  %v3709_v62 = vmul.f32 %v2674_v53, %v1479_v25 }
 0xf39   :  { %v371_v11 = vpop.permute.xlu2 %370  ;;  %v3720_v0 = vadd.f32 %v2305_v31, %v3354_v59  ;;  %v1911_v25 = vrot.slane %v1910_v41, 2  ;;  %v2272_v59 = vmul.f32 0.5, %v3638_v7 }
 0xf3a   :  { %2644 = vrsqrt.f32 %v3659_v1  ;;  %v377_v8 = vsub.f32 %v2668_v9, %v371_v11  ;;  %v378_v22 = vsub.f32 %v2669_v17, %v371_v11  ;;  %v2673_v11 = vld [vmem:[#allocation5 + $0x38] sm:$0xff]  ;;  %v1904_v9 = vrot.slane %v1903_v60, 2 }
 0xf3b   :  { %v3701_v46 = vmul.f32 %v2673_v11, %v1092_v58  ;;  %v2675_v58 = vld [vmem:[#allocation5 + $0x58] sm:$0xff]  ;;  %vm685_vm14 = vweird.f32 %v3659_v1 }
 0xf3c   :  { %v709_v55 = vmul.f32 0.125, %v377_v8  ;;  %v710_v4 = vmul.f32 0.125, %v378_v22  ;;  %v3711_v11 = vmul.f32 %v2675_v58, %v1480_v16  ;;  %v3723_v58 = vadd.f32 %v2306_v26, %v3358_v27 }
 0xf3e   :  { %v713_v43 = vmul.f32 %v709_v55, %v377_v8  ;;  %v714_v47 = vmul.f32 %v710_v4, %v378_v22  ;;  %v2271_v8 = vmul.f32 0.5, %v3636_v14  ;;  %v3733_v4 = vadd.f32 %v1911_v25, %v1910_v41 }
 0xf40   :  { %v2645_v52 = vpop.eup %2644  ;;  %v725_v55 = vadd.f32 %v3666_v38, %v713_v43  ;;  %v726_v27 = vadd.f32 %v3669_v35, %v714_v47  ;;  %v677_v38 = vsub.f32 %v3602_v29, %v3649_v63 }
 0xf41   :  { %v680_v17 = vmul.f32 %v2645_v52, %v3659_v1  ;;  %v1083_v34 = vpop.permute.xlu2 %1082  ;;  %vm686_vm13 = vweird.f32 %v2645_v52 }
 0xf42   :  { %v1087_v44 = vsub.f32 %v2676_v21, %v1083_v34  ;;  %v1088_v50 = vsub.f32 %v2677_v33, %v1083_v34  ;;  %v3725_v21 = vadd.f32 %v1904_v9, %v1903_v60  ;;  %v695_v33 = vrot.slane %v3596_v23, 2  ;;  %vm687_vm15 = vmor %vm685_vm14, %vm686_vm13 }
 0xf43   :  { %v681_v15 = vmul.f32 %v2645_v52, %v680_v17  ;;  %v2255_v60 = vmul.f32 0.31622776, %v3636_v14  ;;  %v2256_v9 = vmul.f32 0.31622776, %v3638_v7 }
 0xf44   :  { %v1099_v53 = vmul.f32 0.125, %v1087_v44  ;;  %v1100_v16 = vmul.f32 0.125, %v1088_v50 }
 0xf45   :  { %v682_v54 = vmul.f32 0.5, %v681_v15  ;;  %v3747_v15 = vmul.f32 0.1, %v726_v27 }
 0xf46   :  { %v1103_v28 = vmul.f32 %v1099_v53, %v1087_v44  ;;  %v1104_v49 = vmul.f32 %v1100_v16, %v1088_v50  ;;  %v676_v44 = vsub.f32 %v3599_v19, %v3649_v63  ;;  %v3743_v50 = vmul.f32 %v2271_v8, %v3636_v14  ;;  %v2678_v14 = vld [vmem:[#allocation8 + $0x10] sm:$0xff] }
 0xf47   :  { %v683_v22 = vsub.f32 1.5, %v682_v54  ;;  %v3750_v19 = vmul.f32 %v2272_v59, %v3638_v7  ;;  %v3761_v16 = vmul.f32 %v2256_v9, %v3629_v32  ;;  %v3871_v7 = vsub.f32 %v3527_v48, %v3537_v3 }
 0xf48   :  { %v1115_v31 = vadd.f32 %v1111_v45, %v1103_v28  ;;  %v1116_v26 = vadd.f32 %v1112_v10, %v1104_v49  ;;  %v3745_v10 = vmul.f32 0.1, %v725_v55  ;;  %v734_v32 = vsub.f32 %v3674_v37, %v3747_v15  ;;  %v2679_v49 = vld [vmem:[#allocation8 + $0x18] sm:$0xff] }
 0xf49   :  { %v684_v17 = vmul.f32 %v2645_v52, %v683_v22  ;;  %v2194_v34 = vpop.permute.xlu2 %2193 }
 0xf4a   :  { %v1119_v35 = vmul.f32 0.1, %v1115_v31  ;;  %v1120_v41 = vmul.f32 0.1, %v1116_v26  ;;  %v3755_v63 = vadd.f32 %v3620_v30, %v2194_v34  ;;  %v3770_v30 = vadd.f32 %v3622_v24, %v2194_v34 }
 0xf4b   :  { %v688_v45 = vsel %vm687_vm15, %v2645_v52, %v684_v17  ;;  %v375_v43 = vpop.permute.xlu1 %374  ;;  %v3758_v52 = vmul.f32 %v2255_v60, %v3627_v20  ;;  %v733_v20 = vsub.f32 %v3661_v40, %v3745_v10  ;;  %v2680_v17 = vld [vmem:[#allocation8 + $0x90] sm:$0xff] }
 0xf4c   :  { %v689_v1 = vmul.f32 %v688_v45, %v676_v44  ;;  %v1123_v47 = vsub.f32 %v3695_v51, %v1119_v35  ;;  %v1124_v29 = vsub.f32 %v3701_v46, %v1120_v41  ;;  %v690_v25 = vmul.f32 %v688_v45, %v677_v38  ;;  %v2682_v10 = vld [vmem:[#allocation8 + $0x50] sm:$0xff] }
 0xf4d   :  { %v379_v53 = vsub.f32 %v2678_v14, %v375_v43  ;;  %v3872_v51 = vsub.f32 %v3529_v61, %v3539_v36  ;;  %v2253_v28 = vmul.f32 0.31622776, %v3755_v63  ;;  %v380_v8 = vsub.f32 %v2679_v49, %v375_v43  ;;  %v2683_v43 = vld [vmem:[#allocation8 + $0x58] sm:$0xff] }
 0xf4e   :  { %v1125_v54 = vadd.f32 %v1123_v47, %v3871_v7  ;;  %v693_v48 = vmul.f32 %v691_v56, %v689_v1  ;;  %v2254_v61 = vmul.f32 0.31622776, %v3770_v30  ;;  %v694_v36 = vmul.f32 %v691_v56, %v690_v25  ;;  %v2681_v56 = vld [vmem:[#allocation8 + $0x98] sm:$0xff] }
 0xf4f   :  { %v1132_v46 = vadd.f32 %v1124_v29, %v3872_v51  ;;  %v711_v59 = vmul.f32 0.125, %v379_v53  ;;  %v3779_v24 = vmul.f32 0.1, %v3755_v63  ;;  %v712_v55 = vmul.f32 0.125, %v380_v8 }
 0xf50   :  { %v1126_v3 = vrot.slane %v1125_v54, 4  ;;  %v3782_v26 = vmul.f32 0.1, %v3770_v30  ;;  %v3785_v37 = vmul.f32 %v2253_v28, %v3685_v6  ;;  %v3790_v41 = vadd.f32 %v695_v33, %v693_v48 }
 0xf51   :  { %v1133_v22 = vrot.slane %v1132_v46, 4  ;;  %v715_v27 = vmul.f32 %v711_v59, %v379_v53  ;;  %v2247_v60 = vpop.permute.xlu2 %2246  ;;  %v716_v9 = vmul.f32 %v712_v55, %v380_v8  ;;  %v2269_v59 = vmul.f32 0.5, %v3755_v63 }
 0xf52   :  { %v1127_v31 = vadd.f32 %v1126_v3, %v1125_v54  ;;  %v2251_v34 = vsub.f32 %v2680_v17, %v2247_v60  ;;  %v2252_v38 = vsub.f32 %v2681_v56, %v2247_v60 }
 0xf53   :  { %v1134_v40 = vadd.f32 %v1133_v22, %v1132_v46  ;;  %v727_v44 = vadd.f32 %v3683_v18, %v715_v27  ;;  %v1471_v35 = vpop.permute.xlu1 %1470  ;;  %v728_v6 = vadd.f32 %v3691_v13, %v716_v9  ;;  %v3795_v18 = vadd.f32 %v695_v33, %v694_v36  ;;  %v2684_v9 = vld [vmem:[#allocation8 + $0x80] sm:$0xff] }
 0xf54   :  { %v1128_v45 = vrot.slane %v1127_v31, 2  ;;  %v1475_v15 = vsub.f32 %v2682_v10, %v1471_v35  ;;  %v1476_v1 = vsub.f32 %v2683_v43, %v1471_v35  ;;  %v2263_v29 = vmul.f32 0.125, %v2251_v34 }
 0xf55   :  { %v731_v47 = vmul.f32 0.1, %v727_v44  ;;  %v2264_v25 = vmul.f32 0.125, %v2252_v38  ;;  %v1135_v14 = vrot.slane %v1134_v40, 2  ;;  %v732_v51 = vmul.f32 0.1, %v728_v6 }
 0xf56   :  { %v1487_v53 = vmul.f32 0.125, %v1475_v15  ;;  %v1488_v7 = vmul.f32 0.125, %v1476_v1  ;;  %v3797_v54 = vadd.f32 %v1128_v45, %v1127_v31  ;;  %v2267_v28 = vmul.f32 %v2263_v29, %v2251_v34  ;;  %v3876_v6 = vld [vmem:[#allocation16_spill] sm:$0xff] }
 0xf57   :  { %v735_v46 = vsub.f32 %v3677_v42, %v731_v47  ;;  %v3801_v13 = vmul.f32 %v2254_v61, %v3693_v39  ;;  %v736_v23 = vsub.f32 %v3697_v12, %v732_v51  ;;  %v2268_v48 = vmul.f32 %v2264_v25, %v2252_v38 }
 0xf58   :  { %v1491_v49 = vmul.f32 %v1487_v53, %v1475_v15  ;;  %v1492_v8 = vmul.f32 %v1488_v7, %v1476_v1  ;;  %v2279_v3 = vadd.f32 %v3743_v50, %v2267_v28  ;;  %v699_v22 = vmax.f32 %v3790_v41, 0.0  ;;  %v2685_v50 = vld [vmem:[#allocation8 + $0x88] sm:$0xff]  ;;  %v3875_v1 = vld [vmem:[#allocation14_spill] sm:$0xff] }
 0xf59   :  { %v737_v33 = vadd.f32 %v735_v46, %v733_v20  ;;  %v700_v36 = vmax.f32 %v3795_v18, 0.0  ;;  %v1130_v27 = vrot.slane %v3797_v54, 1  ;;  %v3811_v39 = vadd.f32 %v1135_v14, %v1134_v40 }
 0xf5a   :  { %v1503_v42 = vadd.f32 %v3714_v57, %v1491_v49  ;;  %v1504_v55 = vadd.f32 %v3717_v2, %v1492_v8  ;;  %v744_v60 = vadd.f32 %v736_v23, %v734_v32  ;;  %v2280_v38 = vadd.f32 %v3750_v19, %v2268_v48 }
 0xf5b   :  { %v738_v61 = vrot.slane %v737_v33, 4  ;;  %v2243_v31 = vpop.permute.xlu1 %2242  ;;  %v2283_v57 = vmul.f32 0.1, %v2279_v3  ;;  %v2270_v15 = vmul.f32 0.5, %v3770_v30  ;;  %v2273_v43 = vmul.f32 %v2269_v59, %v3755_v63 }
 0xf5c   :  { %v1507_v12 = vmul.f32 0.1, %v1503_v42  ;;  %v1508_v20 = vmul.f32 0.1, %v1504_v55  ;;  %v2249_v44 = vsub.f32 %v2684_v9, %v2243_v31  ;;  %v2250_v17 = vsub.f32 %v2685_v50, %v2243_v31 }
 0xf5d   :  { %v739_v34 = vadd.f32 %v738_v61, %v737_v33  ;;  %v745_v56 = vrot.slane %v744_v60, 4  ;;  %v3877_v47 = vsub.f32 %v3875_v1, %v3876_v6  ;;  %v2274_v7 = vmul.f32 %v2270_v15, %v3770_v30 }
 0xf5e   :  { %v1511_v2 = vsub.f32 %v3709_v62, %v1507_v12  ;;  %v1512_v35 = vsub.f32 %v3711_v11, %v1508_v20  ;;  %v2261_v40 = vmul.f32 0.125, %v2249_v44  ;;  %v2262_v45 = vmul.f32 0.125, %v2250_v17  ;;  %v3873_v62 = vld [vmem:[#allocation15_spill] sm:$0xff] }
 0xf5f   :  { %v740_v10 = vrot.slane %v739_v34, 2  ;;  %v746_v32 = vadd.f32 %v745_v56, %v744_v60  ;;  %v3874_v19 = vsub.f32 %v3546_v5, %v3873_v62  ;;  %v2317_v51 = vsub.f32 %v3720_v0, %v3779_v24 }
 0xf60   :  { %v1520_v29 = vadd.f32 %v1512_v35, %v3877_v47  ;;  %v2265_v25 = vmul.f32 %v2261_v40, %v2249_v44  ;;  %v2266_v14 = vmul.f32 %v2262_v45, %v2250_v17  ;;  %v2318_v5 = vsub.f32 %v3723_v58, %v3782_v26 }
 0xf61   :  { %v1513_v11 = vadd.f32 %v1511_v2, %v3874_v19  ;;  %v741_v53 = vadd.f32 %v740_v10, %v739_v34  ;;  %v747_v63 = vrot.slane %v746_v32, 2  ;;  %v2284_v23 = vmul.f32 0.1, %v2280_v38  ;;  %2322 = vst [vmem:[#allocation8 + $0xa0] sm:$0xff] %v2317_v51 }
 0xf62   :  { %v1521_v28 = vrot.slane %v1520_v29, 4  ;;  %v2277_v49 = vadd.f32 %v2273_v43, %v2265_v25  ;;  %v2278_v33 = vadd.f32 %v2274_v7, %v2266_v14  ;;  %v1137_v48 = vrot.slane %v3811_v39, 1  ;;  %2323 = vst [vmem:[#allocation8 + $0xa8] sm:$0xff] %v2318_v5 }
 0xf63   :  { %v1514_v46 = vrot.slane %v1513_v11, 4  ;;  %v742_v8 = vrot.slane %v741_v53, 1  ;;  %v748_v59 = vadd.f32 %v747_v63, %v746_v32  ;;  %v1131_v0 = vadd.f32 %v1130_v27, %v3797_v54  ;;  %2359 = dma.vmem_to_hbm [thread:$0]  %s2352_s4, 3072, %s2354_s14, [#allocation9], %s2791_s9, %s2791_s9, %s2792_s10  }
 0xf64   :  { %v1522_v30 = vadd.f32 %v1521_v28, %v1520_v29  ;;  %v2281_v42 = vmul.f32 0.1, %v2277_v49  ;;  %v2282_v61 = vmul.f32 0.1, %v2278_v33  ;;  %v2287_v58 = vsub.f32 %v3758_v52, %v2283_v57  ;;  %s2341_s9 = sshll.u32 %s2801_s7, 4  ;;  %s2342_s9 = int_to_ptr.vmem [resolvable:$true] %s2341_s9 }
 0xf65   :  { %v1515_v3 = vadd.f32 %v1514_v46, %v1513_v11  ;;  %v743_v24 = vadd.f32 %v742_v8, %v741_v53  ;;  %v749_v55 = vrot.slane %v748_v59, 1  ;;  %v2288_v20 = vsub.f32 %v3761_v16, %v2284_v23 }
 0xf66   :  { %v1523_v60 = vrot.slane %v1522_v30, 2  ;;  %v2285_v31 = vsub.f32 %v3785_v37, %v2281_v42  ;;  %v2286_v9 = vsub.f32 %v3801_v13, %v2282_v61  ;;  %v1906_v17 = vrot.slane %v3725_v21, 1 }
 0xf67   :  { %v1516_v26 = vrot.slane %v1515_v3, 2  ;;  %v750_v12 = vadd.f32 %v749_v55, %v748_v59  ;;  %v751_v54 = vadd.f32 %v743_v24, %v699_v22  ;;  %v1138_v34 = vadd.f32 %v1137_v48, %v3811_v39 }
 0xf68   :  { %v1524_v44 = vadd.f32 %v1523_v60, %v1522_v30  ;;  %v2289_v50 = vadd.f32 %v2287_v58, %v2285_v31  ;;  %v2296_v56 = vadd.f32 %v2288_v20, %v2286_v9  ;;  %v1913_v38 = vrot.slane %v3733_v4, 1 }
 0xf69   :  { %v1517_v27 = vadd.f32 %v1516_v26, %v1515_v3  ;;  %v752_v52 = vadd.f32 %v750_v12, %v700_v36  ;;  %v1139_v37 = vadd.f32 %v1131_v0, %v751_v54  ;;  %v1907_v10 = vadd.f32 %v1906_v17, %v3725_v21 }
 0xf6a   :  { %v1525_v57 = vrot.slane %v1524_v44, 1  ;;  %v2290_v13 = vrot.slane %v2289_v50, 4  ;;  %v2297_v2 = vrot.slane %v2296_v56, 4  ;;  %v1914_v18 = vadd.f32 %v1913_v38, %v3733_v4 }
 0xf6b   :  { %v1518_v16 = vrot.slane %v1517_v27, 1  ;;  %v1140_v41 = vadd.f32 %v1138_v34, %v752_v52  ;;  %v2331_v25 = vlaneseq }
 0xf6c   :  { %v1526_v22 = vadd.f32 %v1525_v57, %v1524_v44  ;;  %v2291_v35 = vadd.f32 %v2290_v13, %v2289_v50  ;;  %v2298_v45 = vadd.f32 %v2297_v2, %v2296_v56 }
 0xf6d   :  { %v1519_v40 = vadd.f32 %v1518_v16, %v1517_v27  ;;  %vm2333_vm1 = vcmp.lt.s32.totalorder %v2331_v25, 256 }
 0xf6e   :  { %v2292_v32 = vrot.slane %v2291_v35, 2  ;;  %v1528_v15 = vadd.f32 %v1526_v22, %v1140_v41  ;;  %v2299_v36 = vrot.slane %v2298_v45, 2 }
 0xf6f   :  { %v1527_v39 = vadd.f32 %v1519_v40, %v1139_v37 }
 0xf70   :  { %v2293_v43 = vadd.f32 %v2292_v32, %v2291_v35  ;;  %v1916_v19 = vadd.f32 %v1914_v18, %v1528_v15  ;;  %v2300_v11 = vadd.f32 %v2299_v36, %v2298_v45 }
 0xf71   :  { %v1915_v62 = vadd.f32 %v1907_v10, %v1527_v39 }
 0xf72   :  { %v2294_v1 = vrot.slane %v2293_v43, 1  ;;  %v2301_v6 = vrot.slane %v2300_v11, 1 }
 0xf74   :  { %v2295_v47 = vadd.f32 %v2294_v1, %v2293_v43  ;;  %v2302_v29 = vadd.f32 %v2301_v6, %v2300_v11 }
 0xf76   :  { %v2304_v14 = vadd.f32 %v2302_v29, %v1916_v19  ;;  %v2303_v21 = vadd.f32 %v2295_v47, %v1915_v62 }
 0xf78   :  { %v2328_v53 = vrot.slane %v2304_v14, 7 }
 0xf7a   :  { %v2329_v4 = vsel %vm659_vm12, %v2303_v21, %v2328_v53 }
 0xf7b   :  { %2335 = vst.msk [vmem:[#allocation7] sm:$0x3] %vm2333_vm1, %v2329_v4 }
 0xf7c   :  { %2346 = dma.vmem_to_hbm [thread:$0]  %s2342_s9, 32, %s2344_s16, [#allocation4]  }
 0xf7d   :  { %2786 = dma.done.wait [#allocation4], 32  }
 0xf7e   :  { %2787 = vsyncadd [#allocation4], 4294967264 }
 0xf7f   :  { %2788 = dma.done.wait [#allocation9], 3072  }
 0xf80   :  { %2789 = vsyncadd [#allocation9], 4294964224 }
 0xf81   :  { %2368 = vsyncpa [#allocation3], 1 }
 0xf82   :  { %2369 = vsyncpa [#allocation6], 1 }
 0xf83   :  { %2370 = vsyncpa [#allocation4], 1 }
 0xf84   :  { %2371 = vsyncpa [#allocation9], 1 }

</bundles_post_ra>
